<compile_context>
chip_gen: v5e
topology: v5e:2x2
jax: 0.10.0
libtpu: 0.0.40
codegen_flags: <defaults>
</compile_context>

<pallas_src>
import functools

import jax
import jax.numpy as jnp
from jax import lax
from jax.experimental import pallas as pl
from jax.experimental.pallas import tpu as pltpu

BN_EPS = 1e-5
LEAKY_SLOPE = 0.01
LANE = 128


def _round_up(n, m):
    return ((n + m - 1) // m) * m


def _leaky_relu(z):
    return jnp.where(z > 0, z, LEAKY_SLOPE * z)


# ---------------------------------------------------------------------------
# Kernel
# ---------------------------------------------------------------------------
def resid_deriv_kernel(x_ref, w_in_ref, b_in_ref,
                       bn_s_ref, bn_t_ref,
                       w1_ref, b1_ref, w2_ref, b2_ref,
                       w_hid_ref, b_hid_ref, w_out_ref, b_out_ref,
                       o_ref):
    # x tile is bf16 [tb, nv_p]; all matmuls take bf16 inputs, accumulate f32.
    x = x_ref[...]

    # input_layer
    h = jnp.dot(x, w_in_ref[...], preferred_element_type=jnp.float32) + b_in_ref[...]
    residual = h

    n_blocks = bn_s_ref.shape[0]
    for i in range(n_blocks):  # unrolled at trace time (static block count)
        # BatchNorm1d (eval), pre-folded: xb = h * scale + shift
        xb = h * bn_s_ref[i] + bn_t_ref[i]
        z = jnp.dot(xb.astype(jnp.bfloat16), w1_ref[i],
                    preferred_element_type=jnp.float32) + b1_ref[i]
        z = _leaky_relu(z)
        # Dropout(p=0.4): identity in eval
        z = jnp.dot(z.astype(jnp.bfloat16), w2_ref[i],
                    preferred_element_type=jnp.float32) + b2_ref[i]
        z = _leaky_relu(z)
        h = jnp.maximum(z + xb, 0.0)  # ReLU(block + residual)

    h = h + residual

    # hidden_layer: Linear -> ReLU -> Dropout(0.01) [identity]
    z = jnp.dot(h.astype(jnp.bfloat16), w_hid_ref[...],
                preferred_element_type=jnp.float32) + b_hid_ref[...]
    z = jnp.maximum(z, 0.0)

    # output_layer: Linear -> Sigmoid (reciprocal on the EUP slot)
    z = jnp.dot(z.astype(jnp.bfloat16), w_out_ref[...],
                preferred_element_type=jnp.float32) + b_out_ref[...]
    o_ref[...] = pl.reciprocal(1.0 + jnp.exp(-z), approx=True).astype(o_ref.dtype)


# ---------------------------------------------------------------------------
# Parameter construction / preparation
# ---------------------------------------------------------------------------
def init_params(key, n_vars, n_output, n_blocks, size_internal):
    """Deterministic f32 parameters (PyTorch-Linear-style uniform ranges)."""
    H = size_internal
    H2 = 2 * size_internal

    def lin(k, fan_in, fan_out):
        k1, k2 = jax.random.split(k)
        bound = 1.0 / jnp.sqrt(float(fan_in))
        w = jax.random.uniform(k1, (fan_in, fan_out), jnp.float32, -bound, bound)
        b = jax.random.uniform(k2, (1, fan_out), jnp.float32, -bound, bound)
        return w, b

    keys = jax.random.split(key, 3 + 2 * n_blocks)
    w_in, b_in = lin(keys[0], n_vars, H)
    w_hid, b_hid = lin(keys[1], H, H2)
    w_out, b_out = lin(keys[2], H2, n_output)

    w1s, b1s, w2s, b2s = [], [], [], []
    for i in range(n_blocks):
        w1, b1 = lin(keys[3 + 2 * i], H, H2)
        w2, b2 = lin(keys[4 + 2 * i], H2, H)
        w1s.append(w1); b1s.append(b1); w2s.append(w2); b2s.append(b2)

    return dict(
        w_in=w_in, b_in=b_in,
        bn_gamma=jnp.ones((n_blocks, 1, H), jnp.float32),
        bn_beta=jnp.zeros((n_blocks, 1, H), jnp.float32),
        bn_mean=jnp.zeros((n_blocks, 1, H), jnp.float32),
        bn_var=jnp.ones((n_blocks, 1, H), jnp.float32),
        w1=jnp.stack(w1s), b1=jnp.stack(b1s),
        w2=jnp.stack(w2s), b2=jnp.stack(b2s),
        w_hid=w_hid, b_hid=b_hid,
        w_out=w_out, b_out=b_out,
    )


def prepare_params(params):
    """One-time prep: pad feature dims to 128 lanes, fold BN, cast weights to bf16."""
    n_vars, H = params["w_in"].shape
    H2 = params["w_hid"].shape[1]
    n_out = params["w_out"].shape[1]
    nv_p, Hp, H2p, no_p = (_round_up(d, LANE) for d in (n_vars, H, H2, n_out))

    def pad_w(w, r, c):  # zero-pad last two dims, cast to bf16 (MXU inputs)
        pad = [(0, 0)] * (w.ndim - 2) + [(0, r - w.shape[-2]), (0, c - w.shape[-1])]
        return jnp.pad(w, pad).astype(jnp.bfloat16)

    def pad_v(v, c):     # zero-pad last dim, keep f32 (biases / BN scale-shift)
        pad = [(0, 0)] * (v.ndim - 1) + [(0, c - v.shape[-1])]
        return jnp.pad(v, pad).astype(jnp.float32)

    # Fold BN: scale = gamma / sqrt(var + eps), shift = beta - mean * scale.
    # Zero-padded scale/shift keep padded lanes exactly zero through the blocks.
    scale = params["bn_gamma"] * lax.rsqrt(params["bn_var"] + BN_EPS)
    shift = params["bn_beta"] - params["bn_mean"] * scale

    return dict(
        w_in=pad_w(params["w_in"], nv_p, Hp), b_in=pad_v(params["b_in"], Hp),
        bn_scale=pad_v(scale, Hp), bn_shift=pad_v(shift, Hp),
        w1=pad_w(params["w1"], Hp, H2p), b1=pad_v(params["b1"], H2p),
        w2=pad_w(params["w2"], H2p, Hp), b2=pad_v(params["b2"], Hp),
        w_hid=pad_w(params["w_hid"], Hp, H2p), b_hid=pad_v(params["b_hid"], H2p),
        w_out=pad_w(params["w_out"], H2p, no_p), b_out=pad_v(params["b_out"], no_p),
    )


# ---------------------------------------------------------------------------
# Wrapper
# ---------------------------------------------------------------------------
@functools.partial(jax.jit, static_argnames=("n_output", "batch_tile"))
def resid_deriv_estimator(x, prepped, n_output, batch_tile=256):
    B, n_vars = x.shape
    nv_p, Hp = prepped["w_in"].shape
    H2p = prepped["w_hid"].shape[1]
    no_p = prepped["w_out"].shape[1]

    # Batch tiling: tb rows per grid step (multiple of 8 sublanes); pad B up.
    tb = _round_up(min(batch_tile, B), 8)
    Bp = _round_up(B, tb)
    grid = Bp // tb

    xp = jnp.pad(x, ((0, Bp - B), (0, nv_p - n_vars))).astype(jnp.bfloat16)

    arg_order = ("w_in", "b_in", "bn_scale", "bn_shift",
                 "w1", "b1", "w2", "b2", "w_hid", "b_hid", "w_out", "b_out")
    weight_args = [prepped[k] for k in arg_order]

    def rep(arr):
        # full-array block, constant index across the batch grid
        return pl.BlockSpec(arr.shape, lambda i, _r=arr.ndim: (0,) * _r)

    # Explicit VMEM budget: 2x weights (auto double-buffer), 2x x/out tiles,
    # plus f32 intermediates; capped at 64 MiB so the same budget fits v7x.
    weight_bytes = sum(int(a.size) * a.dtype.itemsize for a in weight_args)
    act_bytes = 2 * tb * (nv_p * 2 + no_p * 4)
    work_bytes = 8 * tb * H2p * 4
    vmem_limit = int(min(max(2 * weight_bytes + act_bytes + work_bytes + (8 << 20),
                             32 << 20), 64 << 20))

    grid_spec = pltpu.PrefetchScalarGridSpec(
        num_scalar_prefetch=0,
        grid=(grid,),
        in_specs=[pl.BlockSpec((tb, nv_p), lambda i: (i, 0))]
                 + [rep(a) for a in weight_args],
        out_specs=pl.BlockSpec((tb, no_p), lambda i: (i, 0)),
    )

    out = pl.pallas_call(
        resid_deriv_kernel,
        out_shape=jax.ShapeDtypeStruct((Bp, no_p), jnp.float32),
        grid_spec=grid_spec,
        compiler_params=pltpu.CompilerParams(
            dimension_semantics=("parallel",),
            vmem_limit_bytes=vmem_limit),
    )(xp, *weight_args)

    return out[:B, :n_output]


# ---------------------------------------------------------------------------
# Plain-JAX reference (eval mode, bf16 matmul inputs to match kernel)
# ---------------------------------------------------------------------------
def reference_forward(x, params):
    def mm(a, w):
        return jnp.dot(a.astype(jnp.bfloat16), w.astype(jnp.bfloat16),
                       preferred_element_type=jnp.float32)

    h = mm(x, params["w_in"]) + params["b_in"]
    residual = h
    n_blocks = params["w1"].shape[0]
    for i in range(n_blocks):
        xb = (h - params["bn_mean"][i]) * lax.rsqrt(params["bn_var"][i] + BN_EPS)
        xb = xb * params["bn_gamma"][i] + params["bn_beta"][i]
        z = _leaky_relu(mm(xb, params["w1"][i]) + params["b1"][i])
        z = _leaky_relu(mm(z, params["w2"][i]) + params["b2"][i])
        h = jnp.maximum(z + xb, 0.0)
    h = h + residual
    z = jnp.maximum(mm(h, params["w_hid"]) + params["b_hid"], 0.0)
    z = mm(z, params["w_out"]) + params["b_out"]
    return jax.nn.sigmoid(z)


if __name__ == "__main__":
    # x is [batch, n_vars]; non-divisible batch exercises padding + multi-step grid.
    B, n_vars, n_output, n_blocks, size_internal = 1000, 16, 8, 2, 32

    key = jax.random.PRNGKey(0)
    k_x, k_p = jax.random.split(key)
    x = jax.random.normal(k_x, (B, n_vars), jnp.float32)
    params = init_params(k_p, n_vars, n_output, n_blocks, size_internal)
    prepped = prepare_params(params)

    out = resid_deriv_estimator(x, prepped, n_output)
    out = jax.block_until_ready(out)

    ref = reference_forward(x, params)
    assert out.shape == (B, n_output)
    max_err = float(jnp.max(jnp.abs(out - ref)))
    assert max_err < 5e-3, f"mismatch vs reference: max abs err = {max_err}"

    print("KERNEL_OK")
</pallas_src>

<mosaic_0001>
module attributes {stable_mosaic.version = 11 : i64} {
  func.func @resid_deriv_kernel(%arg0: i32, %arg1: memref<256x128xbf16, #tpu.memory_space<vmem>>, %arg2: memref<128x128xbf16, #tpu.memory_space<vmem>>, %arg3: memref<1x128xf32, #tpu.memory_space<vmem>>, %arg4: memref<2x1x128xf32, #tpu.memory_space<vmem>>, %arg5: memref<2x1x128xf32, #tpu.memory_space<vmem>>, %arg6: memref<2x128x128xbf16, #tpu.memory_space<vmem>>, %arg7: memref<2x1x128xf32, #tpu.memory_space<vmem>>, %arg8: memref<2x128x128xbf16, #tpu.memory_space<vmem>>, %arg9: memref<2x1x128xf32, #tpu.memory_space<vmem>>, %arg10: memref<128x128xbf16, #tpu.memory_space<vmem>>, %arg11: memref<1x128xf32, #tpu.memory_space<vmem>>, %arg12: memref<128x128xbf16, #tpu.memory_space<vmem>>, %arg13: memref<1x128xf32, #tpu.memory_space<vmem>>, %arg14: memref<256x128xf32, #tpu.memory_space<vmem>>) attributes {dimension_semantics = [#tpu.dimension_semantics<parallel>], iteration_bounds = array<i64: 4>, scalar_prefetch = 0 : i64, scratch_operands = 0 : i64, tpu.core_type = #tpu.core_type<tc>, window_params = [{transform_indices = @transform_0, window_bounds = array<i64: 256, 128>}, {pipeline_mode = #tpu.pipeline_mode<synchronous>, transform_indices = @transform_1, window_bounds = array<i64: 128, 128>}, {pipeline_mode = #tpu.pipeline_mode<synchronous>, transform_indices = @transform_2, window_bounds = array<i64: 1, 128>}, {pipeline_mode = #tpu.pipeline_mode<synchronous>, transform_indices = @transform_3, window_bounds = array<i64: 2, 1, 128>}, {pipeline_mode = #tpu.pipeline_mode<synchronous>, transform_indices = @transform_4, window_bounds = array<i64: 2, 1, 128>}, {pipeline_mode = #tpu.pipeline_mode<synchronous>, transform_indices = @transform_5, window_bounds = array<i64: 2, 128, 128>}, {pipeline_mode = #tpu.pipeline_mode<synchronous>, transform_indices = @transform_6, window_bounds = array<i64: 2, 1, 128>}, {pipeline_mode = #tpu.pipeline_mode<synchronous>, transform_indices = @transform_7, window_bounds = array<i64: 2, 128, 128>}, {pipeline_mode = #tpu.pipeline_mode<synchronous>, transform_indices = @transform_8, window_bounds = array<i64: 2, 1, 128>}, {pipeline_mode = #tpu.pipeline_mode<synchronous>, transform_indices = @transform_9, window_bounds = array<i64: 128, 128>}, {pipeline_mode = #tpu.pipeline_mode<synchronous>, transform_indices = @transform_10, window_bounds = array<i64: 1, 128>}, {pipeline_mode = #tpu.pipeline_mode<synchronous>, transform_indices = @transform_11, window_bounds = array<i64: 128, 128>}, {pipeline_mode = #tpu.pipeline_mode<synchronous>, transform_indices = @transform_12, window_bounds = array<i64: 1, 128>}, {transform_indices = @transform_13, window_bounds = array<i64: 256, 128>}]} {
    %c0 = arith.constant 0 : index
    %c0_0 = arith.constant 0 : index
    %0 = vector.load %arg1[%c0, %c0_0] : memref<256x128xbf16, #tpu.memory_space<vmem>>, vector<256x128xbf16>
    %c0_1 = arith.constant 0 : index
    %c0_2 = arith.constant 0 : index
    %1 = vector.load %arg2[%c0_1, %c0_2] : memref<128x128xbf16, #tpu.memory_space<vmem>>, vector<128x128xbf16>
    %cst = arith.constant dense<0.000000e+00> : vector<256x128xf32>
    %2 = tpu.matmul %0, %1, %cst {dimension_numbers = #tpu.dot_dimension_numbers<[1], [0], [0], [1], [0, 0, 1, 1], [], []>} : vector<256x128xbf16>, vector<128x128xbf16>, vector<256x128xf32> -> vector<256x128xf32>
    %c0_3 = arith.constant 0 : index
    %c0_4 = arith.constant 0 : index
    %3 = vector.load %arg3[%c0_3, %c0_4] : memref<1x128xf32, #tpu.memory_space<vmem>>, vector<1x128xf32>
    %4 = vector.broadcast %3 : vector<1x128xf32> to vector<256x128xf32>
    %5 = arith.addf %2, %4 : vector<256x128xf32>
    %c0_5 = arith.constant 0 : index
    %c0_6 = arith.constant 0 : index
    %c0_7 = arith.constant 0 : index
    %6 = vector.load %arg4[%c0_5, %c0_6, %c0_7] : memref<2x1x128xf32, #tpu.memory_space<vmem>>, vector<1x1x128xf32>
    %7 = vector.shape_cast %6 : vector<1x1x128xf32> to vector<1x128xf32>
    %8 = vector.broadcast %7 : vector<1x128xf32> to vector<256x128xf32>
    %9 = arith.mulf %5, %8 : vector<256x128xf32>
    %c0_8 = arith.constant 0 : index
    %c0_9 = arith.constant 0 : index
    %c0_10 = arith.constant 0 : index
    %10 = vector.load %arg5[%c0_8, %c0_9, %c0_10] : memref<2x1x128xf32, #tpu.memory_space<vmem>>, vector<1x1x128xf32>
    %11 = vector.shape_cast %10 : vector<1x1x128xf32> to vector<1x128xf32>
    %12 = vector.broadcast %11 : vector<1x128xf32> to vector<256x128xf32>
    %13 = arith.addf %9, %12 : vector<256x128xf32>
    %14 = arith.truncf %13 : vector<256x128xf32> to vector<256x128xbf16>
    %c0_11 = arith.constant 0 : index
    %c0_12 = arith.constant 0 : index
    %c0_13 = arith.constant 0 : index
    %15 = vector.load %arg6[%c0_11, %c0_12, %c0_13] : memref<2x128x128xbf16, #tpu.memory_space<vmem>>, vector<1x128x128xbf16>
    %16 = vector.shape_cast %15 : vector<1x128x128xbf16> to vector<128x128xbf16>
    %cst_14 = arith.constant dense<0.000000e+00> : vector<256x128xf32>
    %17 = tpu.matmul %14, %16, %cst_14 {dimension_numbers = #tpu.dot_dimension_numbers<[1], [0], [0], [1], [0, 0, 1, 1], [], []>} : vector<256x128xbf16>, vector<128x128xbf16>, vector<256x128xf32> -> vector<256x128xf32>
    %c0_15 = arith.constant 0 : index
    %c0_16 = arith.constant 0 : index
    %c0_17 = arith.constant 0 : index
    %18 = vector.load %arg7[%c0_15, %c0_16, %c0_17] : memref<2x1x128xf32, #tpu.memory_space<vmem>>, vector<1x1x128xf32>
    %19 = vector.shape_cast %18 : vector<1x1x128xf32> to vector<1x128xf32>
    %20 = vector.broadcast %19 : vector<1x128xf32> to vector<256x128xf32>
    %21 = arith.addf %17, %20 : vector<256x128xf32>
    %cst_18 = arith.constant 0.000000e+00 : f32
    %22 = vector.broadcast %cst_18 : f32 to vector<256x128xf32>
    %23 = arith.cmpf ogt, %21, %22 : vector<256x128xf32>
    %cst_19 = arith.constant 0.00999999977 : f32
    %24 = vector.broadcast %cst_19 : f32 to vector<256x128xf32>
    %25 = arith.mulf %24, %21 : vector<256x128xf32>
    %26 = arith.select %23, %21, %25 : vector<256x128xi1>, vector<256x128xf32>
    %27 = arith.truncf %26 : vector<256x128xf32> to vector<256x128xbf16>
    %c0_20 = arith.constant 0 : index
    %c0_21 = arith.constant 0 : index
    %c0_22 = arith.constant 0 : index
    %28 = vector.load %arg8[%c0_20, %c0_21, %c0_22] : memref<2x128x128xbf16, #tpu.memory_space<vmem>>, vector<1x128x128xbf16>
    %29 = vector.shape_cast %28 : vector<1x128x128xbf16> to vector<128x128xbf16>
    %cst_23 = arith.constant dense<0.000000e+00> : vector<256x128xf32>
    %30 = tpu.matmul %27, %29, %cst_23 {dimension_numbers = #tpu.dot_dimension_numbers<[1], [0], [0], [1], [0, 0, 1, 1], [], []>} : vector<256x128xbf16>, vector<128x128xbf16>, vector<256x128xf32> -> vector<256x128xf32>
    %c0_24 = arith.constant 0 : index
    %c0_25 = arith.constant 0 : index
    %c0_26 = arith.constant 0 : index
    %31 = vector.load %arg9[%c0_24, %c0_25, %c0_26] : memref<2x1x128xf32, #tpu.memory_space<vmem>>, vector<1x1x128xf32>
    %32 = vector.shape_cast %31 : vector<1x1x128xf32> to vector<1x128xf32>
    %33 = vector.broadcast %32 : vector<1x128xf32> to vector<256x128xf32>
    %34 = arith.addf %30, %33 : vector<256x128xf32>
    %cst_27 = arith.constant 0.000000e+00 : f32
    %35 = vector.broadcast %cst_27 : f32 to vector<256x128xf32>
    %36 = arith.cmpf ogt, %34, %35 : vector<256x128xf32>
    %cst_28 = arith.constant 0.00999999977 : f32
    %37 = vector.broadcast %cst_28 : f32 to vector<256x128xf32>
    %38 = arith.mulf %37, %34 : vector<256x128xf32>
    %39 = arith.select %36, %34, %38 : vector<256x128xi1>, vector<256x128xf32>
    %40 = arith.addf %39, %13 : vector<256x128xf32>
    %cst_29 = arith.constant 0.000000e+00 : f32
    %41 = vector.broadcast %cst_29 : f32 to vector<256x128xf32>
    %42 = arith.maximumf %40, %41 : vector<256x128xf32>
    %c1 = arith.constant 1 : index
    %c0_30 = arith.constant 0 : index
    %c0_31 = arith.constant 0 : index
    %43 = vector.load %arg4[%c1, %c0_30, %c0_31] : memref<2x1x128xf32, #tpu.memory_space<vmem>>, vector<1x1x128xf32>
    %44 = vector.shape_cast %43 : vector<1x1x128xf32> to vector<1x128xf32>
    %45 = vector.broadcast %44 : vector<1x128xf32> to vector<256x128xf32>
    %46 = arith.mulf %42, %45 : vector<256x128xf32>
    %c1_32 = arith.constant 1 : index
    %c0_33 = arith.constant 0 : index
    %c0_34 = arith.constant 0 : index
    %47 = vector.load %arg5[%c1_32, %c0_33, %c0_34] : memref<2x1x128xf32, #tpu.memory_space<vmem>>, vector<1x1x128xf32>
    %48 = vector.shape_cast %47 : vector<1x1x128xf32> to vector<1x128xf32>
    %49 = vector.broadcast %48 : vector<1x128xf32> to vector<256x128xf32>
    %50 = arith.addf %46, %49 : vector<256x128xf32>
    %51 = arith.truncf %50 : vector<256x128xf32> to vector<256x128xbf16>
    %c1_35 = arith.constant 1 : index
    %c0_36 = arith.constant 0 : index
    %c0_37 = arith.constant 0 : index
    %52 = vector.load %arg6[%c1_35, %c0_36, %c0_37] : memref<2x128x128xbf16, #tpu.memory_space<vmem>>, vector<1x128x128xbf16>
    %53 = vector.shape_cast %52 : vector<1x128x128xbf16> to vector<128x128xbf16>
    %cst_38 = arith.constant dense<0.000000e+00> : vector<256x128xf32>
    %54 = tpu.matmul %51, %53, %cst_38 {dimension_numbers = #tpu.dot_dimension_numbers<[1], [0], [0], [1], [0, 0, 1, 1], [], []>} : vector<256x128xbf16>, vector<128x128xbf16>, vector<256x128xf32> -> vector<256x128xf32>
    %c1_39 = arith.constant 1 : index
    %c0_40 = arith.constant 0 : index
    %c0_41 = arith.constant 0 : index
    %55 = vector.load %arg7[%c1_39, %c0_40, %c0_41] : memref<2x1x128xf32, #tpu.memory_space<vmem>>, vector<1x1x128xf32>
    %56 = vector.shape_cast %55 : vector<1x1x128xf32> to vector<1x128xf32>
    %57 = vector.broadcast %56 : vector<1x128xf32> to vector<256x128xf32>
    %58 = arith.addf %54, %57 : vector<256x128xf32>
    %cst_42 = arith.constant 0.000000e+00 : f32
    %59 = vector.broadcast %cst_42 : f32 to vector<256x128xf32>
    %60 = arith.cmpf ogt, %58, %59 : vector<256x128xf32>
    %cst_43 = arith.constant 0.00999999977 : f32
    %61 = vector.broadcast %cst_43 : f32 to vector<256x128xf32>
    %62 = arith.mulf %61, %58 : vector<256x128xf32>
    %63 = arith.select %60, %58, %62 : vector<256x128xi1>, vector<256x128xf32>
    %64 = arith.truncf %63 : vector<256x128xf32> to vector<256x128xbf16>
    %c1_44 = arith.constant 1 : index
    %c0_45 = arith.constant 0 : index
    %c0_46 = arith.constant 0 : index
    %65 = vector.load %arg8[%c1_44, %c0_45, %c0_46] : memref<2x128x128xbf16, #tpu.memory_space<vmem>>, vector<1x128x128xbf16>
    %66 = vector.shape_cast %65 : vector<1x128x128xbf16> to vector<128x128xbf16>
    %cst_47 = arith.constant dense<0.000000e+00> : vector<256x128xf32>
    %67 = tpu.matmul %64, %66, %cst_47 {dimension_numbers = #tpu.dot_dimension_numbers<[1], [0], [0], [1], [0, 0, 1, 1], [], []>} : vector<256x128xbf16>, vector<128x128xbf16>, vector<256x128xf32> -> vector<256x128xf32>
    %c1_48 = arith.constant 1 : index
    %c0_49 = arith.constant 0 : index
    %c0_50 = arith.constant 0 : index
    %68 = vector.load %arg9[%c1_48, %c0_49, %c0_50] : memref<2x1x128xf32, #tpu.memory_space<vmem>>, vector<1x1x128xf32>
    %69 = vector.shape_cast %68 : vector<1x1x128xf32> to vector<1x128xf32>
    %70 = vector.broadcast %69 : vector<1x128xf32> to vector<256x128xf32>
    %71 = arith.addf %67, %70 : vector<256x128xf32>
    %cst_51 = arith.constant 0.000000e+00 : f32
    %72 = vector.broadcast %cst_51 : f32 to vector<256x128xf32>
    %73 = arith.cmpf ogt, %71, %72 : vector<256x128xf32>
    %cst_52 = arith.constant 0.00999999977 : f32
    %74 = vector.broadcast %cst_52 : f32 to vector<256x128xf32>
    %75 = arith.mulf %74, %71 : vector<256x128xf32>
    %76 = arith.select %73, %71, %75 : vector<256x128xi1>, vector<256x128xf32>
    %77 = arith.addf %76, %50 : vector<256x128xf32>
    %cst_53 = arith.constant 0.000000e+00 : f32
    %78 = vector.broadcast %cst_53 : f32 to vector<256x128xf32>
    %79 = arith.maximumf %77, %78 : vector<256x128xf32>
    %80 = arith.addf %79, %5 : vector<256x128xf32>
    %81 = arith.truncf %80 : vector<256x128xf32> to vector<256x128xbf16>
    %c0_54 = arith.constant 0 : index
    %c0_55 = arith.constant 0 : index
    %82 = vector.load %arg10[%c0_54, %c0_55] : memref<128x128xbf16, #tpu.memory_space<vmem>>, vector<128x128xbf16>
    %cst_56 = arith.constant dense<0.000000e+00> : vector<256x128xf32>
    %83 = tpu.matmul %81, %82, %cst_56 {dimension_numbers = #tpu.dot_dimension_numbers<[1], [0], [0], [1], [0, 0, 1, 1], [], []>} : vector<256x128xbf16>, vector<128x128xbf16>, vector<256x128xf32> -> vector<256x128xf32>
    %c0_57 = arith.constant 0 : index
    %c0_58 = arith.constant 0 : index
    %84 = vector.load %arg11[%c0_57, %c0_58] : memref<1x128xf32, #tpu.memory_space<vmem>>, vector<1x128xf32>
    %85 = vector.broadcast %84 : vector<1x128xf32> to vector<256x128xf32>
    %86 = arith.addf %83, %85 : vector<256x128xf32>
    %cst_59 = arith.constant 0.000000e+00 : f32
    %87 = vector.broadcast %cst_59 : f32 to vector<256x128xf32>
    %88 = arith.maximumf %86, %87 : vector<256x128xf32>
    %89 = arith.truncf %88 : vector<256x128xf32> to vector<256x128xbf16>
    %c0_60 = arith.constant 0 : index
    %c0_61 = arith.constant 0 : index
    %90 = vector.load %arg12[%c0_60, %c0_61] : memref<128x128xbf16, #tpu.memory_space<vmem>>, vector<128x128xbf16>
    %cst_62 = arith.constant dense<0.000000e+00> : vector<256x128xf32>
    %91 = tpu.matmul %89, %90, %cst_62 {dimension_numbers = #tpu.dot_dimension_numbers<[1], [0], [0], [1], [0, 0, 1, 1], [], []>} : vector<256x128xbf16>, vector<128x128xbf16>, vector<256x128xf32> -> vector<256x128xf32>
    %c0_63 = arith.constant 0 : index
    %c0_64 = arith.constant 0 : index
    %92 = vector.load %arg13[%c0_63, %c0_64] : memref<1x128xf32, #tpu.memory_space<vmem>>, vector<1x128xf32>
    %93 = vector.broadcast %92 : vector<1x128xf32> to vector<256x128xf32>
    %94 = arith.addf %91, %93 : vector<256x128xf32>
    %cst_65 = arith.constant 0.000000e+00 : f32
    %95 = vector.broadcast %cst_65 : f32 to vector<256x128xf32>
    %96 = arith.subf %95, %94 : vector<256x128xf32>
    %97 = math.exp %96 : vector<256x128xf32>
    %cst_66 = arith.constant 1.000000e+00 : f32
    %98 = vector.broadcast %cst_66 : f32 to vector<256x128xf32>
    %99 = arith.addf %98, %97 : vector<256x128xf32>
    %100 = tpu.reciprocal %99 {approx = true} : vector<256x128xf32> -> vector<256x128xf32>
    %c0_67 = arith.constant 0 : index
    %c0_68 = arith.constant 0 : index
    %101 = vector.load %arg14[%c0_67, %c0_68] : memref<256x128xf32, #tpu.memory_space<vmem>>, vector<256x128xf32>
    tpu.vector_store %arg14[%c0_67, %c0_68], %100 {strides = array<i32>} : memref<256x128xf32, #tpu.memory_space<vmem>>, vector<256x128xf32>,
    return
  }
  func.func @transform_0(%arg0: i32) -> (i32, i32) {
    %c0_i32 = arith.constant 0 : i32
    %c0_i32_0 = arith.constant 0 : i32
    return %arg0, %c0_i32 : i32, i32
  }
  func.func @transform_1(%arg0: i32) -> (i32, i32) {
    %c0_i32 = arith.constant 0 : i32
    %c0_i32_0 = arith.constant 0 : i32
    %c0_i32_1 = arith.constant 0 : i32
    return %c0_i32, %c0_i32_0 : i32, i32
  }
  func.func @transform_2(%arg0: i32) -> (i32, i32) {
    %c0_i32 = arith.constant 0 : i32
    %c0_i32_0 = arith.constant 0 : i32
    %c0_i32_1 = arith.constant 0 : i32
    return %c0_i32, %c0_i32_0 : i32, i32
  }
  func.func @transform_3(%arg0: i32) -> (i32, i32, i32) {
    %c0_i32 = arith.constant 0 : i32
    %c0_i32_0 = arith.constant 0 : i32
    %c0_i32_1 = arith.constant 0 : i32
    %c0_i32_2 = arith.constant 0 : i32
    return %c0_i32, %c0_i32_0, %c0_i32_1 : i32, i32, i32
  }
  func.func @transform_4(%arg0: i32) -> (i32, i32, i32) {
    %c0_i32 = arith.constant 0 : i32
    %c0_i32_0 = arith.constant 0 : i32
    %c0_i32_1 = arith.constant 0 : i32
    %c0_i32_2 = arith.constant 0 : i32
    return %c0_i32, %c0_i32_0, %c0_i32_1 : i32, i32, i32
  }
  func.func @transform_5(%arg0: i32) -> (i32, i32, i32) {
    %c0_i32 = arith.constant 0 : i32
    %c0_i32_0 = arith.constant 0 : i32
    %c0_i32_1 = arith.constant 0 : i32
    %c0_i32_2 = arith.constant 0 : i32
    return %c0_i32, %c0_i32_0, %c0_i32_1 : i32, i32, i32
  }
  func.func @transform_6(%arg0: i32) -> (i32, i32, i32) {
    %c0_i32 = arith.constant 0 : i32
    %c0_i32_0 = arith.constant 0 : i32
    %c0_i32_1 = arith.constant 0 : i32
    %c0_i32_2 = arith.constant 0 : i32
    return %c0_i32, %c0_i32_0, %c0_i32_1 : i32, i32, i32
  }
  func.func @transform_7(%arg0: i32) -> (i32, i32, i32) {
    %c0_i32 = arith.constant 0 : i32
    %c0_i32_0 = arith.constant 0 : i32
    %c0_i32_1 = arith.constant 0 : i32
    %c0_i32_2 = arith.constant 0 : i32
    return %c0_i32, %c0_i32_0, %c0_i32_1 : i32, i32, i32
  }
  func.func @transform_8(%arg0: i32) -> (i32, i32, i32) {
    %c0_i32 = arith.constant 0 : i32
    %c0_i32_0 = arith.constant 0 : i32
    %c0_i32_1 = arith.constant 0 : i32
    %c0_i32_2 = arith.constant 0 : i32
    return %c0_i32, %c0_i32_0, %c0_i32_1 : i32, i32, i32
  }
  func.func @transform_9(%arg0: i32) -> (i32, i32) {
    %c0_i32 = arith.constant 0 : i32
    %c0_i32_0 = arith.constant 0 : i32
    %c0_i32_1 = arith.constant 0 : i32
    return %c0_i32, %c0_i32_0 : i32, i32
  }
  func.func @transform_10(%arg0: i32) -> (i32, i32) {
    %c0_i32 = arith.constant 0 : i32
    %c0_i32_0 = arith.constant 0 : i32
    %c0_i32_1 = arith.constant 0 : i32
    return %c0_i32, %c0_i32_0 : i32, i32
  }
  func.func @transform_11(%arg0: i32) -> (i32, i32) {
    %c0_i32 = arith.constant 0 : i32
    %c0_i32_0 = arith.constant 0 : i32
    %c0_i32_1 = arith.constant 0 : i32
    return %c0_i32, %c0_i32_0 : i32, i32
  }
  func.func @transform_12(%arg0: i32) -> (i32, i32) {
    %c0_i32 = arith.constant 0 : i32
    %c0_i32_0 = arith.constant 0 : i32
    %c0_i32_1 = arith.constant 0 : i32
    return %c0_i32, %c0_i32_0 : i32, i32
  }
  func.func @transform_13(%arg0: i32) -> (i32, i32) {
    %c0_i32 = arith.constant 0 : i32
    %c0_i32_0 = arith.constant 0 : i32
    return %arg0, %c0_i32 : i32, i32
  }
}

</mosaic_0001>

<bundles_post_ra>
// kernel: resid_deriv_estimator.1
= control target key start
LH: loop header
LB: loop body
LE: loop exit
PB: predicated region body
PF: predicated region fallthrough
CT: control target
= control target key end

     0   :  { %s3397_s25 = smov 0   ;;  %s4453_s0 = inlined_call_operand.vmem [shape: bf16[1024,128], index: 0, kind: input, shape index: {}]   ;;  %s4454_s1 = inlined_call_operand.vmem [shape: bf16[128,128], index: 1, kind: input, shape index: {}]   ;;  %s4455_s2 = inlined_call_operand.vmem [shape: f32[1,128], index: 2, kind: input, shape index: {}]   ;;  %s4456_s3 = inlined_call_operand.vmem [shape: f32[2,1,128], index: 3, kind: input, shape index: {}]   ;;  %s4457_s4 = inlined_call_operand.vmem [shape: f32[2,1,128], index: 4, kind: input, shape index: {}]   ;;  %s4458_s5 = inlined_call_operand.vmem [shape: bf16[2,128,128], index: 5, kind: input, shape index: {}]   ;;  %s4459_s6 = inlined_call_operand.vmem [shape: f32[2,1,128], index: 6, kind: input, shape index: {}]   ;;  %s4460_s7 = inlined_call_operand.vmem [shape: bf16[2,128,128], index: 7, kind: input, shape index: {}]   ;;  %s4461_s8 = inlined_call_operand.vmem [shape: f32[2,1,128], index: 8, kind: input, shape index: {}]   ;;  %s4462_s9 = inlined_call_operand.vmem [shape: bf16[128,128], index: 9, kind: input, shape index: {}]   ;;  %s4463_s10 = inlined_call_operand.vmem [shape: f32[1,128], index: 10, kind: input, shape index: {}]   ;;  %s4464_s11 = inlined_call_operand.vmem [shape: bf16[128,128], index: 11, kind: input, shape index: {}]   ;;  %s4465_s12 = inlined_call_operand.vmem [shape: f32[1,128], index: 12, kind: input, shape index: {}]   ;;  %s4466_s13 = inlined_call_operand.vmem [shape: f32[1024,128], index: 13, kind: output, shape index: {}]  }
   0x1 LB: > { %s2741_s26 = sadd.s32 4294967295, %s3325_s25   ;;  %p2745_p0 = scmp.ge.s32.totalorder %s3325_s25, 1  ;;  %s3325_s25 = sphi %s3397_s25, %s23_s25  }
   0x2   : > { %p388_p1 = scmp.lt.s32.totalorder %s3325_s25, 5 }
   0x4   : > { %p389_p2 = pnand %p2745_p0, %p388_p1 }
   0x6   : > { %392 = sbr.rel (%p389_p2) target bundleno = 1318 (0x526), region = 72 }
   0xb   : > { %v3099_v0 = vld [vmem:[%s4454_s1 + $0x38] sm:$0xff]  ;;  %v3098_v1 = vld [vmem:[%s4454_s1 + $0x30] sm:$0xff]  ;;  %v3097_v2 = vld [vmem:[%s4454_s1 + $0x28] sm:$0xff]  ;;  %s2746_s18 = sshll.u32 %s2741_s26, 5 }
   0xc   : > { %640 = vmatpush.bf16.msra.mxu0 %v3099_v0  ;;  %3148 = vmatpush.bf16.msra.mxu3 %v3099_v0  ;;  %v3096_v3 = vld [vmem:[%s4454_s1 + $0x20] sm:$0xff]  ;;  %v3095_v4 = vld [vmem:[%s4454_s1 + $0x18] sm:$0xff]  ;;  %p433_p3 = scmp.lt.s32.totalorder %s2746_s18, 127  ;;  %v3094_v5 = vld [vmem:[%s4454_s1 + $0x10] sm:$0xff] }
   0xd   : > { %v3093_v6 = vld [vmem:[%s4454_s1 + $0x8] sm:$0xff]  ;;  %v3092_v7 = vld [vmem:[%s4454_s1] sm:$0xff]  ;;  %v3107_v17 = vld [vmem:[%s4458_s5 + $0x38] sm:$0xff] }
   0xe   : > { %s4561_s18 = smov (!%p433_p3, %s2746_s18), 127  ;;  %885 = vmatpush.bf16.msra.mxu1 %v3107_v17  ;;  %v3106_v19 = vld [vmem:[%s4458_s5 + $0x30] sm:$0xff]  ;;  %v3105_v20 = vld [vmem:[%s4458_s5 + $0x28] sm:$0xff]  ;;  %v3104_v21 = vld [vmem:[%s4458_s5 + $0x20] sm:$0xff] }
   0xf   : > { %s2747_s26 = sshll.u32 %s4561_s18, 2  ;;  %v3103_v23 = vld [vmem:[%s4458_s5 + $0x18] sm:$0xff]  ;;  %v3102_v24 = vld [vmem:[%s4458_s5 + $0x10] sm:$0xff]  ;;  %v3101_v25 = vld [vmem:[%s4458_s5 + $0x8] sm:$0xff]  ;;  %s2749_s30 = sshll.u32 %s4561_s18, 3 }
  0x10   : > { %641 = vmatpush.bf16.msra.mxu0 %v3098_v1  ;;  %3149 = vmatpush.bf16.msra.mxu3 %v3098_v1  ;;  %s3435_s14 = scalar_lea.vmem %s4453_s0, %s2747_s26  ;;  %v3100_v26 = vld [vmem:[%s4458_s5] sm:$0xff]  ;;  %s4375_s17 = scalar_lea.vmem %s4466_s13, %s2749_s30 }
  0x11   : > { %v3076_v8 = vld [vmem:[%s3435_s14] sm:$0xff]  ;;  %v3077_v10 = vld [vmem:[%s3435_s14 + $0x8] sm:$0xff]  ;;  %v3078_v12 = vld [vmem:[%s3435_s14 + $0x10] sm:$0xff] }
  0x12   : > { %v3088_v9 = vld [vmem:[%s3435_s14 + $0x60] sm:$0xff]  ;;  %v3089_v11 = vld [vmem:[%s3435_s14 + $0x68] sm:$0xff]  ;;  %v3090_v13 = vld [vmem:[%s3435_s14 + $0x70] sm:$0xff]  ;;  %886 = vmatpush.bf16.msra.mxu1 %v3106_v19 }
  0x13   : > { %v3079_v14 = vld [vmem:[%s3435_s14 + $0x18] sm:$0xff]  ;;  %v3080_v16 = vld [vmem:[%s3435_s14 + $0x20] sm:$0xff]  ;;  %v3081_v18 = vld [vmem:[%s3435_s14 + $0x28] sm:$0xff] }
  0x14   : > { %642 = vmatpush.bf16.msra.mxu0 %v3097_v2  ;;  %3150 = vmatpush.bf16.msra.mxu3 %v3097_v2  ;;  %v3091_v15 = vld [vmem:[%s3435_s14 + $0x78] sm:$0xff]  ;;  %v3082_v22 = vld [vmem:[%s3435_s14 + $0x30] sm:$0xff]  ;;  %v3084_v28 = vld [vmem:[%s3435_s14 + $0x40] sm:$0xff] }
  0x15   : > { %v3083_v27 = vld [vmem:[%s3435_s14 + $0x38] sm:$0xff]  ;;  %v3477_v30 = vld [vmem:[%s4455_s2] ss:$0 sm:$0xff]  ;;  %v3085_v46 = vld [vmem:[%s3435_s14 + $0x48] sm:$0xff] }
  0x16   : > { %887 = vmatpush.bf16.msra.mxu1 %v3105_v20  ;;  %v3485_v32 = vld [vmem:[%s4456_s3] ss:$0 sm:$0xff]  ;;  %v3086_v1 = vld [vmem:[%s3435_s14 + $0x50] sm:$0xff] }
  0x17   : > { %v3495_v37 = vld [vmem:[%s4457_s4] ss:$0 sm:$0xff] }
  0x18   : > { %643 = vmatpush.bf16.msra.mxu0 %v3096_v3  ;;  %3151 = vmatpush.bf16.msra.mxu3 %v3096_v3 }
  0x1a   : > { %888 = vmatpush.bf16.msra.mxu1 %v3104_v21 }
  0x1c   : > { %644 = vmatpush.bf16.msra.mxu0 %v3095_v4  ;;  %3152 = vmatpush.bf16.msra.mxu3 %v3095_v4 }
  0x1e   : > { %889 = vmatpush.bf16.msra.mxu1 %v3103_v23 }
  0x20   : > { %645 = vmatpush.bf16.msra.mxu0 %v3094_v5  ;;  %3153 = vmatpush.bf16.msra.mxu3 %v3094_v5 }
  0x22   : > { %890 = vmatpush.bf16.msra.mxu1 %v3102_v24 }
  0x24   : > { %646 = vmatpush.bf16.msra.mxu0 %v3093_v6  ;;  %3154 = vmatpush.bf16.msra.mxu3 %v3093_v6 }
  0x26   : > { %891 = vmatpush.bf16.msra.mxu1 %v3101_v25 }
  0x28   : > { %647 = vmatpush.bf16.msra.mxu0 %v3092_v7  ;;  %3155 = vmatpush.bf16.msra.mxu3 %v3092_v7 }
  0x2a   : > { %892 = vmatpush.bf16.msra.mxu1 %v3100_v26 }
  0x2b   : > { %648 = vmatmul.bf16.vlgmr.msra.gmra.mxu0 %v3076_v8  ;;  %708 = vmatmul.bf16.vlgmr.msra.gmra.mxu3 %v3088_v9 }
  0x2c   : > { %3156 = vmatpush.bf16.msrb.mxu3 %v3107_v17 }
  0x30   : > { %3157 = vmatpush.bf16.msrb.mxu3 %v3106_v19 }
  0x34   : > { %3158 = vmatpush.bf16.msrb.mxu3 %v3105_v20  ;;  %v3087_v20 = vld [vmem:[%s3435_s14 + $0x58] sm:$0xff] }
  0x38   : > { %3159 = vmatpush.bf16.msrb.mxu3 %v3104_v21 }
  0x3b   : > { %653 = vmatmul.bf16.gmra.mxu0 %v3077_v10  ;;  %713 = vmatmul.bf16.gmra.mxu3 %v3089_v11 }
  0x3c   : > { %3160 = vmatpush.bf16.msrb.mxu3 %v3103_v23 }
  0x40   : > { %3161 = vmatpush.bf16.msrb.mxu3 %v3102_v24 }
  0x44   : > { %3162 = vmatpush.bf16.msrb.mxu3 %v3101_v25 }
  0x48   : > { %3163 = vmatpush.bf16.msrb.mxu3 %v3100_v26 }
  0x4b   : > { %658 = vmatmul.bf16.gmra.mxu0 %v3078_v12  ;;  %718 = vmatmul.bf16.gmra.mxu3 %v3090_v13 }
  0x5b   : > { %663 = vmatmul.bf16.gmra.mxu0 %v3079_v14  ;;  %723 = vmatmul.bf16.gmra.mxu3 %v3091_v15 }
  0x6b   : > { %668 = vmatmul.bf16.gmra.mxu0 %v3080_v16 }
  0x7b   : > { %673 = vmatmul.bf16.gmra.mxu0 %v3081_v18 }
  0x8b   : > { %678 = vmatmul.bf16.gmra.mxu0 %v3082_v22 }
  0x9b   : > { %683 = vmatmul.bf16.gmra.mxu0 %v3083_v27 }
  0xa8   : > { %v649_v29 = vpop.f32.mrf.mxu0 }
  0xa9   : > { %v3480_v31 = vadd.f32 %v3477_v30, %v649_v29 }
  0xab   : > { %688 = vmatmul.bf16.gmra.mxu0 %v3084_v28  ;;  %v733_v35 = vmul.f32 %v3485_v32, %v3480_v31 }
  0xad   : > { %v3505_v41 = vadd.f32 %v3495_v37, %v733_v35 }
  0xae   : > { %v709_v33 = vpop.f32.mrf.mxu3 }
  0xaf   : > { %v3490_v36 = vadd.f32 %v3477_v30, %v709_v33 }
  0xb0   : > { %v651_v34 = vpop.f32.mrf.mxu0 }
  0xb1   : > { %4498 = vst [vmem:[#allocation2_spill] sm:$0xff] %v3490_v36  ;;  %v3498_v38 = vadd.f32 %v3477_v30, %v651_v34  ;;  %v757_v40 = vmul.f32 %v3485_v32, %v3490_v36 }
  0xb3   : > { %v734_v39 = vmul.f32 %v3485_v32, %v3498_v38  ;;  %v3517_v48 = vadd.f32 %v3495_v37, %v757_v40 }
  0xb5   : > { %v3508_v42 = vadd.f32 %v3495_v37, %v734_v39 }
  0xb6   : > { %v711_v43 = vpop.f32.mrf.mxu3 }
  0xb7   : > { %v3511_v44 = vadd.f32 %v3477_v30, %v711_v43  ;;  %v801_v45 = vpack.c.bf16 %v3508_v42, %v3505_v41 }
  0xb8   : > { %v654_v47 = vpop.f32.mrf.mxu0 }
  0xb9   : > { %4499 = vst [vmem:[#allocation3_spill] sm:$0xff] %v3511_v44  ;;  %v758_v49 = vmul.f32 %v3485_v32, %v3511_v44  ;;  %893 = vmatmul.bf16.vlgmr.msra.gmra.mxu1 %v801_v45  ;;  %v3525_v51 = vadd.f32 %v3477_v30, %v654_v47 }
  0xbb   : > { %v3522_v50 = vadd.f32 %v3495_v37, %v758_v49  ;;  %693 = vmatmul.bf16.gmra.mxu0 %v3085_v46  ;;  %v735_v55 = vmul.f32 %v3485_v32, %v3525_v51 }
  0xbd   : > { %v813_v52 = vpack.c.bf16 %v3522_v50, %v3517_v48  ;;  %v3542_v60 = vadd.f32 %v3495_v37, %v735_v55 }
  0xbe   : > { %v714_v53 = vpop.f32.mrf.mxu3 }
  0xbf   : > { %953 = vmatmul.bf16.vlgmr.msrb.gmra.mxu3 %v813_v52  ;;  %v3532_v56 = vadd.f32 %v3477_v30, %v714_v53 }
  0xc0   : > { %v656_v54 = vpop.f32.mrf.mxu0 }
  0xc1   : > { %4500 = vst [vmem:[#allocation4_spill] sm:$0xff] %v3532_v56  ;;  %v3535_v57 = vadd.f32 %v3477_v30, %v656_v54  ;;  %v759_v59 = vmul.f32 %v3485_v32, %v3532_v56 }
  0xc3   : > { %v736_v58 = vmul.f32 %v3485_v32, %v3535_v57  ;;  %v3556_v4 = vadd.f32 %v3495_v37, %v759_v59 }
  0xc5   : > { %v3545_v61 = vadd.f32 %v3495_v37, %v736_v58 }
  0xc6   : > { %v716_v62 = vpop.f32.mrf.mxu3 }
  0xc7   : > { %v3548_v63 = vadd.f32 %v3477_v30, %v716_v62  ;;  %v802_v0 = vpack.c.bf16 %v3545_v61, %v3542_v60 }
  0xc8   : > { %v659_v2 = vpop.f32.mrf.mxu0 }
  0xc9   : > { %4501 = vst [vmem:[#allocation5_spill] sm:$0xff] %v3548_v63  ;;  %v760_v3 = vmul.f32 %v3485_v32, %v3548_v63  ;;  %898 = vmatmul.bf16.gmra.mxu1 %v802_v0  ;;  %v3562_v6 = vadd.f32 %v3477_v30, %v659_v2 }
  0xcb   : > { %698 = vmatmul.bf16.gmra.mxu0 %v3086_v1  ;;  %v3559_v5 = vadd.f32 %v3495_v37, %v760_v3  ;;  %v737_v10 = vmul.f32 %v3485_v32, %v3562_v6 }
  0xcd   : > { %v814_v7 = vpack.c.bf16 %v3559_v5, %v3556_v4  ;;  %v3579_v15 = vadd.f32 %v3495_v37, %v737_v10 }
  0xce   : > { %v719_v8 = vpop.f32.mrf.mxu3 }
  0xcf   : > { %958 = vmatmul.bf16.gmra.mxu3 %v814_v7  ;;  %v3569_v11 = vadd.f32 %v3477_v30, %v719_v8 }
  0xd0   : > { %v661_v9 = vpop.f32.mrf.mxu0 }
  0xd1   : > { %4502 = vst [vmem:[#allocation6_spill] sm:$0xff] %v3569_v11  ;;  %v3572_v12 = vadd.f32 %v3477_v30, %v661_v9  ;;  %v761_v14 = vmul.f32 %v3485_v32, %v3569_v11 }
  0xd3   : > { %v738_v13 = vmul.f32 %v3485_v32, %v3572_v12  ;;  %v3593_v23 = vadd.f32 %v3495_v37, %v761_v14 }
  0xd5   : > { %v3582_v16 = vadd.f32 %v3495_v37, %v738_v13 }
  0xd6   : > { %v721_v17 = vpop.f32.mrf.mxu3 }
  0xd7   : > { %v3585_v18 = vadd.f32 %v3477_v30, %v721_v17  ;;  %v803_v19 = vpack.c.bf16 %v3582_v16, %v3579_v15 }
  0xd8   : > { %v664_v21 = vpop.f32.mrf.mxu0 }
  0xd9   : > { %4503 = vst [vmem:[#allocation7_spill] sm:$0xff] %v3585_v18  ;;  %v762_v22 = vmul.f32 %v3485_v32, %v3585_v18  ;;  %903 = vmatmul.bf16.gmra.mxu1 %v803_v19  ;;  %v3599_v25 = vadd.f32 %v3477_v30, %v664_v21  ;;  %v3115_v19 = vld [vmem:[%s4460_s7 + $0x38] sm:$0xff] }
  0xda   : > { %1154 = vmatpush.bf16.msra.mxu2 %v3115_v19  ;;  %3164 = vmatpush.bf16.msra.mxu3 %v3115_v19 }
  0xdb   : > { %703 = vmatmul.bf16.gmra.mxu0 %v3087_v20  ;;  %v3596_v24 = vadd.f32 %v3495_v37, %v762_v22  ;;  %v739_v29 = vmul.f32 %v3485_v32, %v3599_v25 }
  0xdd   : > { %v815_v26 = vpack.c.bf16 %v3596_v24, %v3593_v23  ;;  %v3616_v40 = vadd.f32 %v3495_v37, %v739_v29 }
  0xde   : > { %v724_v27 = vpop.f32.mrf.mxu3 }
  0xdf   : > { %963 = vmatmul.bf16.gmra.mxu3 %v815_v26  ;;  %v3606_v33 = vadd.f32 %v3477_v30, %v724_v27  ;;  %v3114_v27 = vld [vmem:[%s4460_s7 + $0x30] sm:$0xff] }
  0xe0   : > { %v666_v28 = vpop.f32.mrf.mxu0  ;;  %1155 = vmatpush.bf16.msra.mxu2 %v3114_v27  ;;  %3165 = vmatpush.bf16.msra.mxu3 %v3114_v27 }
  0xe1   : > { %4504 = vst [vmem:[#allocation8_spill] sm:$0xff] %v3606_v33  ;;  %v3609_v34 = vadd.f32 %v3477_v30, %v666_v28  ;;  %v763_v39 = vmul.f32 %v3485_v32, %v3606_v33  ;;  %v3113_v28 = vld [vmem:[%s4460_s7 + $0x28] sm:$0xff] }
  0xe3   : > { %v740_v35 = vmul.f32 %v3485_v32, %v3609_v34  ;;  %v3629_v53 = vadd.f32 %v3495_v37, %v763_v39 }
  0xe4   : > { %1156 = vmatpush.bf16.msra.mxu2 %v3113_v28  ;;  %3166 = vmatpush.bf16.msra.mxu3 %v3113_v28 }
  0xe5   : > { %v3619_v43 = vadd.f32 %v3495_v37, %v740_v35 }
  0xe6   : > { %v726_v45 = vpop.f32.mrf.mxu3 }
  0xe7   : > { %v3622_v46 = vadd.f32 %v3477_v30, %v726_v45  ;;  %v804_v47 = vpack.c.bf16 %v3619_v43, %v3616_v40 }
  0xe8   : > { %v669_v49 = vpop.f32.mrf.mxu0 }
  0xe9   : > { %4505 = vst [vmem:[#allocation9_spill] sm:$0xff] %v3622_v46  ;;  %v764_v52 = vmul.f32 %v3485_v32, %v3622_v46  ;;  %908 = vmatmul.bf16.gmra.mxu1 %v804_v47  ;;  %v3635_v55 = vadd.f32 %v3477_v30, %v669_v49  ;;  %v3112_v47 = vld [vmem:[%s4460_s7 + $0x20] sm:$0xff] }
  0xea   : > { %1157 = vmatpush.bf16.msra.mxu2 %v3112_v47  ;;  %3167 = vmatpush.bf16.msra.mxu3 %v3112_v47 }
  0xeb   : > { %v3632_v54 = vadd.f32 %v3495_v37, %v764_v52  ;;  %v741_v62 = vmul.f32 %v3485_v32, %v3635_v55 }
  0xed   : > { %v816_v58 = vpack.c.bf16 %v3632_v54, %v3629_v53  ;;  %v3647_v2 = vadd.f32 %v3495_v37, %v741_v62 }
  0xef   : > { %968 = vmatmul.bf16.gmra.mxu3 %v816_v58 }
  0xf0   : > { %v671_v59 = vpop.f32.mrf.mxu0 }
  0xf1   : > { %v3642_v0 = vadd.f32 %v3477_v30, %v671_v59  ;;  %v3111_v59 = vld [vmem:[%s4460_s7 + $0x18] sm:$0xff] }
  0xf2   : > { %1158 = vmatpush.bf16.msra.mxu2 %v3111_v59  ;;  %3168 = vmatpush.bf16.msra.mxu3 %v3111_v59 }
  0xf3   : > { %4506 = vst [vmem:[#allocation10_spill] sm:$0xff] %v3642_v0  ;;  %v742_v1 = vmul.f32 %v3485_v32, %v3642_v0 }
  0xf5   : > { %v3650_v3 = vadd.f32 %v3495_v37, %v742_v1 }
  0xf7   : > { %v805_v7 = vpack.c.bf16 %v3650_v3, %v3647_v2 }
  0xf8   : > { %v674_v8 = vpop.f32.mrf.mxu0 }
  0xf9   : > { %913 = vmatmul.bf16.gmra.mxu1 %v805_v7  ;;  %v3655_v9 = vadd.f32 %v3477_v30, %v674_v8  ;;  %v3110_v7 = vld [vmem:[%s4460_s7 + $0x10] sm:$0xff] }
  0xfa   : > { %1159 = vmatpush.bf16.msra.mxu2 %v3110_v7  ;;  %3169 = vmatpush.bf16.msra.mxu3 %v3110_v7 }
  0xfb   : > { %4507 = vst [vmem:[#allocation11_spill] sm:$0xff] %v3655_v9  ;;  %v743_v13 = vmul.f32 %v3485_v32, %v3655_v9 }
  0xfd   : > { %v3668_v20 = vadd.f32 %v3495_v37, %v743_v13 }
 0x100   : > { %v676_v10 = vpop.f32.mrf.mxu0 }
 0x101   : > { %v3660_v14 = vadd.f32 %v3477_v30, %v676_v10  ;;  %v3109_v10 = vld [vmem:[%s4460_s7 + $0x8] sm:$0xff] }
 0x102   : > { %1160 = vmatpush.bf16.msra.mxu2 %v3109_v10  ;;  %3170 = vmatpush.bf16.msra.mxu3 %v3109_v10 }
 0x103   : > { %4508 = vst [vmem:[#allocation12_spill] sm:$0xff] %v3660_v14  ;;  %v744_v17 = vmul.f32 %v3485_v32, %v3660_v14 }
 0x105   : > { %v3671_v21 = vadd.f32 %v3495_v37, %v744_v17 }
 0x107   : > { %v806_v22 = vpack.c.bf16 %v3671_v21, %v3668_v20 }
 0x108   : > { %v679_v26 = vpop.f32.mrf.mxu0 }
 0x109   : > { %918 = vmatmul.bf16.gmra.mxu1 %v806_v22  ;;  %v3682_v29 = vadd.f32 %v3477_v30, %v679_v26  ;;  %v3108_v22 = vld [vmem:[%s4460_s7] sm:$0xff] }
 0x10a   : > { %1161 = vmatpush.bf16.msra.mxu2 %v3108_v22  ;;  %3171 = vmatpush.bf16.msra.mxu3 %v3108_v22 }
 0x10b   : > { %4509 = vst [vmem:[#allocation13_spill] sm:$0xff] %v3682_v29  ;;  %v745_v39 = vmul.f32 %v3485_v32, %v3682_v29 }
 0x10d   : > { %v3695_v52 = vadd.f32 %v3495_v37, %v745_v39 }
 0x110   : > { %v681_v35 = vpop.f32.mrf.mxu0 }
 0x111   : > { %v3687_v45 = vadd.f32 %v3477_v30, %v681_v35 }
 0x113   : > { %4510 = vst [vmem:[#allocation14_spill] sm:$0xff] %v3687_v45  ;;  %v746_v49 = vmul.f32 %v3485_v32, %v3687_v45 }
 0x115   : > { %v3698_v58 = vadd.f32 %v3495_v37, %v746_v49 }
 0x117   : > { %v807_v62 = vpack.c.bf16 %v3698_v58, %v3695_v52 }
 0x118   : > { %v684_v1 = vpop.f32.mrf.mxu0 }
 0x119   : > { %923 = vmatmul.bf16.gmra.mxu1 %v807_v62  ;;  %v3709_v8 = vadd.f32 %v3477_v30, %v684_v1 }
 0x11b   : > { %4511 = vst [vmem:[#allocation15_spill] sm:$0xff] %v3709_v8  ;;  %v747_v17 = vmul.f32 %v3485_v32, %v3709_v8 }
 0x11d   : > { %v3725_v27 = vadd.f32 %v3495_v37, %v747_v17  ;;  %v3751_v17 = vld [vmem:[%s4459_s6] ss:$0 sm:$0xff] }
 0x120   : > { %v686_v13 = vpop.f32.mrf.mxu0 }
 0x121   : > { %v3717_v19 = vadd.f32 %v3477_v30, %v686_v13 }
 0x123   : > { %4512 = vst [vmem:[#allocation16_spill] sm:$0xff] %v3717_v19  ;;  %v748_v26 = vmul.f32 %v3485_v32, %v3717_v19 }
 0x125   : > { %v3728_v28 = vadd.f32 %v3495_v37, %v748_v26 }
 0x127   : > { %v808_v35 = vpack.c.bf16 %v3728_v28, %v3725_v27 }
 0x128   : > { %v689_v39 = vpop.f32.mrf.mxu0 }
 0x129   : > { %928 = vmatmul.bf16.gmra.mxu1 %v808_v35  ;;  %v3733_v47 = vadd.f32 %v3477_v30, %v689_v39 }
 0x12b   : > { %4513 = vst [vmem:[#allocation17_spill] sm:$0xff] %v3733_v47  ;;  %v749_v59 = vmul.f32 %v3485_v32, %v3733_v47 }
 0x12d   : > { %v3743_v7 = vadd.f32 %v3495_v37, %v749_v59 }
 0x130   : > { %v691_v49 = vpop.f32.mrf.mxu0 }
 0x131   : > { %v3738_v62 = vadd.f32 %v3477_v30, %v691_v49 }
 0x133   : > { %4514 = vst [vmem:[#allocation18_spill] sm:$0xff] %v3738_v62  ;;  %v750_v1 = vmul.f32 %v3485_v32, %v3738_v62 }
 0x135   : > { %v3746_v10 = vadd.f32 %v3495_v37, %v750_v1 }
 0x136   : > { %v894_v13 = vpop.f32.mrf.mxu1 }
 0x137   : > { %v809_v22 = vpack.c.bf16 %v3746_v10, %v3743_v7  ;;  %v895_v35 = vadd.f32 %v3751_v17, %v894_v13 }
 0x138   : > { %v694_v26 = vpop.f32.mrf.mxu0 }
 0x139   : > { %933 = vmatmul.bf16.gmra.mxu1 %v809_v22  ;;  %v3757_v39 = vadd.f32 %v3477_v30, %v694_v26  ;;  %v1006_v59 = vmul.f32 0.01, %v895_v35  ;;  %vm974_vm0 = vcmp.gt.f32.partialorder %v895_v35, 0.0 }
 0x13b   : > { %4515 = vst [vmem:[#allocation19_spill] sm:$0xff] %v3757_v39  ;;  %v751_v33 = vmul.f32 %v3485_v32, %v3757_v39  ;;  %v1038_v26 = vsel %vm974_vm0, %v895_v35, %v1006_v59 }
 0x13e   : > { %v896_v49 = vpop.f32.mrf.mxu1 }
 0x13f   : > { %v897_v1 = vadd.f32 %v3751_v17, %v896_v49  ;;  %v3769_v49 = vadd.f32 %v3495_v37, %v751_v33 }
 0x140   : > { %v696_v46 = vpop.f32.mrf.mxu0 }
 0x141   : > { %v1007_v18 = vmul.f32 0.01, %v897_v1  ;;  %v3763_v11 = vadd.f32 %v3477_v30, %v696_v46  ;;  %vm975_vm1 = vcmp.gt.f32.partialorder %v897_v1, 0.0 }
 0x142   : > { %v954_v22 = vpop.f32.mrf.mxu3 }
 0x143   : > { %4516 = vst [vmem:[#allocation20_spill] sm:$0xff] %v3763_v11  ;;  %v752_v13 = vmul.f32 %v3485_v32, %v3763_v11  ;;  %v1039_v63 = vsel %vm975_vm1, %v897_v1, %v1007_v18  ;;  %v955_v44 = vadd.f32 %v3751_v17, %v954_v22 }
 0x144   : > { %v1070_v56 = vpack.c.bf16 %v1039_v63, %v1038_v26 }
 0x145   : > { %v3772_v36 = vadd.f32 %v3495_v37, %v752_v13  ;;  %v1030_v47 = vmul.f32 0.01, %v955_v44  ;;  %vm998_vm2 = vcmp.gt.f32.partialorder %v955_v44, 0.0 }
 0x146   : > { %v899_v39 = vpop.f32.mrf.mxu1  ;;  %1162 = vmatmul.bf16.vlgmr.msra.gmra.mxu2 %v1070_v56 }
 0x147   : > { %v810_v46 = vpack.c.bf16 %v3772_v36, %v3769_v49  ;;  %v900_v63 = vadd.f32 %v3751_v17, %v899_v39  ;;  %v1062_v59 = vsel %vm998_vm2, %v955_v44, %v1030_v47 }
 0x148   : > { %v699_v62 = vpop.f32.mrf.mxu0 }
 0x149   : > { %938 = vmatmul.bf16.gmra.mxu1 %v810_v46  ;;  %v3779_v33 = vadd.f32 %v3477_v30, %v699_v62  ;;  %v1008_v56 = vmul.f32 0.01, %v900_v63  ;;  %vm976_vm4 = vcmp.gt.f32.partialorder %v900_v63, 0.0 }
 0x14a   : > { %v956_v35 = vpop.f32.mrf.mxu3 }
 0x14b   : > { %v957_v18 = vadd.f32 %v3751_v17, %v956_v35  ;;  %4517 = vst [vmem:[#allocation21_spill] sm:$0xff] %v3779_v33  ;;  %v753_v46 = vmul.f32 %v3485_v32, %v3779_v33  ;;  %v1040_v62 = vsel %vm976_vm4, %v900_v63, %v1008_v56 }
 0x14d   : > { %vm999_vm3 = vcmp.gt.f32.partialorder %v957_v18, 0.0  ;;  %v1031_v1 = vmul.f32 0.01, %v957_v18 }
 0x14e   : > { %v901_v22 = vpop.f32.mrf.mxu1 }
 0x14f   : > { %v1063_v13 = vsel %vm999_vm3, %v957_v18, %v1031_v1  ;;  %v902_v26 = vadd.f32 %v3751_v17, %v901_v22  ;;  %v3791_v22 = vadd.f32 %v3495_v37, %v753_v46 }
 0x150   : > { %v1082_v11 = vpack.c.bf16 %v1063_v13, %v1062_v59  ;;  %v701_v19 = vpop.f32.mrf.mxu0 }
 0x151   : > { %v1009_v39 = vmul.f32 0.01, %v902_v26  ;;  %v3785_v35 = vadd.f32 %v3477_v30, %v701_v19  ;;  %vm977_vm5 = vcmp.gt.f32.partialorder %v902_v26, 0.0 }
 0x152   : > { %v959_v44 = vpop.f32.mrf.mxu3  ;;  %1222 = vmatmul.bf16.vlgmr.msra.gmra.mxu3 %v1082_v11 }
 0x153   : > { %4518 = vst [vmem:[#allocation22_spill] sm:$0xff] %v3785_v35  ;;  %v754_v47 = vmul.f32 %v3485_v32, %v3785_v35  ;;  %v1041_v18 = vsel %vm977_vm5, %v902_v26, %v1009_v39  ;;  %v960_v59 = vadd.f32 %v3751_v17, %v959_v44 }
 0x154   : > { %v1071_v1 = vpack.c.bf16 %v1041_v18, %v1040_v62 }
 0x155   : > { %v3794_v13 = vadd.f32 %v3495_v37, %v754_v47  ;;  %v1032_v8 = vmul.f32 0.01, %v960_v59  ;;  %vm1000_vm6 = vcmp.gt.f32.partialorder %v960_v59, 0.0 }
 0x156   : > { %v904_v33 = vpop.f32.mrf.mxu1  ;;  %1167 = vmatmul.bf16.gmra.mxu2 %v1071_v1 }
 0x157   : > { %v811_v19 = vpack.c.bf16 %v3794_v13, %v3791_v22  ;;  %v905_v63 = vadd.f32 %v3751_v17, %v904_v33  ;;  %v1064_v39 = vsel %vm1000_vm6, %v960_v59, %v1032_v8 }
 0x158   : > { %v704_v11 = vpop.f32.mrf.mxu0 }
 0x159   : > { %943 = vmatmul.bf16.gmra.mxu1 %v811_v19  ;;  %v3801_v26 = vadd.f32 %v3477_v30, %v704_v11  ;;  %v1010_v47 = vmul.f32 0.01, %v905_v63  ;;  %vm978_vm8 = vcmp.gt.f32.partialorder %v905_v63, 0.0 }
 0x15a   : > { %v961_v35 = vpop.f32.mrf.mxu3 }
 0x15b   : > { %v962_v56 = vadd.f32 %v3751_v17, %v961_v35  ;;  %4519 = vst [vmem:[#allocation23_spill] sm:$0xff] %v3801_v26  ;;  %v755_v19 = vmul.f32 %v3485_v32, %v3801_v26  ;;  %v1042_v59 = vsel %vm978_vm8, %v905_v63, %v1010_v47 }
 0x15d   : > { %v1033_v46 = vmul.f32 0.01, %v962_v56  ;;  %vm1001_vm7 = vcmp.gt.f32.partialorder %v962_v56, 0.0 }
 0x15e   : > { %v906_v44 = vpop.f32.mrf.mxu1 }
 0x15f   : > { %v907_v62 = vadd.f32 %v3751_v17, %v906_v44  ;;  %v1065_v18 = vsel %vm1001_vm7, %v962_v56, %v1033_v46  ;;  %v3813_v46 = vadd.f32 %v3495_v37, %v755_v19 }
 0x160   : > { %v706_v1 = vpop.f32.mrf.mxu0  ;;  %v1083_v45 = vpack.c.bf16 %v1065_v18, %v1064_v39 }
 0x161   : > { %v1011_v33 = vmul.f32 0.01, %v907_v62  ;;  %v3807_v35 = vadd.f32 %v3477_v30, %v706_v1  ;;  %vm979_vm9 = vcmp.gt.f32.partialorder %v907_v62, 0.0 }
 0x162   : > { %v964_v11 = vpop.f32.mrf.mxu3  ;;  %1227 = vmatmul.bf16.gmra.mxu3 %v1083_v45 }
 0x163   : > { %4520 = vst [vmem:[#allocation24_spill] sm:$0xff] %v3807_v35  ;;  %v756_v8 = vmul.f32 %v3485_v32, %v3807_v35  ;;  %v1043_v29 = vsel %vm979_vm9, %v907_v62, %v1011_v33  ;;  %v965_v56 = vadd.f32 %v3751_v17, %v964_v11 }
 0x164   : > { %v1072_v44 = vpack.c.bf16 %v1043_v29, %v1042_v59 }
 0x165   : > { %v3816_v39 = vadd.f32 %v3495_v37, %v756_v8  ;;  %v1034_v45 = vmul.f32 0.01, %v965_v56  ;;  %vm1002_vm10 = vcmp.gt.f32.partialorder %v965_v56, 0.0 }
 0x166   : > { %v909_v18 = vpop.f32.mrf.mxu1  ;;  %1172 = vmatmul.bf16.gmra.mxu2 %v1072_v44 }
 0x167   : > { %v812_v30 = vpack.c.bf16 %v3816_v39, %v3813_v46  ;;  %v910_v32 = vadd.f32 %v3751_v17, %v909_v18  ;;  %v1066_v47 = vsel %vm1002_vm10, %v965_v56, %v1034_v45 }
 0x169   : > { %948 = vmatmul.bf16.gmra.mxu1 %v812_v30  ;;  %v1012_v19 = vmul.f32 0.01, %v910_v32  ;;  %vm980_vm12 = vcmp.gt.f32.partialorder %v910_v32, 0.0 }
 0x16a   : > { %v966_v1 = vpop.f32.mrf.mxu3 }
 0x16b   : > { %v967_v29 = vadd.f32 %v3751_v17, %v966_v1  ;;  %v1044_v44 = vsel %vm980_vm12, %v910_v32, %v1012_v19 }
 0x16d   : > { %v1035_v63 = vmul.f32 0.01, %v967_v29  ;;  %vm1003_vm11 = vcmp.gt.f32.partialorder %v967_v29, 0.0 }
 0x16e   : > { %v911_v62 = vpop.f32.mrf.mxu1 }
 0x16f   : > { %v912_v37 = vadd.f32 %v3751_v17, %v911_v62  ;;  %v1067_v33 = vsel %vm1003_vm11, %v967_v29, %v1035_v63 }
 0x170   : > { %v1084_v11 = vpack.c.bf16 %v1067_v33, %v1066_v47 }
 0x171   : > { %v1013_v8 = vmul.f32 0.01, %v912_v37  ;;  %vm981_vm13 = vcmp.gt.f32.partialorder %v912_v37, 0.0 }
 0x172   : > { %v969_v59 = vpop.f32.mrf.mxu3  ;;  %1232 = vmatmul.bf16.gmra.mxu3 %v1084_v11 }
 0x173   : > { %v1045_v30 = vsel %vm981_vm13, %v912_v37, %v1013_v8  ;;  %v970_v18 = vadd.f32 %v3751_v17, %v969_v59 }
 0x174   : > { %v1073_v35 = vpack.c.bf16 %v1045_v30, %v1044_v44 }
 0x175   : > { %v1036_v26 = vmul.f32 0.01, %v970_v18  ;;  %vm1004_vm14 = vcmp.gt.f32.partialorder %v970_v18, 0.0 }
 0x176   : > { %v914_v1 = vpop.f32.mrf.mxu1  ;;  %1177 = vmatmul.bf16.gmra.mxu2 %v1073_v35  ;;  %v3123_v35 = vld [vmem:[%s4458_s5 + $0x78] sm:$0xff] }
 0x177   : > { %v915_v45 = vadd.f32 %v3751_v17, %v914_v1  ;;  %v1068_v47 = vsel %vm1004_vm14, %v970_v18, %v1036_v26  ;;  %1563 = vmatpush.bf16.msrb.mxu3 %v3123_v35  ;;  %v3122_v26 = vld [vmem:[%s4458_s5 + $0x70] sm:$0xff] }
 0x179   : > { %v1014_v33 = vmul.f32 0.01, %v915_v45  ;;  %vm982_vm0 = vcmp.gt.f32.partialorder %v915_v45, 0.0 }
 0x17a   : > { %v971_v56 = vpop.f32.mrf.mxu3 }
 0x17b   : > { %v972_v29 = vadd.f32 %v3751_v17, %v971_v56  ;;  %v1046_v8 = vsel %vm982_vm0, %v915_v45, %v1014_v33  ;;  %1564 = vmatpush.bf16.msrb.mxu3 %v3122_v26  ;;  %v3121_v45 = vld [vmem:[%s4458_s5 + $0x68] sm:$0xff] }
 0x17d   : > { %v1037_v63 = vmul.f32 0.01, %v972_v29  ;;  %vm1005_vm15 = vcmp.gt.f32.partialorder %v972_v29, 0.0 }
 0x17e   : > { %v916_v62 = vpop.f32.mrf.mxu1 }
 0x17f   : > { %v917_v32 = vadd.f32 %v3751_v17, %v916_v62  ;;  %v1069_v19 = vsel %vm1005_vm15, %v972_v29, %v1037_v63  ;;  %1565 = vmatpush.bf16.msrb.mxu3 %v3121_v45 }
 0x180   : > { %v1085_v37 = vpack.c.bf16 %v1069_v19, %v1068_v47  ;;  %v3131_v47 = vld [vmem:[%s4460_s7 + $0x78] sm:$0xff] }
 0x181   : > { %v1015_v11 = vmul.f32 0.01, %v917_v32  ;;  %vm983_vm1 = vcmp.gt.f32.partialorder %v917_v32, 0.0  ;;  %1834 = vmatpush.bf16.msrb.mxu0 %v3131_v47 }
 0x182   : > { %1237 = vmatmul.bf16.gmra.mxu3 %v1085_v37  ;;  %v3120_v37 = vld [vmem:[%s4458_s5 + $0x60] sm:$0xff] }
 0x183   : > { %v1047_v59 = vsel %vm983_vm1, %v917_v32, %v1015_v11  ;;  %1566 = vmatpush.bf16.msrb.mxu3 %v3120_v37  ;;  %v3118_v37 = vld [vmem:[%s4458_s5 + $0x50] sm:$0xff] }
 0x184   : > { %v1074_v44 = vpack.c.bf16 %v1047_v59, %v1046_v8 }
 0x186   : > { %v919_v30 = vpop.f32.mrf.mxu1  ;;  %1182 = vmatmul.bf16.gmra.mxu2 %v1074_v44 }
 0x187   : > { %v920_v18 = vadd.f32 %v3751_v17, %v919_v30  ;;  %v3119_v30 = vld [vmem:[%s4458_s5 + $0x58] sm:$0xff] }
 0x188   : > { %1567 = vmatpush.bf16.msrb.mxu3 %v3119_v30 }
 0x189   : > { %v1016_v56 = vmul.f32 0.01, %v920_v18  ;;  %vm984_vm2 = vcmp.gt.f32.partialorder %v920_v18, 0.0 }
 0x18b   : > { %v1048_v62 = vsel %vm984_vm2, %v920_v18, %v1016_v56 }
 0x18c   : > { %1568 = vmatpush.bf16.msrb.mxu3 %v3118_v37 }
 0x18e   : > { %v921_v1 = vpop.f32.mrf.mxu1 }
 0x18f   : > { %v922_v29 = vadd.f32 %v3751_v17, %v921_v1 }
 0x191   : > { %v1017_v63 = vmul.f32 0.01, %v922_v29  ;;  %vm985_vm3 = vcmp.gt.f32.partialorder %v922_v29, 0.0 }
 0x193   : > { %v1049_v33 = vsel %vm985_vm3, %v922_v29, %v1017_v63 }
 0x194   : > { %v1075_v32 = vpack.c.bf16 %v1049_v33, %v1048_v62 }
 0x196   : > { %v924_v19 = vpop.f32.mrf.mxu1  ;;  %1187 = vmatmul.bf16.gmra.mxu2 %v1075_v32 }
 0x197   : > { %v925_v11 = vadd.f32 %v3751_v17, %v924_v19 }
 0x199   : > { %v1018_v8 = vmul.f32 0.01, %v925_v11  ;;  %vm986_vm4 = vcmp.gt.f32.partialorder %v925_v11, 0.0 }
 0x19b   : > { %v1050_v26 = vsel %vm986_vm4, %v925_v11, %v1018_v8  ;;  %v3130_v11 = vld [vmem:[%s4460_s7 + $0x70] sm:$0xff]  ;;  %v3117_v8 = vld [vmem:[%s4458_s5 + $0x48] sm:$0xff] }
 0x19c   : > { %1835 = vmatpush.bf16.msrb.mxu0 %v3130_v11  ;;  %1569 = vmatpush.bf16.msrb.mxu3 %v3117_v8 }
 0x19e   : > { %v926_v35 = vpop.f32.mrf.mxu1 }
 0x19f   : > { %v927_v59 = vadd.f32 %v3751_v17, %v926_v35 }
 0x1a1   : > { %v1019_v44 = vmul.f32 0.01, %v927_v59  ;;  %vm987_vm5 = vcmp.gt.f32.partialorder %v927_v59, 0.0 }
 0x1a3   : > { %v1051_v18 = vsel %vm987_vm5, %v927_v59, %v1019_v44  ;;  %v3116_v44 = vld [vmem:[%s4458_s5 + $0x40] sm:$0xff] }
 0x1a4   : > { %v1076_v1 = vpack.c.bf16 %v1051_v18, %v1050_v26  ;;  %1570 = vmatpush.bf16.msrb.mxu3 %v3116_v44 }
 0x1a6   : > { %v929_v56 = vpop.f32.mrf.mxu1  ;;  %1192 = vmatmul.bf16.gmra.mxu2 %v1076_v1 }
 0x1a7   : > { %v930_v29 = vadd.f32 %v3751_v17, %v929_v56 }
 0x1a9   : > { %v1020_v45 = vmul.f32 0.01, %v930_v29  ;;  %vm988_vm6 = vcmp.gt.f32.partialorder %v930_v29, 0.0 }
 0x1ab   : > { %v1052_v33 = vsel %vm988_vm6, %v930_v29, %v1020_v45 }
 0x1ae   : > { %v931_v63 = vpop.f32.mrf.mxu1 }
 0x1af   : > { %v932_v47 = vadd.f32 %v3751_v17, %v931_v63 }
 0x1b1   : > { %v1021_v62 = vmul.f32 0.01, %v932_v47  ;;  %vm989_vm7 = vcmp.gt.f32.partialorder %v932_v47, 0.0 }
 0x1b3   : > { %v1053_v32 = vsel %vm989_vm7, %v932_v47, %v1021_v62  ;;  %v3868_v47 = vld [vmem:[%s4461_s8] ss:$0 sm:$0xff] }
 0x1b4   : > { %v1077_v19 = vpack.c.bf16 %v1053_v32, %v1052_v33  ;;  %v3129_v33 = vld [vmem:[%s4460_s7 + $0x68] sm:$0xff] }
 0x1b5   : > { %1836 = vmatpush.bf16.msrb.mxu0 %v3129_v33 }
 0x1b6   : > { %v934_v35 = vpop.f32.mrf.mxu1  ;;  %1197 = vmatmul.bf16.gmra.mxu2 %v1077_v19 }
 0x1b7   : > { %v935_v59 = vadd.f32 %v3751_v17, %v934_v35 }
 0x1b9   : > { %v1022_v26 = vmul.f32 0.01, %v935_v59  ;;  %vm990_vm8 = vcmp.gt.f32.partialorder %v935_v59, 0.0 }
 0x1bb   : > { %v1054_v56 = vsel %vm990_vm8, %v935_v59, %v1022_v26 }
 0x1be   : > { %v936_v30 = vpop.f32.mrf.mxu1 }
 0x1bf   : > { %v937_v18 = vadd.f32 %v3751_v17, %v936_v30 }
 0x1c1   : > { %v1023_v1 = vmul.f32 0.01, %v937_v18  ;;  %vm991_vm9 = vcmp.gt.f32.partialorder %v937_v18, 0.0 }
 0x1c3   : > { %v1055_v29 = vsel %vm991_vm9, %v937_v18, %v1023_v1 }
 0x1c4   : > { %v1078_v63 = vpack.c.bf16 %v1055_v29, %v1054_v56 }
 0x1c6   : > { %v939_v45 = vpop.f32.mrf.mxu1  ;;  %1202 = vmatmul.bf16.gmra.mxu2 %v1078_v63 }
 0x1c7   : > { %v940_v19 = vadd.f32 %v3751_v17, %v939_v45 }
 0x1c9   : > { %v1163_v62 = vpop.f32.mrf.mxu2  ;;  %v1024_v8 = vmul.f32 0.01, %v940_v19  ;;  %vm992_vm11 = vcmp.gt.f32.partialorder %v940_v19, 0.0 }
 0x1ca   : > { %v1164_v32 = vadd.f32 %v3868_v47, %v1163_v62  ;;  %v3881_v62 = vld [vmem:[%s4456_s3 + $0x1] ss:$0 sm:$0xff] }
 0x1cb   : > { %v1056_v1 = vsel %vm992_vm11, %v940_v19, %v1024_v8  ;;  %v3888_v19 = vld [vmem:[%s4457_s4 + $0x1] ss:$0 sm:$0xff] }
 0x1cc   : > { %vm1243_vm10 = vcmp.gt.f32.partialorder %v1164_v32, 0.0  ;;  %v1275_v37 = vmul.f32 0.01, %v1164_v32 }
 0x1ce   : > { %v1307_v11 = vsel %vm1243_vm10, %v1164_v32, %v1275_v37  ;;  %v941_v35 = vpop.f32.mrf.mxu1 }
 0x1cf   : > { %v942_v59 = vadd.f32 %v3751_v17, %v941_v35  ;;  %v1339_v44 = vadd.f32 %v1307_v11, %v3505_v41 }
 0x1d1   : > { %v1025_v30 = vmul.f32 0.01, %v942_v59  ;;  %v1165_v26 = vpop.f32.mrf.mxu2  ;;  %vm993_vm12 = vcmp.gt.f32.partialorder %v942_v59, 0.0  ;;  %v1371_v45 = vmax.f32 %v1339_v44, 0.0 }
 0x1d2   : > { %v1166_v18 = vadd.f32 %v3868_v47, %v1165_v26 }
 0x1d3   : > { %v1057_v56 = vsel %vm993_vm12, %v942_v59, %v1025_v30  ;;  %v1408_v37 = vmul.f32 %v3881_v62, %v1371_v45 }
 0x1d4   : > { %vm1244_vm13 = vcmp.gt.f32.partialorder %v1166_v18, 0.0  ;;  %v1276_v29 = vmul.f32 0.01, %v1166_v18  ;;  %v1079_v63 = vpack.c.bf16 %v1057_v56, %v1056_v1 }
 0x1d5   : > { %v3894_v26 = vadd.f32 %v3888_v19, %v1408_v37 }
 0x1d6   : > { %v1308_v33 = vsel %vm1244_vm13, %v1166_v18, %v1276_v29  ;;  %v944_v32 = vpop.f32.mrf.mxu1  ;;  %1207 = vmatmul.bf16.gmra.mxu2 %v1079_v63 }
 0x1d7   : > { %v1340_v41 = vadd.f32 %v1308_v33, %v3508_v42  ;;  %v945_v44 = vadd.f32 %v3751_v17, %v944_v32 }
 0x1d9   : > { %v1372_v11 = vmax.f32 %v1340_v41, 0.0  ;;  %v1168_v35 = vpop.f32.mrf.mxu2  ;;  %v1026_v56 = vmul.f32 0.01, %v945_v44  ;;  %vm994_vm15 = vcmp.gt.f32.partialorder %v945_v44, 0.0  ;;  %v3128_v41 = vld [vmem:[%s4460_s7 + $0x60] sm:$0xff] }
 0x1da   : > { %v1169_v8 = vadd.f32 %v3868_v47, %v1168_v35  ;;  %1837 = vmatpush.bf16.msrb.mxu0 %v3128_v41 }
 0x1db   : > { %v1409_v59 = vmul.f32 %v3881_v62, %v1372_v11  ;;  %v1058_v11 = vsel %vm994_vm15, %v945_v44, %v1026_v56 }
 0x1dc   : > { %vm1245_vm14 = vcmp.gt.f32.partialorder %v1169_v8, 0.0  ;;  %v1277_v30 = vmul.f32 0.01, %v1169_v8 }
 0x1dd   : > { %v3897_v42 = vadd.f32 %v3888_v19, %v1409_v59 }
 0x1de   : > { %v1309_v18 = vsel %vm1245_vm14, %v1169_v8, %v1277_v30  ;;  %v946_v1 = vpop.f32.mrf.mxu1 }
 0x1df   : > { %v947_v29 = vadd.f32 %v3751_v17, %v946_v1  ;;  %v1477_v63 = vpack.c.bf16 %v3897_v42, %v3894_v26  ;;  %v1341_v45 = vadd.f32 %v1309_v18, %v3542_v60 }
 0x1e1   : > { %v1027_v33 = vmul.f32 0.01, %v947_v29  ;;  %v1170_v32 = vpop.f32.mrf.mxu2  ;;  %1571 = vmatmul.bf16.vlgmr.msrb.gmra.mxu3 %v1477_v63  ;;  %vm995_vm0 = vcmp.gt.f32.partialorder %v947_v29, 0.0  ;;  %v1373_v30 = vmax.f32 %v1341_v45, 0.0 }
 0x1e2   : > { %v1171_v37 = vadd.f32 %v3868_v47, %v1170_v32 }
 0x1e3   : > { %v1059_v35 = vsel %vm995_vm0, %v947_v29, %v1027_v33  ;;  %v1410_v9 = vmul.f32 %v3881_v62, %v1373_v30 }
 0x1e4   : > { %vm1246_vm1 = vcmp.gt.f32.partialorder %v1171_v37, 0.0  ;;  %v1278_v8 = vmul.f32 0.01, %v1171_v37  ;;  %v1080_v59 = vpack.c.bf16 %v1059_v35, %v1058_v11 }
 0x1e5   : > { %v3913_v29 = vadd.f32 %v3888_v19, %v1410_v9 }
 0x1e6   : > { %v1310_v1 = vsel %vm1246_vm1, %v1171_v37, %v1278_v8  ;;  %v949_v14 = vpop.f32.mrf.mxu1  ;;  %1212 = vmatmul.bf16.gmra.mxu2 %v1080_v59 }
 0x1e7   : > { %v1342_v60 = vadd.f32 %v1310_v1, %v3545_v61  ;;  %v950_v32 = vadd.f32 %v3751_v17, %v949_v14 }
 0x1e9   : > { %v1374_v18 = vmax.f32 %v1342_v60, 0.0  ;;  %v1173_v63 = vpop.f32.mrf.mxu2  ;;  %v1028_v41 = vmul.f32 0.01, %v950_v32  ;;  %vm996_vm3 = vcmp.gt.f32.partialorder %v950_v32, 0.0 }
 0x1ea   : > { %v1174_v0 = vadd.f32 %v3868_v47, %v1173_v63 }
 0x1eb   : > { %v1411_v44 = vmul.f32 %v3881_v62, %v1374_v18  ;;  %v1060_v59 = vsel %vm996_vm3, %v950_v32, %v1028_v41 }
 0x1ec   : > { %vm1247_vm2 = vcmp.gt.f32.partialorder %v1174_v0, 0.0  ;;  %v1279_v56 = vmul.f32 0.01, %v1174_v0 }
 0x1ed   : > { %v3916_v45 = vadd.f32 %v3888_v19, %v1411_v44 }
 0x1ee   : > { %v1311_v33 = vsel %vm1247_vm2, %v1174_v0, %v1279_v56  ;;  %v951_v61 = vpop.f32.mrf.mxu1  ;;  %v3127_v56 = vld [vmem:[%s4460_s7 + $0x58] sm:$0xff] }
 0x1ef   : > { %v952_v37 = vadd.f32 %v3751_v17, %v951_v61  ;;  %v1478_v11 = vpack.c.bf16 %v3916_v45, %v3913_v29  ;;  %v1343_v14 = vadd.f32 %v1311_v33, %v3579_v15  ;;  %1838 = vmatpush.bf16.msrb.mxu0 %v3127_v56 }
 0x1f1   : > { %v1029_v35 = vmul.f32 0.01, %v952_v37  ;;  %v1175_v8 = vpop.f32.mrf.mxu2  ;;  %1576 = vmatmul.bf16.gmra.mxu3 %v1478_v11  ;;  %vm997_vm4 = vcmp.gt.f32.partialorder %v952_v37, 0.0  ;;  %v1375_v60 = vmax.f32 %v1343_v14, 0.0 }
 0x1f2   : > { %v1176_v9 = vadd.f32 %v3868_v47, %v1175_v8 }
 0x1f3   : > { %v1061_v30 = vsel %vm997_vm4, %v952_v37, %v1029_v35  ;;  %v1412_v15 = vmul.f32 %v3881_v62, %v1375_v60 }
 0x1f4   : > { %vm1248_vm5 = vcmp.gt.f32.partialorder %v1176_v9, 0.0  ;;  %v1280_v0 = vmul.f32 0.01, %v1176_v9  ;;  %v1081_v1 = vpack.c.bf16 %v1061_v30, %v1060_v59 }
 0x1f5   : > { %v3931_v41 = vadd.f32 %v3888_v19, %v1412_v15 }
 0x1f6   : > { %v1312_v18 = vsel %vm1248_vm5, %v1176_v9, %v1280_v0  ;;  %1217 = vmatmul.bf16.gmra.mxu2 %v1081_v1 }
 0x1f7   : > { %v1344_v17 = vadd.f32 %v1312_v18, %v3582_v16 }
 0x1f9   : > { %v1376_v63 = vmax.f32 %v1344_v17, 0.0  ;;  %v1178_v44 = vpop.f32.mrf.mxu2 }
 0x1fa   : > { %v1179_v33 = vadd.f32 %v3868_v47, %v1178_v44 }
 0x1fb   : > { %v1413_v32 = vmul.f32 %v3881_v62, %v1376_v63 }
 0x1fc   : > { %vm1249_vm6 = vcmp.gt.f32.partialorder %v1179_v33, 0.0  ;;  %v1281_v61 = vmul.f32 0.01, %v1179_v33 }
 0x1fd   : > { %v3934_v16 = vadd.f32 %v3888_v19, %v1413_v32 }
 0x1fe   : > { %v1313_v37 = vsel %vm1249_vm6, %v1179_v33, %v1281_v61  ;;  %v3126_v61 = vld [vmem:[%s4460_s7 + $0x50] sm:$0xff] }
 0x1ff   : > { %v1479_v11 = vpack.c.bf16 %v3934_v16, %v3931_v41  ;;  %v1345_v14 = vadd.f32 %v1313_v37, %v3616_v40  ;;  %1839 = vmatpush.bf16.msrb.mxu0 %v3126_v61 }
 0x201   : > { %v1180_v35 = vpop.f32.mrf.mxu2  ;;  %1581 = vmatmul.bf16.gmra.mxu3 %v1479_v11  ;;  %v1377_v59 = vmax.f32 %v1345_v14, 0.0 }
 0x202   : > { %v1181_v8 = vadd.f32 %v3868_v47, %v1180_v35  ;;  %v3957_v35 = vpop.f32.mrf.mxu3 }
 0x203   : > { %v1414_v18 = vmul.f32 %v3881_v62, %v1377_v59 }
 0x204   : > { %vm1250_vm7 = vcmp.gt.f32.partialorder %v1181_v8, 0.0  ;;  %v1282_v9 = vmul.f32 0.01, %v1181_v8 }
 0x205   : > { %v3945_v44 = vadd.f32 %v3888_v19, %v1414_v18 }
 0x206   : > { %v1314_v30 = vsel %vm1250_vm7, %v1181_v8, %v1282_v9 }
 0x207   : > { %v1346_v0 = vadd.f32 %v1314_v30, %v3619_v43 }
 0x209   : > { %v1378_v1 = vmax.f32 %v1346_v0, 0.0  ;;  %v1183_v60 = vpop.f32.mrf.mxu2 }
 0x20a   : > { %v1184_v17 = vadd.f32 %v3868_v47, %v1183_v60 }
 0x20b   : > { %v1415_v63 = vmul.f32 %v3881_v62, %v1378_v1 }
 0x20c   : > { %vm1251_vm8 = vcmp.gt.f32.partialorder %v1184_v17, 0.0  ;;  %v1283_v40 = vmul.f32 0.01, %v1184_v17 }
 0x20d   : > { %v3948_v15 = vadd.f32 %v3888_v19, %v1415_v63 }
 0x20e   : > { %v1315_v56 = vsel %vm1251_vm8, %v1184_v17, %v1283_v40  ;;  %v3971_v40 = vpop.f32.mrf.mxu3 }
 0x20f   : > { %v1480_v43 = vpack.c.bf16 %v3948_v15, %v3945_v44  ;;  %v1347_v33 = vadd.f32 %v1315_v56, %v3647_v2 }
 0x211   : > { %v1185_v32 = vpop.f32.mrf.mxu2  ;;  %1586 = vmatmul.bf16.gmra.mxu3 %v1480_v43  ;;  %v1379_v14 = vmax.f32 %v1347_v33, 0.0 }
 0x212   : > { %v1186_v37 = vadd.f32 %v3868_v47, %v1185_v32 }
 0x213   : > { %v1416_v2 = vmul.f32 %v3881_v62, %v1379_v14 }
 0x214   : > { %vm1252_vm9 = vcmp.gt.f32.partialorder %v1186_v37, 0.0  ;;  %v1284_v11 = vmul.f32 0.01, %v1186_v37 }
 0x215   : > { %v3964_v18 = vadd.f32 %v3888_v19, %v1416_v2 }
 0x216   : > { %v1316_v8 = vsel %vm1252_vm9, %v1186_v37, %v1284_v11 }
 0x217   : > { %v1348_v9 = vadd.f32 %v1316_v8, %v3650_v3 }
 0x219   : > { %v1380_v59 = vmax.f32 %v1348_v9, 0.0  ;;  %v1188_v30 = vpop.f32.mrf.mxu2 }
 0x21a   : > { %v1189_v0 = vadd.f32 %v3868_v47, %v1188_v30  ;;  %v3983_v30 = vpop.f32.mrf.mxu3 }
 0x21b   : > { %v1417_v1 = vmul.f32 %v3881_v62, %v1380_v59  ;;  %v3125_v59 = vld [vmem:[%s4460_s7 + $0x48] sm:$0xff] }
 0x21c   : > { %vm1253_vm10 = vcmp.gt.f32.partialorder %v1189_v0, 0.0  ;;  %v1285_v60 = vmul.f32 0.01, %v1189_v0  ;;  %1840 = vmatpush.bf16.msrb.mxu0 %v3125_v59 }
 0x21d   : > { %v3967_v17 = vadd.f32 %v3888_v19, %v1417_v1 }
 0x21e   : > { %v1317_v63 = vsel %vm1253_vm10, %v1189_v0, %v1285_v60 }
 0x21f   : > { %v1481_v3 = vpack.c.bf16 %v3967_v17, %v3964_v18  ;;  %v1349_v56 = vadd.f32 %v1317_v63, %v3668_v20  ;;  %v3139_v20 = vld [vmem:[%s4462_s9 + $0x38] sm:$0xff] }
 0x220   : > { %2199 = vmatpush.bf16.msrb.mxu1 %v3139_v20 }
 0x221   : > { %v1190_v43 = vpop.f32.mrf.mxu2  ;;  %1591 = vmatmul.bf16.gmra.mxu3 %v1481_v3  ;;  %v1381_v61 = vmax.f32 %v1349_v56, 0.0 }
 0x222   : > { %v1191_v33 = vadd.f32 %v3868_v47, %v1190_v43 }
 0x223   : > { %v1418_v9 = vmul.f32 %v3881_v62, %v1381_v61 }
 0x224   : > { %vm1254_vm11 = vcmp.gt.f32.partialorder %v1191_v33, 0.0  ;;  %v1286_v32 = vmul.f32 0.01, %v1191_v33 }
 0x225   : > { %v3988_v1 = vadd.f32 %v3888_v19, %v1418_v9 }
 0x226   : > { %v1318_v37 = vsel %vm1254_vm11, %v1191_v33, %v1286_v32  ;;  %v3997_v32 = vpop.f32.mrf.mxu3 }
 0x227   : > { %v1350_v11 = vadd.f32 %v1318_v37, %v3671_v21 }
 0x229   : > { %v1382_v14 = vmax.f32 %v1350_v11, 0.0  ;;  %v1193_v8 = vpop.f32.mrf.mxu2 }
 0x22a   : > { %v1194_v2 = vadd.f32 %v3868_v47, %v1193_v8 }
 0x22b   : > { %v1419_v0 = vmul.f32 %v3881_v62, %v1382_v14 }
 0x22c   : > { %vm1255_vm12 = vcmp.gt.f32.partialorder %v1194_v2, 0.0  ;;  %v1287_v21 = vmul.f32 0.01, %v1194_v2 }
 0x22d   : > { %v3991_v60 = vadd.f32 %v3888_v19, %v1419_v0 }
 0x22e   : > { %v1319_v63 = vsel %vm1255_vm12, %v1194_v2, %v1287_v21 }
 0x22f   : > { %v1482_v3 = vpack.c.bf16 %v3991_v60, %v3988_v1  ;;  %v1351_v56 = vadd.f32 %v1319_v63, %v3695_v52  ;;  %v4009_v63 = vpop.f32.mrf.mxu3 }
 0x231   : > { %v1195_v43 = vpop.f32.mrf.mxu2  ;;  %1596 = vmatmul.bf16.gmra.mxu3 %v1482_v3  ;;  %v1383_v37 = vmax.f32 %v1351_v56, 0.0 }
 0x232   : > { %v1196_v33 = vadd.f32 %v3868_v47, %v1195_v43 }
 0x233   : > { %v1420_v59 = vmul.f32 %v3881_v62, %v1383_v37 }
 0x234   : > { %vm1256_vm13 = vcmp.gt.f32.partialorder %v1196_v33, 0.0  ;;  %v1288_v61 = vmul.f32 0.01, %v1196_v33 }
 0x235   : > { %v4004_v0 = vadd.f32 %v3888_v19, %v1420_v59 }
 0x236   : > { %v1320_v11 = vsel %vm1256_vm13, %v1196_v33, %v1288_v61  ;;  %v3124_v33 = vld [vmem:[%s4460_s7 + $0x40] sm:$0xff]  ;;  %v3138_v61 = vld [vmem:[%s4462_s9 + $0x30] sm:$0xff] }
 0x237   : > { %v1352_v14 = vadd.f32 %v1320_v11, %v3698_v58  ;;  %4521 = vst [vmem:[#allocation25_spill] sm:$0xff] %v4004_v0  ;;  %1841 = vmatpush.bf16.msrb.mxu0 %v3124_v33  ;;  %2200 = vmatpush.bf16.msrb.mxu1 %v3138_v61 }
 0x239   : > { %v1384_v8 = vmax.f32 %v1352_v14, 0.0  ;;  %v1198_v9 = vpop.f32.mrf.mxu2 }
 0x23a   : > { %v1199_v20 = vadd.f32 %v3868_v47, %v1198_v9  ;;  %v4022_v9 = vpop.f32.mrf.mxu3 }
 0x23b   : > { %v1421_v52 = vmul.f32 %v3881_v62, %v1384_v8 }
 0x23c   : > { %vm1257_vm14 = vcmp.gt.f32.partialorder %v1199_v20, 0.0  ;;  %v1289_v2 = vmul.f32 0.01, %v1199_v20 }
 0x23d   : > { %v4007_v21 = vadd.f32 %v3888_v19, %v1421_v52 }
 0x23e   : > { %v1321_v3 = vsel %vm1257_vm14, %v1199_v20, %v1289_v2 }
 0x23f   : > { %4522 = vst [vmem:[#allocation26_spill] sm:$0xff] %v4007_v21  ;;  %v1483_v58 = vpack.c.bf16 %v4007_v21, %v4004_v0  ;;  %v1353_v56 = vadd.f32 %v1321_v3, %v3725_v27 }
 0x241   : > { %v1200_v43 = vpop.f32.mrf.mxu2  ;;  %1601 = vmatmul.bf16.gmra.mxu3 %v1483_v58  ;;  %v1385_v14 = vmax.f32 %v1353_v56, 0.0 }
 0x242   : > { %v1201_v37 = vadd.f32 %v3868_v47, %v1200_v43 }
 0x243   : > { %v1422_v52 = vmul.f32 %v3881_v62, %v1385_v14 }
 0x244   : > { %vm1258_vm15 = vcmp.gt.f32.partialorder %v1201_v37, 0.0  ;;  %v1290_v11 = vmul.f32 0.01, %v1201_v37 }
 0x245   : > { %v4028_v43 = vadd.f32 %v3888_v19, %v1422_v52 }
 0x246   : > { %v1322_v8 = vsel %vm1258_vm15, %v1201_v37, %v1290_v11  ;;  %v4036_v11 = vpop.f32.mrf.mxu3 }
 0x247   : > { %v1354_v27 = vadd.f32 %v1322_v8, %v3728_v28  ;;  %4523 = vst [vmem:[#allocation27_spill] sm:$0xff] %v4028_v43 }
 0x249   : > { %v1386_v59 = vmax.f32 %v1354_v27, 0.0  ;;  %v1203_v20 = vpop.f32.mrf.mxu2 }
 0x24a   : > { %v1204_v2 = vadd.f32 %v3868_v47, %v1203_v20 }
 0x24b   : > { %v1423_v3 = vmul.f32 %v3881_v62, %v1386_v59 }
 0x24c   : > { %vm1259_vm0 = vcmp.gt.f32.partialorder %v1204_v2, 0.0  ;;  %v1291_v58 = vmul.f32 0.01, %v1204_v2 }
 0x24d   : > { %v4031_v56 = vadd.f32 %v3888_v19, %v1423_v3 }
 0x24e   : > { %v1323_v33 = vsel %vm1259_vm0, %v1204_v2, %v1291_v58 }
 0x24f   : > { %4524 = vst [vmem:[#allocation28_spill] sm:$0xff] %v4031_v56  ;;  %v1484_v28 = vpack.c.bf16 %v4031_v56, %v4028_v43  ;;  %v1355_v61 = vadd.f32 %v1323_v33, %v3743_v7  ;;  %v3137_v7 = vld [vmem:[%s4462_s9 + $0x28] sm:$0xff] }
 0x250   : > { %2201 = vmatpush.bf16.msrb.mxu1 %v3137_v7 }
 0x251   : > { %v1205_v37 = vpop.f32.mrf.mxu2  ;;  %1606 = vmatmul.bf16.gmra.mxu3 %v1484_v28  ;;  %v1387_v27 = vmax.f32 %v1355_v61, 0.0  ;;  %v4046_v28 = vpop.f32.mrf.mxu3 }
 0x252   : > { %v1206_v14 = vadd.f32 %v3868_v47, %v1205_v37 }
 0x253   : > { %v1424_v2 = vmul.f32 %v3881_v62, %v1387_v27 }
 0x254   : > { %vm1260_vm1 = vcmp.gt.f32.partialorder %v1206_v14, 0.0  ;;  %v1292_v8 = vmul.f32 0.01, %v1206_v14 }
 0x255   : > { %v4049_v37 = vadd.f32 %v3888_v19, %v1424_v2  ;;  %v4061_v2 = vld [vmem:[%s4459_s6 + $0x1] ss:$0 sm:$0xff] }
 0x256   : > { %v1324_v59 = vsel %vm1260_vm1, %v1206_v14, %v1292_v8 }
 0x257   : > { %v1356_v20 = vadd.f32 %v1324_v59, %v3746_v10  ;;  %4525 = vst [vmem:[#allocation29_spill] sm:$0xff] %v4049_v37 }
 0x259   : > { %v1388_v52 = vmax.f32 %v1356_v20, 0.0  ;;  %v1208_v3 = vpop.f32.mrf.mxu2 }
 0x25a   : > { %v1209_v58 = vadd.f32 %v3868_v47, %v1208_v3 }
 0x25b   : > { %v1425_v33 = vmul.f32 %v3881_v62, %v1388_v52 }
 0x25c   : > { %vm1261_vm2 = vcmp.gt.f32.partialorder %v1209_v58, 0.0  ;;  %v1293_v61 = vmul.f32 0.01, %v1209_v58 }
 0x25d   : > { %v4052_v10 = vadd.f32 %v3888_v19, %v1425_v33 }
 0x25e   : > { %v1325_v14 = vsel %vm1261_vm2, %v1209_v58, %v1293_v61 }
 0x25f   : > { %4526 = vst [vmem:[#allocation30_spill] sm:$0xff] %v4052_v10  ;;  %v1485_v8 = vpack.c.bf16 %v4052_v10, %v4049_v37  ;;  %v1357_v27 = vadd.f32 %v1325_v14, %v3769_v49 }
 0x261   : > { %v1210_v59 = vpop.f32.mrf.mxu2  ;;  %1611 = vmatmul.bf16.gmra.mxu3 %v1485_v8  ;;  %v1389_v7 = vmax.f32 %v1357_v27, 0.0 }
 0x262   : > { %v1211_v20 = vadd.f32 %v3868_v47, %v1210_v59 }
 0x263   : > { %v1426_v14 = vmul.f32 %v3881_v62, %v1389_v7 }
 0x264   : > { %vm1262_vm3 = vcmp.gt.f32.partialorder %v1211_v20, 0.0  ;;  %v1294_v52 = vmul.f32 0.01, %v1211_v20  ;;  %v1572_v3 = vpop.f32.mrf.mxu3 }
 0x265   : > { %v1573_v10 = vadd.f32 %v4061_v2, %v1572_v3 }
 0x266   : > { %v1326_v33 = vsel %vm1262_vm3, %v1211_v20, %v1294_v52  ;;  %v4070_v20 = vadd.f32 %v3888_v19, %v1426_v14 }
 0x267   : > { %v1358_v58 = vadd.f32 %v1326_v33, %v3772_v36  ;;  %v1684_v56 = vmul.f32 0.01, %v1573_v10  ;;  %vm1652_vm5 = vcmp.gt.f32.partialorder %v1573_v10, 0.0  ;;  %v3136_v33 = vld [vmem:[%s4462_s9 + $0x20] sm:$0xff] }
 0x268   : > { %4527 = vst [vmem:[#allocation31_spill] sm:$0xff] %v4070_v20  ;;  %2202 = vmatpush.bf16.msrb.mxu1 %v3136_v33 }
 0x269   : > { %v1390_v61 = vmax.f32 %v1358_v58, 0.0  ;;  %v1213_v49 = vpop.f32.mrf.mxu2  ;;  %v1716_v58 = vsel %vm1652_vm5, %v1573_v10, %v1684_v56 }
 0x26a   : > { %v1214_v8 = vadd.f32 %v3868_v47, %v1213_v49 }
 0x26b   : > { %v1427_v59 = vmul.f32 %v3881_v62, %v1390_v61 }
 0x26c   : > { %vm1263_vm4 = vcmp.gt.f32.partialorder %v1214_v8, 0.0  ;;  %v1295_v27 = vmul.f32 0.01, %v1214_v8  ;;  %v1574_v37 = vpop.f32.mrf.mxu3 }
 0x26d   : > { %v1575_v43 = vadd.f32 %v4061_v2, %v1574_v37  ;;  %v4073_v36 = vadd.f32 %v3888_v19, %v1427_v59 }
 0x26e   : > { %v1327_v52 = vsel %vm1263_vm4, %v1214_v8, %v1295_v27 }
 0x26f   : > { %4528 = vst [vmem:[#allocation32_spill] sm:$0xff] %v4073_v36  ;;  %vm1653_vm6 = vcmp.gt.f32.partialorder %v1575_v43, 0.0  ;;  %v1685_v3 = vmul.f32 0.01, %v1575_v43  ;;  %v1486_v7 = vpack.c.bf16 %v4073_v36, %v4070_v20  ;;  %v1359_v37 = vadd.f32 %v1327_v52, %v3791_v22 }
 0x271   : > { %v1717_v61 = vsel %vm1653_vm6, %v1575_v43, %v1685_v3  ;;  %v1215_v49 = vpop.f32.mrf.mxu2  ;;  %1616 = vmatmul.bf16.gmra.mxu3 %v1486_v7  ;;  %v1391_v21 = vmax.f32 %v1359_v37, 0.0 }
 0x272   : > { %v1748_v14 = vpack.c.bf16 %v1717_v61, %v1716_v58  ;;  %v1216_v59 = vadd.f32 %v3868_v47, %v1215_v49 }
 0x273   : > { %v1428_v22 = vmul.f32 %v3881_v62, %v1391_v21 }
 0x274   : > { %vm1264_vm7 = vcmp.gt.f32.partialorder %v1216_v59, 0.0  ;;  %v1296_v8 = vmul.f32 0.01, %v1216_v59  ;;  %v1577_v27 = vpop.f32.mrf.mxu3  ;;  %1842 = vmatmul.bf16.vlgmr.msrb.gmra.mxu0 %v1748_v14 }
 0x275   : > { %v1578_v56 = vadd.f32 %v4061_v2, %v1577_v27  ;;  %v4089_v37 = vadd.f32 %v3888_v19, %v1428_v22  ;;  %v1226_v27 = vadd.f32 %v3868_v47, %v3971_v40 }
 0x276   : > { %v1328_v36 = vsel %vm1264_vm7, %v1216_v59, %v1296_v8 }
 0x277   : > { %v1360_v20 = vadd.f32 %v1328_v36, %v3794_v13  ;;  %v1686_v33 = vmul.f32 0.01, %v1578_v56  ;;  %vm1654_vm9 = vcmp.gt.f32.partialorder %v1578_v56, 0.0  ;;  %vm1268_vm12 = vcmp.gt.f32.partialorder %v1226_v27, 0.0 }
 0x279   : > { %v1392_v0 = vmax.f32 %v1360_v20, 0.0  ;;  %v1218_v10 = vpop.f32.mrf.mxu2  ;;  %v1718_v49 = vsel %vm1654_vm9, %v1578_v56, %v1686_v33  ;;  %v3135_v56 = vld [vmem:[%s4462_s9 + $0x18] sm:$0xff] }
 0x27a   : > { %v1219_v43 = vadd.f32 %v3868_v47, %v1218_v10  ;;  %2203 = vmatpush.bf16.msrb.mxu1 %v3135_v56  ;;  %v1231_v56 = vadd.f32 %v3868_v47, %v3997_v32 }
 0x27b   : > { %v1429_v52 = vmul.f32 %v3881_v62, %v1392_v0 }
 0x27c   : > { %vm1265_vm8 = vcmp.gt.f32.partialorder %v1219_v43, 0.0  ;;  %v1297_v3 = vmul.f32 0.01, %v1219_v43  ;;  %v1579_v7 = vpop.f32.mrf.mxu3  ;;  %vm1270_vm0 = vcmp.gt.f32.partialorder %v1231_v56, 0.0 }
 0x27d   : > { %v1580_v58 = vadd.f32 %v4061_v2, %v1579_v7  ;;  %v4092_v13 = vadd.f32 %v3888_v19, %v1429_v52  ;;  %v1224_v52 = vadd.f32 %v3868_v47, %v3957_v35  ;;  %v1300_v7 = vmul.f32 0.01, %v1226_v27 }
 0x27e   : > { %v1329_v20 = vsel %vm1265_vm8, %v1219_v43, %v1297_v3 }
 0x27f   : > { %vm1655_vm10 = vcmp.gt.f32.partialorder %v1580_v58, 0.0  ;;  %v1687_v21 = vmul.f32 0.01, %v1580_v58  ;;  %v1487_v36 = vpack.c.bf16 %v4092_v13, %v4089_v37  ;;  %v1361_v0 = vadd.f32 %v1329_v20, %v3813_v46 }
 0x280   : > { %v1299_v20 = vmul.f32 0.01, %v1224_v52  ;;  %vm1267_vm13 = vcmp.gt.f32.partialorder %v1224_v52, 0.0  ;;  %v1332_v35 = vsel %vm1268_vm12, %v1226_v27, %v1300_v7 }
 0x281   : > { %v1220_v61 = vpop.f32.mrf.mxu2  ;;  %1621 = vmatmul.bf16.gmra.mxu3 %v1487_v36  ;;  %v1719_v14 = vsel %vm1655_vm10, %v1580_v58, %v1687_v21  ;;  %v1393_v43 = vmax.f32 %v1361_v0, 0.0 }
 0x282   : > { %v1221_v59 = vadd.f32 %v3868_v47, %v1220_v61  ;;  %v1749_v8 = vpack.c.bf16 %v1719_v14, %v1718_v49  ;;  %v1331_v14 = vsel %vm1267_vm13, %v1224_v52, %v1299_v20 }
 0x283   : > { %v1430_v58 = vmul.f32 %v3881_v62, %v1393_v43  ;;  %v1363_v27 = vadd.f32 %v1331_v14, %v3517_v48 }
 0x284   : > { %vm1266_vm11 = vcmp.gt.f32.partialorder %v1221_v59, 0.0  ;;  %v1298_v10 = vmul.f32 0.01, %v1221_v59  ;;  %v1582_v22 = vpop.f32.mrf.mxu3  ;;  %1847 = vmatmul.bf16.gmra.mxu0 %v1749_v8 }
 0x285   : > { %v1583_v40 = vadd.f32 %v4061_v2, %v1582_v22  ;;  %v4111_v61 = vadd.f32 %v3888_v19, %v1430_v58  ;;  %v1395_v52 = vmax.f32 %v1363_v27, 0.0  ;;  %v1302_v58 = vmul.f32 0.01, %v1231_v56 }
 0x286   : > { %v1330_v3 = vsel %vm1266_vm11, %v1221_v59, %v1298_v10  ;;  %v1364_v59 = vadd.f32 %v1332_v35, %v3522_v50  ;;  %v1229_v50 = vadd.f32 %v3868_v47, %v3983_v30 }
 0x287   : > { %v1362_v46 = vadd.f32 %v1330_v3, %v3816_v39  ;;  %v1688_v0 = vmul.f32 0.01, %v1583_v40  ;;  %vm1656_vm14 = vcmp.gt.f32.partialorder %v1583_v40, 0.0  ;;  %v1334_v32 = vsel %vm1270_vm0, %v1231_v56, %v1302_v58 }
 0x288   : > { %v1301_v20 = vmul.f32 0.01, %v1229_v50  ;;  %vm1269_vm1 = vcmp.gt.f32.partialorder %v1229_v50, 0.0  ;;  %v1366_v14 = vadd.f32 %v1334_v32, %v3559_v5  ;;  %v1236_v5 = vadd.f32 %v3868_v47, %v4022_v9 }
 0x289   : > { %v1394_v33 = vmax.f32 %v1362_v46, 0.0  ;;  %v1720_v22 = vsel %vm1656_vm14, %v1583_v40, %v1688_v0  ;;  %v1396_v46 = vmax.f32 %v1364_v59, 0.0  ;;  %v1432_v40 = vmul.f32 %v3881_v62, %v1395_v52 }
 0x28a   : > { %v1234_v52 = vadd.f32 %v3868_v47, %v4009_v63  ;;  %vm1272_vm4 = vcmp.gt.f32.partialorder %v1236_v5, 0.0 }
 0x28b   : > { %v1431_v21 = vmul.f32 %v3881_v62, %v1394_v33  ;;  %v1433_v33 = vmul.f32 %v3881_v62, %v1396_v46  ;;  %v4132_v30 = vadd.f32 %v3888_v19, %v1432_v40  ;;  %v1398_v46 = vmax.f32 %v1366_v14, 0.0 }
 0x28c   : > { %v1584_v36 = vpop.f32.mrf.mxu3  ;;  %vm1271_vm5 = vcmp.gt.f32.partialorder %v1234_v52, 0.0 }
 0x28d   : > { %v1585_v39 = vadd.f32 %v4061_v2, %v1584_v36  ;;  %v4114_v49 = vadd.f32 %v3888_v19, %v1431_v21  ;;  %v4128_v21 = vadd.f32 %v3888_v19, %v1433_v33  ;;  %v1304_v33 = vmul.f32 0.01, %v1236_v5 }
 0x28f   : > { %vm1657_vm15 = vcmp.gt.f32.partialorder %v1585_v39, 0.0  ;;  %v1689_v8 = vmul.f32 0.01, %v1585_v39  ;;  %v1488_v10 = vpack.c.bf16 %v4114_v49, %v4111_v61  ;;  %v1336_v9 = vsel %vm1272_vm4, %v1236_v5, %v1304_v33 }
 0x290   : > { %v1239_v5 = vadd.f32 %v3868_v47, %v4036_v11 }
 0x291   : > { %1626 = vmatmul.bf16.gmra.mxu3 %v1488_v10  ;;  %v1721_v43 = vsel %vm1657_vm15, %v1585_v39, %v1689_v8  ;;  %v1333_v39 = vsel %vm1269_vm1, %v1229_v50, %v1301_v20  ;;  %v1489_v8 = vpack.c.bf16 %v4128_v21, %v4132_v30  ;;  %v3134_v10 = vld [vmem:[%s4462_s9 + $0x10] sm:$0xff]  ;;  %v1435_v50 = vmul.f32 %v3881_v62, %v1398_v46 }
 0x292   : > { %v1750_v3 = vpack.c.bf16 %v1721_v43, %v1720_v22  ;;  %v1365_v27 = vadd.f32 %v1333_v39, %v3556_v4  ;;  %2204 = vmatpush.bf16.msrb.mxu1 %v3134_v10  ;;  %vm1273_vm9 = vcmp.gt.f32.partialorder %v1239_v5, 0.0 }
 0x293   : > { %v4149_v40 = vadd.f32 %v3888_v19, %v1435_v50 }
 0x294   : > { %v1587_v7 = vpop.f32.mrf.mxu3  ;;  %1852 = vmatmul.bf16.gmra.mxu0 %v1750_v3 }
 0x295   : > { %v1588_v48 = vadd.f32 %v4061_v2, %v1587_v7  ;;  %v1397_v7 = vmax.f32 %v1365_v27, 0.0  ;;  %v3147_v27 = vld [vmem:[%s4464_s11 + $0x38] sm:$0xff] }
 0x296   : > { %2404 = vmatpush.bf16.msrb.mxu2 %v3147_v27 }
 0x297   : > { %v1690_v36 = vmul.f32 0.01, %v1588_v48  ;;  %vm1658_vm2 = vcmp.gt.f32.partialorder %v1588_v48, 0.0  ;;  %v1434_v58 = vmul.f32 %v3881_v62, %v1397_v7 }
 0x299   : > { %v1722_v22 = vsel %vm1658_vm2, %v1588_v48, %v1690_v36  ;;  %v1303_v48 = vmul.f32 0.01, %v1234_v52  ;;  %v4153_v63 = vadd.f32 %v3888_v19, %v1434_v58 }
 0x29b   : > { %v1335_v36 = vsel %vm1271_vm5, %v1234_v52, %v1303_v48  ;;  %v1490_v14 = vpack.c.bf16 %v4149_v40, %v4153_v63 }
 0x29c   : > { %v1589_v35 = vpop.f32.mrf.mxu3 }
 0x29d   : > { %v1590_v0 = vadd.f32 %v4061_v2, %v1589_v35 }
 0x29f   : > { %vm1659_vm3 = vcmp.gt.f32.partialorder %v1590_v0, 0.0  ;;  %v1691_v59 = vmul.f32 0.01, %v1590_v0 }
 0x2a1   : > { %1631 = vmatmul.bf16.gmra.mxu3 %v1489_v8  ;;  %v1723_v43 = vsel %vm1659_vm3, %v1590_v0, %v1691_v59  ;;  %v1368_v0 = vadd.f32 %v1336_v9, %v3596_v24  ;;  %v1367_v59 = vadd.f32 %v1335_v36, %v3593_v23  ;;  %v1241_v24 = vadd.f32 %v3868_v47, %v4046_v28 }
 0x2a2   : > { %v1751_v3 = vpack.c.bf16 %v1723_v43, %v1722_v22  ;;  %v1305_v28 = vmul.f32 0.01, %v1239_v5 }
 0x2a3   : > { %v1400_v43 = vmax.f32 %v1368_v0, 0.0  ;;  %v1399_v46 = vmax.f32 %v1367_v59, 0.0  ;;  %v1306_v7 = vmul.f32 0.01, %v1241_v24  ;;  %vm1274_vm8 = vcmp.gt.f32.partialorder %v1241_v24, 0.0 }
 0x2a4   : > { %v1592_v56 = vpop.f32.mrf.mxu3  ;;  %1857 = vmatmul.bf16.gmra.mxu0 %v1751_v3  ;;  %v1337_v9 = vsel %vm1273_vm9, %v1239_v5, %v1305_v28 }
 0x2a5   : > { %v1593_v4 = vadd.f32 %v4061_v2, %v1592_v56  ;;  %v1437_v23 = vmul.f32 %v3881_v62, %v1400_v43  ;;  %v3133_v56 = vld [vmem:[%s4462_s9 + $0x8] sm:$0xff]  ;;  %v1436_v50 = vmul.f32 %v3881_v62, %v1399_v46  ;;  %v1369_v36 = vadd.f32 %v1337_v9, %v3629_v53 }
 0x2a6   : > { %2205 = vmatpush.bf16.msrb.mxu1 %v3133_v56 }
 0x2a7   : > { %v1692_v32 = vmul.f32 0.01, %v1593_v4  ;;  %vm1660_vm6 = vcmp.gt.f32.partialorder %v1593_v4, 0.0  ;;  %v4173_v33 = vadd.f32 %v3888_v19, %v1437_v23  ;;  %v4177_v48 = vadd.f32 %v3888_v19, %v1436_v50 }
 0x2a9   : > { %v1724_v8 = vsel %vm1660_vm6, %v1593_v4, %v1692_v32  ;;  %v1338_v4 = vsel %vm1274_vm8, %v1241_v24, %v1306_v7 }
 0x2ac   : > { %v1594_v20 = vpop.f32.mrf.mxu3 }
 0x2ad   : > { %v1595_v35 = vadd.f32 %v4061_v2, %v1594_v20  ;;  %v1370_v20 = vadd.f32 %v1338_v4, %v3632_v54  ;;  %v3146_v54 = vld [vmem:[%s4464_s11 + $0x30] sm:$0xff] }
 0x2ae   : > { %2405 = vmatpush.bf16.msrb.mxu2 %v3146_v54 }
 0x2af   : > { %vm1661_vm7 = vcmp.gt.f32.partialorder %v1595_v35, 0.0  ;;  %v1693_v39 = vmul.f32 0.01, %v1595_v35  ;;  %v1402_v59 = vmax.f32 %v1370_v20, 0.0 }
 0x2b1   : > { %1636 = vmatmul.bf16.gmra.mxu3 %v1490_v14  ;;  %v1725_v10 = vsel %vm1661_vm7, %v1595_v35, %v1693_v39  ;;  %v1491_v35 = vpack.c.bf16 %v4173_v33, %v4177_v48  ;;  %v1439_v27 = vmul.f32 %v3881_v62, %v1402_v59 }
 0x2b2   : > { %v1752_v22 = vpack.c.bf16 %v1725_v10, %v1724_v8  ;;  %v1401_v10 = vmax.f32 %v1369_v36, 0.0 }
 0x2b3   : > { %v4190_v53 = vadd.f32 %v3888_v19, %v1439_v27 }
 0x2b4   : > { %v1597_v3 = vpop.f32.mrf.mxu3  ;;  %1862 = vmatmul.bf16.gmra.mxu0 %v1752_v22  ;;  %v1438_v43 = vmul.f32 %v3881_v62, %v1401_v10  ;;  %v3132_v62 = vld [vmem:[%s4462_s9] sm:$0xff] }
 0x2b5   : > { %v1598_v52 = vadd.f32 %v4061_v2, %v1597_v3  ;;  %2206 = vmatpush.bf16.msrb.mxu1 %v3132_v62 }
 0x2b6   : > { %v4194_v5 = vadd.f32 %v3888_v19, %v1438_v43 }
 0x2b7   : > { %v1694_v11 = vmul.f32 0.01, %v1598_v52  ;;  %vm1662_vm10 = vcmp.gt.f32.partialorder %v1598_v52, 0.0 }
 0x2b8   : > { %v1492_v56 = vpack.c.bf16 %v4190_v53, %v4194_v5 }
 0x2b9   : > { %v1726_v0 = vsel %vm1662_vm10, %v1598_v52, %v1694_v11 }
 0x2bc   : > { %v1599_v47 = vpop.f32.mrf.mxu3 }
 0x2bd   : > { %v1600_v58 = vadd.f32 %v4061_v2, %v1599_v47 }
 0x2bf   : > { %vm1663_vm11 = vcmp.gt.f32.partialorder %v1600_v58, 0.0  ;;  %v1695_v32 = vmul.f32 0.01, %v1600_v58 }
 0x2c1   : > { %1641 = vmatmul.bf16.gmra.mxu3 %v1491_v35  ;;  %v1727_v39 = vsel %vm1663_vm11, %v1600_v58, %v1695_v32 }
 0x2c2   : > { %v1753_v14 = vpack.c.bf16 %v1727_v39, %v1726_v0  ;;  %v3145_v0 = vld [vmem:[%s4464_s11 + $0x28] sm:$0xff] }
 0x2c3   : > { %2406 = vmatpush.bf16.msrb.mxu2 %v3145_v0 }
 0x2c4   : > { %v1602_v8 = vpop.f32.mrf.mxu3  ;;  %1867 = vmatmul.bf16.gmra.mxu0 %v1753_v14 }
 0x2c5   : > { %v1603_v22 = vadd.f32 %v4061_v2, %v1602_v8  ;;  %v4211_v8 = vld [vmem:[%s4461_s8 + $0x1] ss:$0 sm:$0xff] }
 0x2c7   : > { %v1696_v3 = vmul.f32 0.01, %v1603_v22  ;;  %vm1664_vm12 = vcmp.gt.f32.partialorder %v1603_v22, 0.0 }
 0x2c9   : > { %v1728_v7 = vsel %vm1664_vm12, %v1603_v22, %v1696_v3 }
 0x2cc   : > { %v1604_v24 = vpop.f32.mrf.mxu3 }
 0x2cd   : > { %v1605_v46 = vadd.f32 %v4061_v2, %v1604_v24 }
 0x2cf   : > { %vm1665_vm13 = vcmp.gt.f32.partialorder %v1605_v46, 0.0  ;;  %v1697_v23 = vmul.f32 0.01, %v1605_v46 }
 0x2d1   : > { %1646 = vmatmul.bf16.gmra.mxu3 %v1492_v56  ;;  %v1729_v52 = vsel %vm1665_vm13, %v1605_v46, %v1697_v23 }
 0x2d2   : > { %v1754_v50 = vpack.c.bf16 %v1729_v52, %v1728_v7 }
 0x2d4   : > { %v1607_v28 = vpop.f32.mrf.mxu3  ;;  %1872 = vmatmul.bf16.gmra.mxu0 %v1754_v50 }
 0x2d5   : > { %v1608_v19 = vadd.f32 %v4061_v2, %v1607_v28 }
 0x2d7   : > { %v1698_v47 = vmul.f32 0.01, %v1608_v19  ;;  %vm1666_vm14 = vcmp.gt.f32.partialorder %v1608_v19, 0.0 }
 0x2d9   : > { %v1730_v9 = vsel %vm1666_vm14, %v1608_v19, %v1698_v47 }
 0x2dc   : > { %v1609_v4 = vpop.f32.mrf.mxu3 }
 0x2dd   : > { %v1610_v11 = vadd.f32 %v4061_v2, %v1609_v4 }
 0x2df   : > { %vm1667_vm15 = vcmp.gt.f32.partialorder %v1610_v11, 0.0  ;;  %v1699_v58 = vmul.f32 0.01, %v1610_v11 }
 0x2e1   : > { %v1731_v20 = vsel %vm1667_vm15, %v1610_v11, %v1699_v58 }
 0x2e2   : > { %v1755_v32 = vpack.c.bf16 %v1731_v20, %v1730_v9 }
 0x2e4   : > { %v1612_v35 = vpop.f32.mrf.mxu3  ;;  %1877 = vmatmul.bf16.gmra.mxu0 %v1755_v32 }
 0x2e5   : > { %v1613_v36 = vadd.f32 %v4061_v2, %v1612_v35 }
 0x2e7   : > { %v1700_v14 = vmul.f32 0.01, %v1613_v36  ;;  %vm1668_vm0 = vcmp.gt.f32.partialorder %v1613_v36, 0.0 }
 0x2e9   : > { %v1732_v54 = vsel %vm1668_vm0, %v1613_v36, %v1700_v14 }
 0x2ec   : > { %v1614_v39 = vpop.f32.mrf.mxu3 }
 0x2ed   : > { %v1615_v59 = vadd.f32 %v4061_v2, %v1614_v39 }
 0x2ef   : > { %vm1669_vm1 = vcmp.gt.f32.partialorder %v1615_v59, 0.0  ;;  %v1701_v10 = vmul.f32 0.01, %v1615_v59 }
 0x2f1   : > { %v1843_v27 = vpop.f32.mrf.mxu0  ;;  %v1733_v22 = vsel %vm1669_vm1, %v1615_v59, %v1701_v10 }
 0x2f2   : > { %v1844_v43 = vadd.f32 %v4211_v8, %v1843_v27  ;;  %v1756_v24 = vpack.c.bf16 %v1733_v22, %v1732_v54 }
 0x2f4   : > { %v1955_v3 = vmul.f32 0.01, %v1844_v43  ;;  %v1617_v46 = vpop.f32.mrf.mxu3  ;;  %1882 = vmatmul.bf16.gmra.mxu0 %v1756_v24  ;;  %vm1923_vm2 = vcmp.gt.f32.partialorder %v1844_v43, 0.0 }
 0x2f5   : > { %v1618_v56 = vadd.f32 %v4061_v2, %v1617_v46 }
 0x2f6   : > { %v1987_v23 = vsel %vm1923_vm2, %v1844_v43, %v1955_v3 }
 0x2f7   : > { %v2019_v52 = vadd.f32 %v1987_v23, %v3894_v26  ;;  %v1702_v19 = vmul.f32 0.01, %v1618_v56  ;;  %vm1670_vm4 = vcmp.gt.f32.partialorder %v1618_v56, 0.0  ;;  %v3144_v26 = vld [vmem:[%s4464_s11 + $0x20] sm:$0xff] }
 0x2f8   : > { %2407 = vmatpush.bf16.msrb.mxu2 %v3144_v26  ;;  %v3143_v26 = vld [vmem:[%s4464_s11 + $0x18] sm:$0xff] }
 0x2f9   : > { %v1845_v62 = vpop.f32.mrf.mxu0  ;;  %v2051_v11 = vmax.f32 %v2019_v52, 0.0  ;;  %v1734_v35 = vsel %vm1670_vm4, %v1618_v56, %v1702_v19 }
 0x2fa   : > { %v1846_v7 = vadd.f32 %v4211_v8, %v1845_v62 }
 0x2fb   : > { %v2083_v14 = vadd.f32 %v2051_v11, %v3480_v31 }
 0x2fc   : > { %vm1924_vm3 = vcmp.gt.f32.partialorder %v1846_v7, 0.0  ;;  %v1956_v50 = vmul.f32 0.01, %v1846_v7  ;;  %v1619_v28 = vpop.f32.mrf.mxu3  ;;  %2408 = vmatpush.bf16.msrb.mxu2 %v3143_v26 }
 0x2fd   : > { %v1620_v4 = vadd.f32 %v4061_v2, %v1619_v28 }
 0x2fe   : > { %v1988_v47 = vsel %vm1924_vm3, %v1846_v7, %v1956_v50 }
 0x2ff   : > { %v2020_v58 = vadd.f32 %v1988_v47, %v3897_v42  ;;  %vm1671_vm5 = vcmp.gt.f32.partialorder %v1620_v4, 0.0  ;;  %v1703_v9 = vmul.f32 0.01, %v1620_v4 }
 0x301   : > { %v2052_v20 = vmax.f32 %v2020_v58, 0.0  ;;  %v1848_v32 = vpop.f32.mrf.mxu0  ;;  %v1735_v36 = vsel %vm1671_vm5, %v1620_v4, %v1703_v9 }
 0x302   : > { %v1849_v0 = vadd.f32 %v4211_v8, %v1848_v32  ;;  %v1757_v39 = vpack.c.bf16 %v1735_v36, %v1734_v35 }
 0x303   : > { %v2084_v59 = vadd.f32 %v2052_v20, %v3498_v38 }
 0x304   : > { %v1957_v10 = vmul.f32 0.01, %v1849_v0  ;;  %v1622_v42 = vpop.f32.mrf.mxu3  ;;  %1887 = vmatmul.bf16.gmra.mxu0 %v1757_v39  ;;  %vm1925_vm6 = vcmp.gt.f32.partialorder %v1849_v0, 0.0 }
 0x305   : > { %v2115_v27 = vpack.c.bf16 %v2084_v59, %v2083_v14  ;;  %v1623_v22 = vadd.f32 %v4061_v2, %v1622_v42 }
 0x306   : > { %v1989_v54 = vsel %vm1925_vm6, %v1849_v0, %v1957_v10 }
 0x307   : > { %2207 = vmatmul.bf16.vlgmr.msrb.gmra.mxu1 %v2115_v27  ;;  %v2021_v3 = vadd.f32 %v1989_v54, %v3913_v29  ;;  %v1704_v23 = vmul.f32 0.01, %v1623_v22  ;;  %vm1672_vm8 = vcmp.gt.f32.partialorder %v1623_v22, 0.0 }
 0x309   : > { %v1850_v43 = vpop.f32.mrf.mxu0  ;;  %v2053_v62 = vmax.f32 %v2021_v3, 0.0  ;;  %v1736_v19 = vsel %vm1672_vm8, %v1623_v22, %v1704_v23 }
 0x30a   : > { %v1851_v24 = vadd.f32 %v4211_v8, %v1850_v43 }
 0x30b   : > { %v2085_v11 = vadd.f32 %v2053_v62, %v3525_v51 }
 0x30c   : > { %vm1926_vm7 = vcmp.gt.f32.partialorder %v1851_v24, 0.0  ;;  %v1958_v46 = vmul.f32 0.01, %v1851_v24  ;;  %v1624_v31 = vpop.f32.mrf.mxu3 }
 0x30d   : > { %v1625_v38 = vadd.f32 %v4061_v2, %v1624_v31 }
 0x30e   : > { %v1990_v56 = vsel %vm1926_vm7, %v1851_v24, %v1958_v46 }
 0x30f   : > { %v2022_v7 = vadd.f32 %v1990_v56, %v3916_v45  ;;  %vm1673_vm9 = vcmp.gt.f32.partialorder %v1625_v38, 0.0  ;;  %v1705_v52 = vmul.f32 0.01, %v1625_v38 }
 0x311   : > { %v2054_v50 = vmax.f32 %v2022_v7, 0.0  ;;  %v1853_v28 = vpop.f32.mrf.mxu0  ;;  %v1737_v4 = vsel %vm1673_vm9, %v1625_v38, %v1705_v52 }
 0x312   : > { %v1854_v47 = vadd.f32 %v4211_v8, %v1853_v28  ;;  %v1758_v29 = vpack.c.bf16 %v1737_v4, %v1736_v19 }
 0x313   : > { %v2086_v58 = vadd.f32 %v2054_v50, %v3535_v57 }
 0x314   : > { %v1959_v9 = vmul.f32 0.01, %v1854_v47  ;;  %v1627_v20 = vpop.f32.mrf.mxu3  ;;  %1892 = vmatmul.bf16.gmra.mxu0 %v1758_v29  ;;  %vm1927_vm10 = vcmp.gt.f32.partialorder %v1854_v47, 0.0 }
 0x315   : > { %v2116_v32 = vpack.c.bf16 %v2086_v58, %v2085_v11  ;;  %v1628_v35 = vadd.f32 %v4061_v2, %v1627_v20 }
 0x316   : > { %v1991_v45 = vsel %vm1927_vm10, %v1854_v47, %v1959_v9 }
 0x317   : > { %2212 = vmatmul.bf16.gmra.mxu1 %v2116_v32  ;;  %v2023_v51 = vadd.f32 %v1991_v45, %v3931_v41  ;;  %v1706_v14 = vmul.f32 0.01, %v1628_v35  ;;  %vm1674_vm12 = vcmp.gt.f32.partialorder %v1628_v35, 0.0 }
 0x319   : > { %v1855_v36 = vpop.f32.mrf.mxu0  ;;  %v2055_v42 = vmax.f32 %v2023_v51, 0.0  ;;  %v1738_v24 = vsel %vm1674_vm12, %v1628_v35, %v1706_v14 }
 0x31a   : > { %v1856_v0 = vadd.f32 %v4211_v8, %v1855_v36 }
 0x31b   : > { %v2087_v31 = vadd.f32 %v2055_v42, %v3562_v6 }
 0x31c   : > { %vm1928_vm11 = vcmp.gt.f32.partialorder %v1856_v0, 0.0  ;;  %v1960_v57 = vmul.f32 0.01, %v1856_v0  ;;  %v1629_v39 = vpop.f32.mrf.mxu3 }
 0x31d   : > { %v1630_v59 = vadd.f32 %v4061_v2, %v1629_v39 }
 0x31e   : > { %v1992_v10 = vsel %vm1928_vm11, %v1856_v0, %v1960_v57 }
 0x31f   : > { %v2024_v27 = vadd.f32 %v1992_v10, %v3934_v16  ;;  %vm1675_vm13 = vcmp.gt.f32.partialorder %v1630_v59, 0.0  ;;  %v1707_v54 = vmul.f32 0.01, %v1630_v59 }
 0x321   : > { %v2056_v22 = vmax.f32 %v2024_v27, 0.0  ;;  %v1858_v43 = vpop.f32.mrf.mxu0  ;;  %v1739_v3 = vsel %vm1675_vm13, %v1630_v59, %v1707_v54 }
 0x322   : > { %v1859_v41 = vadd.f32 %v4211_v8, %v1858_v43  ;;  %v1759_v46 = vpack.c.bf16 %v1739_v3, %v1738_v24 }
 0x323   : > { %v2088_v23 = vadd.f32 %v2056_v22, %v3572_v12 }
 0x324   : > { %v1961_v38 = vmul.f32 0.01, %v1859_v41  ;;  %v1632_v56 = vpop.f32.mrf.mxu3  ;;  %1897 = vmatmul.bf16.gmra.mxu0 %v1759_v46  ;;  %vm1929_vm14 = vcmp.gt.f32.partialorder %v1859_v41, 0.0 }
 0x325   : > { %v2117_v62 = vpack.c.bf16 %v2088_v23, %v2087_v31  ;;  %v1633_v7 = vadd.f32 %v4061_v2, %v1632_v56 }
 0x326   : > { %v1993_v16 = vsel %vm1929_vm14, %v1859_v41, %v1961_v38 }
 0x327   : > { %2217 = vmatmul.bf16.gmra.mxu1 %v2117_v62  ;;  %v2025_v28 = vadd.f32 %v1993_v16, %v3945_v44  ;;  %v1708_v6 = vmul.f32 0.01, %v1633_v7  ;;  %vm1676_vm0 = vcmp.gt.f32.partialorder %v1633_v7, 0.0  ;;  %v3142_v44 = vld [vmem:[%s4464_s11 + $0x10] sm:$0xff]  ;;  %v4529_v62 = vld [vmem:[#allocation10_spill] sm:$0xff] }
 0x328   : > { %2409 = vmatpush.bf16.msrb.mxu2 %v3142_v44 }
 0x329   : > { %v1860_v52 = vpop.f32.mrf.mxu0  ;;  %v2057_v29 = vmax.f32 %v2025_v28, 0.0  ;;  %v1740_v32 = vsel %vm1676_vm0, %v1633_v7, %v1708_v6 }
 0x32a   : > { %v1861_v50 = vadd.f32 %v4211_v8, %v1860_v52 }
 0x32b   : > { %v2089_v26 = vadd.f32 %v2057_v29, %v3599_v25 }
 0x32c   : > { %vm1930_vm15 = vcmp.gt.f32.partialorder %v1861_v50, 0.0  ;;  %v1962_v19 = vmul.f32 0.01, %v1861_v50  ;;  %v1634_v4 = vpop.f32.mrf.mxu3 }
 0x32d   : > { %v1635_v12 = vadd.f32 %v4061_v2, %v1634_v4  ;;  %v3141_v4 = vld [vmem:[%s4464_s11 + $0x8] sm:$0xff] }
 0x32e   : > { %v1994_v47 = vsel %vm1930_vm15, %v1861_v50, %v1962_v19  ;;  %2410 = vmatpush.bf16.msrb.mxu2 %v3141_v4 }
 0x32f   : > { %v2026_v11 = vadd.f32 %v1994_v47, %v3948_v15  ;;  %vm1677_vm1 = vcmp.gt.f32.partialorder %v1635_v12, 0.0  ;;  %v1709_v58 = vmul.f32 0.01, %v1635_v12 }
 0x331   : > { %v2058_v9 = vmax.f32 %v2026_v11, 0.0  ;;  %v1863_v20 = vpop.f32.mrf.mxu0  ;;  %v1741_v45 = vsel %vm1677_vm1, %v1635_v12, %v1709_v58 }
 0x332   : > { %v1864_v35 = vadd.f32 %v4211_v8, %v1863_v20  ;;  %v1760_v36 = vpack.c.bf16 %v1741_v45, %v1740_v32 }
 0x333   : > { %v2090_v0 = vadd.f32 %v2058_v9, %v3609_v34 }
 0x334   : > { %v1963_v51 = vmul.f32 0.01, %v1864_v35  ;;  %v1637_v15 = vpop.f32.mrf.mxu3  ;;  %1902 = vmatmul.bf16.gmra.mxu0 %v1760_v36  ;;  %vm1931_vm2 = vcmp.gt.f32.partialorder %v1864_v35, 0.0 }
 0x335   : > { %v2118_v57 = vpack.c.bf16 %v2090_v0, %v2089_v26  ;;  %v1638_v14 = vadd.f32 %v4061_v2, %v1637_v15  ;;  %v4530_v0 = vld [vmem:[#allocation11_spill] sm:$0xff]  ;;  %v4531_v15 = vld [vmem:[#allocation12_spill] sm:$0xff] }
 0x336   : > { %v1995_v39 = vsel %vm1931_vm2, %v1864_v35, %v1963_v51 }
 0x337   : > { %2222 = vmatmul.bf16.gmra.mxu1 %v2118_v57  ;;  %v2027_v42 = vadd.f32 %v1995_v39, %v3964_v18  ;;  %v1710_v54 = vmul.f32 0.01, %v1638_v14  ;;  %vm1678_vm4 = vcmp.gt.f32.partialorder %v1638_v14, 0.0 }
 0x339   : > { %v1865_v59 = vpop.f32.mrf.mxu0  ;;  %v2059_v43 = vmax.f32 %v2027_v42, 0.0  ;;  %v1742_v31 = vsel %vm1678_vm4, %v1638_v14, %v1710_v54 }
 0x33a   : > { %v1866_v10 = vadd.f32 %v4211_v8, %v1865_v59 }
 0x33b   : > { %v2091_v56 = vadd.f32 %v2059_v43, %v3635_v55 }
 0x33c   : > { %vm1932_vm3 = vcmp.gt.f32.partialorder %v1866_v10, 0.0  ;;  %v1964_v27 = vmul.f32 0.01, %v1866_v10  ;;  %v1639_v25 = vpop.f32.mrf.mxu3 }
 0x33d   : > { %v1640_v34 = vadd.f32 %v4061_v2, %v1639_v25  ;;  %v4532_v25 = vld [vmem:[#allocation25_spill] sm:$0xff] }
 0x33e   : > { %v1996_v22 = vsel %vm1932_vm3, %v1866_v10, %v1964_v27 }
 0x33f   : > { %v2028_v24 = vadd.f32 %v1996_v22, %v3967_v17  ;;  %vm1679_vm5 = vcmp.gt.f32.partialorder %v1640_v34, 0.0  ;;  %v1711_v3 = vmul.f32 0.01, %v1640_v34 }
 0x341   : > { %v2060_v41 = vmax.f32 %v2028_v24, 0.0  ;;  %v1868_v46 = vpop.f32.mrf.mxu0  ;;  %v1743_v23 = vsel %vm1679_vm5, %v1640_v34, %v1711_v3 }
 0x342   : > { %v1869_v38 = vadd.f32 %v4211_v8, %v1868_v46  ;;  %v1761_v18 = vpack.c.bf16 %v1743_v23, %v1742_v31  ;;  %v4533_v46 = vld [vmem:[#allocation26_spill] sm:$0xff] }
 0x343   : > { %v2092_v16 = vadd.f32 %v2060_v41, %v4529_v62 }
 0x344   : > { %v1965_v7 = vmul.f32 0.01, %v1869_v38  ;;  %v1642_v52 = vpop.f32.mrf.mxu3  ;;  %1907 = vmatmul.bf16.gmra.mxu0 %v1761_v18  ;;  %vm1933_vm6 = vcmp.gt.f32.partialorder %v1869_v38, 0.0 }
 0x345   : > { %v2119_v50 = vpack.c.bf16 %v2092_v16, %v2091_v56  ;;  %v1643_v28 = vadd.f32 %v4061_v2, %v1642_v52  ;;  %v3140_v16 = vld [vmem:[%s4464_s11] sm:$0xff] }
 0x346   : > { %v1997_v17 = vsel %vm1933_vm6, %v1869_v38, %v1965_v7  ;;  %2411 = vmatpush.bf16.msrb.mxu2 %v3140_v16 }
 0x347   : > { %2227 = vmatmul.bf16.gmra.mxu1 %v2119_v50  ;;  %v2029_v55 = vadd.f32 %v1997_v17, %v3988_v1  ;;  %v1712_v29 = vmul.f32 0.01, %v1643_v28  ;;  %vm1680_vm8 = vcmp.gt.f32.partialorder %v1643_v28, 0.0  ;;  %v4534_v50 = vld [vmem:[#allocation13_spill] sm:$0xff]  ;;  %v4535_v17 = vld [vmem:[#allocation14_spill] sm:$0xff] }
 0x349   : > { %v1870_v19 = vpop.f32.mrf.mxu0  ;;  %v2061_v9 = vmax.f32 %v2029_v55, 0.0  ;;  %v1744_v35 = vsel %vm1680_vm8, %v1643_v28, %v1712_v29 }
 0x34a   : > { %v1871_v6 = vadd.f32 %v4211_v8, %v1870_v19 }
 0x34b   : > { %v2093_v51 = vadd.f32 %v2061_v9, %v4530_v0 }
 0x34c   : > { %vm1934_vm7 = vcmp.gt.f32.partialorder %v1871_v6, 0.0  ;;  %v1966_v12 = vmul.f32 0.01, %v1871_v6  ;;  %v1644_v47 = vpop.f32.mrf.mxu3 }
 0x34d   : > { %v1645_v11 = vadd.f32 %v4061_v2, %v1644_v47  ;;  %v4536_v47 = vld [vmem:[#allocation27_spill] sm:$0xff] }
 0x34e   : > { %v1998_v58 = vsel %vm1934_vm7, %v1871_v6, %v1966_v12 }
 0x34f   : > { %v2030_v20 = vadd.f32 %v1998_v58, %v3991_v60  ;;  %vm1681_vm9 = vcmp.gt.f32.partialorder %v1645_v11, 0.0  ;;  %v1713_v32 = vmul.f32 0.01, %v1645_v11 }
 0x351   : > { %v2062_v45 = vmax.f32 %v2030_v20, 0.0  ;;  %v1873_v44 = vpop.f32.mrf.mxu0  ;;  %v1745_v36 = vsel %vm1681_vm9, %v1645_v11, %v1713_v32  ;;  %v4537_v20 = vld [vmem:[#allocation28_spill] sm:$0xff] }
 0x352   : > { %v1874_v1 = vadd.f32 %v4211_v8, %v1873_v44  ;;  %v1762_v26 = vpack.c.bf16 %v1745_v36, %v1744_v35  ;;  %v4538_v36 = vld [vmem:[#allocation15_spill] sm:$0xff] }
 0x353   : > { %v2094_v57 = vadd.f32 %v2062_v45, %v4531_v15 }
 0x354   : > { %v1967_v39 = vmul.f32 0.01, %v1874_v1  ;;  %v1647_v14 = vpop.f32.mrf.mxu3  ;;  %1912 = vmatmul.bf16.gmra.mxu0 %v1762_v26  ;;  %vm1935_vm10 = vcmp.gt.f32.partialorder %v1874_v1, 0.0  ;;  %v4539_v26 = vld [vmem:[#allocation16_spill] sm:$0xff] }
 0x355   : > { %v2120_v59 = vpack.c.bf16 %v2094_v57, %v2093_v51  ;;  %v1648_v10 = vadd.f32 %v4061_v2, %v1647_v14 }
 0x356   : > { %v1999_v60 = vsel %vm1935_vm10, %v1874_v1, %v1967_v39 }
 0x357   : > { %2232 = vmatmul.bf16.gmra.mxu1 %v2120_v59  ;;  %v2031_v54 = vadd.f32 %v1999_v60, %v4532_v25  ;;  %v1714_v43 = vmul.f32 0.01, %v1648_v10  ;;  %vm1682_vm12 = vcmp.gt.f32.partialorder %v1648_v10, 0.0  ;;  %v4540_v59 = vld [vmem:[#allocation29_spill] sm:$0xff]  ;;  %v4541_v25 = vld [vmem:[#allocation30_spill] sm:$0xff] }
 0x359   : > { %v1875_v42 = vpop.f32.mrf.mxu0  ;;  %v2063_v41 = vmax.f32 %v2031_v54, 0.0  ;;  %v1746_v56 = vsel %vm1682_vm12, %v1648_v10, %v1714_v43 }
 0x35a   : > { %v1876_v27 = vadd.f32 %v4211_v8, %v1875_v42 }
 0x35c   : > { %vm1936_vm11 = vcmp.gt.f32.partialorder %v1876_v27, 0.0  ;;  %v1968_v34 = vmul.f32 0.01, %v1876_v27  ;;  %v1649_v22 = vpop.f32.mrf.mxu3 }
 0x35d   : > { %v1650_v24 = vadd.f32 %v4061_v2, %v1649_v22  ;;  %v2095_v2 = vadd.f32 %v2063_v41, %v4534_v50  ;;  %v4543_v41 = vld [vmem:[#allocation18_spill] sm:$0xff] }
 0x35e   : > { %v2000_v3 = vsel %vm1936_vm11, %v1876_v27, %v1968_v34 }
 0x35f   : > { %v2032_v31 = vadd.f32 %v2000_v3, %v4533_v46  ;;  %vm1683_vm13 = vcmp.gt.f32.partialorder %v1650_v24, 0.0  ;;  %v1715_v23 = vmul.f32 0.01, %v1650_v24 }
 0x361   : > { %v2064_v38 = vmax.f32 %v2032_v31, 0.0  ;;  %v1878_v18 = vpop.f32.mrf.mxu0  ;;  %v1747_v62 = vsel %vm1683_vm13, %v1650_v24, %v1715_v23  ;;  %v4542_v24 = vld [vmem:[#allocation17_spill] sm:$0xff] }
 0x362   : > { %v1879_v7 = vadd.f32 %v4211_v8, %v1878_v18  ;;  %v1763_v52 = vpack.c.bf16 %v1747_v62, %v1746_v56  ;;  %v4300_v18 = vld [vmem:[%s4463_s10] ss:$0 sm:$0xff] }
 0x363   : > { %v2096_v28 = vadd.f32 %v2064_v38, %v4535_v17 }
 0x364   : > { %v1969_v19 = vmul.f32 0.01, %v1879_v7  ;;  %1917 = vmatmul.bf16.gmra.mxu0 %v1763_v52  ;;  %vm1937_vm14 = vcmp.gt.f32.partialorder %v1879_v7, 0.0 }
 0x365   : > { %v2121_v4 = vpack.c.bf16 %v2096_v28, %v2095_v2 }
 0x366   : > { %v2001_v6 = vsel %vm1937_vm14, %v1879_v7, %v1969_v19  ;;  %v4544_v7 = vld [vmem:[#allocation31_spill] sm:$0xff] }
 0x367   : > { %2237 = vmatmul.bf16.gmra.mxu1 %v2121_v4  ;;  %v2033_v29 = vadd.f32 %v2001_v6, %v4536_v47 }
 0x369   : > { %v1880_v55 = vpop.f32.mrf.mxu0  ;;  %v2065_v9 = vmax.f32 %v2033_v29, 0.0 }
 0x36a   : > { %v1881_v12 = vadd.f32 %v4211_v8, %v1880_v55  ;;  %v4545_v55 = vld [vmem:[#allocation32_spill] sm:$0xff] }
 0x36b   : > { %v2097_v1 = vadd.f32 %v2065_v9, %v4538_v36 }
 0x36c   : > { %vm1938_vm15 = vcmp.gt.f32.partialorder %v1881_v12, 0.0  ;;  %v1970_v11 = vmul.f32 0.01, %v1881_v12 }
 0x36e   : > { %v2002_v58 = vsel %vm1938_vm15, %v1881_v12, %v1970_v11 }
 0x36f   : > { %v2034_v32 = vadd.f32 %v2002_v58, %v4537_v20  ;;  %v4546_v20 = vld [vmem:[#allocation19_spill] sm:$0xff] }
 0x371   : > { %v2066_v45 = vmax.f32 %v2034_v32, 0.0  ;;  %v1883_v44 = vpop.f32.mrf.mxu0 }
 0x372   : > { %v1884_v35 = vadd.f32 %v4211_v8, %v1883_v44 }
 0x373   : > { %v2098_v0 = vadd.f32 %v2066_v45, %v4539_v26  ;;  %v4547_v45 = vld [vmem:[#allocation20_spill] sm:$0xff] }
 0x374   : > { %v1971_v51 = vmul.f32 0.01, %v1884_v35  ;;  %vm1939_vm0 = vcmp.gt.f32.partialorder %v1884_v35, 0.0 }
 0x375   : > { %v2122_v15 = vpack.c.bf16 %v2098_v0, %v2097_v1 }
 0x376   : > { %v2003_v57 = vsel %vm1939_vm0, %v1884_v35, %v1971_v51 }
 0x377   : > { %2242 = vmatmul.bf16.gmra.mxu1 %v2122_v15  ;;  %v2035_v60 = vadd.f32 %v2003_v57, %v4540_v59 }
 0x379   : > { %v1885_v39 = vpop.f32.mrf.mxu0  ;;  %v2067_v27 = vmax.f32 %v2035_v60, 0.0 }
 0x37a   : > { %v1886_v14 = vadd.f32 %v4211_v8, %v1885_v39 }
 0x37b   : > { %v2099_v3 = vadd.f32 %v2067_v27, %v4542_v24 }
 0x37c   : > { %vm1940_vm1 = vcmp.gt.f32.partialorder %v1886_v14, 0.0  ;;  %v1972_v10 = vmul.f32 0.01, %v1886_v14 }
 0x37e   : > { %v2004_v42 = vsel %vm1940_vm1, %v1886_v14, %v1972_v10 }
 0x37f   : > { %v2036_v54 = vadd.f32 %v2004_v42, %v4541_v25 }
 0x381   : > { %v2068_v34 = vmax.f32 %v2036_v54, 0.0  ;;  %v1888_v22 = vpop.f32.mrf.mxu0 }
 0x382   : > { %v1889_v43 = vadd.f32 %v4211_v8, %v1888_v22 }
 0x383   : > { %v2100_v46 = vadd.f32 %v2068_v34, %v4543_v41 }
 0x384   : > { %v1973_v31 = vmul.f32 0.01, %v1889_v43  ;;  %v2208_v23 = vpop.f32.mrf.mxu1  ;;  %vm1941_vm2 = vcmp.gt.f32.partialorder %v1889_v43, 0.0 }
 0x385   : > { %v2123_v38 = vpack.c.bf16 %v2100_v46, %v2099_v3  ;;  %v2209_v50 = vadd.f32 %v4300_v18, %v2208_v23  ;;  %v4549_v3 = vld [vmem:[#allocation22_spill] sm:$0xff] }
 0x386   : > { %v2005_v56 = vsel %vm1941_vm2, %v1889_v43, %v1973_v31 }
 0x387   : > { %2247 = vmatmul.bf16.gmra.mxu1 %v2123_v38  ;;  %v2037_v52 = vadd.f32 %v2005_v56, %v4544_v7  ;;  %v2288_v6 = vmax.f32 %v2209_v50, 0.0 }
 0x389   : > { %v1890_v62 = vpop.f32.mrf.mxu0  ;;  %v2069_v4 = vmax.f32 %v2037_v52, 0.0 }
 0x38a   : > { %v1891_v16 = vadd.f32 %v4211_v8, %v1890_v62 }
 0x38b   : > { %v2101_v32 = vadd.f32 %v2069_v4, %v4546_v20 }
 0x38c   : > { %vm1942_vm3 = vcmp.gt.f32.partialorder %v1891_v16, 0.0  ;;  %v1974_v2 = vmul.f32 0.01, %v1891_v16  ;;  %v2210_v17 = vpop.f32.mrf.mxu1 }
 0x38d   : > { %v2211_v28 = vadd.f32 %v4300_v18, %v2210_v17 }
 0x38e   : > { %v2006_v19 = vsel %vm1942_vm3, %v1891_v16, %v1974_v2 }
 0x38f   : > { %v2038_v12 = vadd.f32 %v2006_v19, %v4545_v55  ;;  %v2289_v47 = vmax.f32 %v2211_v28, 0.0 }
 0x391   : > { %v2070_v29 = vmax.f32 %v2038_v12, 0.0  ;;  %v2320_v11 = vpack.c.bf16 %v2289_v47, %v2288_v6  ;;  %v1893_v58 = vpop.f32.mrf.mxu0 }
 0x392   : > { %v1894_v9 = vadd.f32 %v4211_v8, %v1893_v58 }
 0x393   : > { %2412 = vmatmul.bf16.vlgmr.msrb.gmra.mxu2 %v2320_v11  ;;  %v2102_v44 = vadd.f32 %v2070_v29, %v4547_v45  ;;  %v4551_v11 = vld [vmem:[#allocation24_spill] sm:$0xff] }
 0x394   : > { %v1975_v35 = vmul.f32 0.01, %v1894_v9  ;;  %v2213_v36 = vpop.f32.mrf.mxu1  ;;  %vm1943_vm4 = vcmp.gt.f32.partialorder %v1894_v9, 0.0 }
 0x395   : > { %v2124_v1 = vpack.c.bf16 %v2102_v44, %v2101_v32  ;;  %v2214_v57 = vadd.f32 %v4300_v18, %v2213_v36 }
 0x396   : > { %v2007_v26 = vsel %vm1943_vm4, %v1894_v9, %v1975_v35 }
 0x397   : > { %2252 = vmatmul.bf16.gmra.mxu1 %v2124_v1  ;;  %v2039_v15 = vadd.f32 %v2007_v26, %v4089_v37  ;;  %v2290_v42 = vmax.f32 %v2214_v57, 0.0  ;;  %v4548_v37 = vld [vmem:[#allocation21_spill] sm:$0xff] }
 0x399   : > { %v1895_v0 = vpop.f32.mrf.mxu0  ;;  %v2071_v10 = vmax.f32 %v2039_v15, 0.0 }
 0x39a   : > { %v1896_v51 = vadd.f32 %v4211_v8, %v1895_v0 }
 0x39b   : > { %v2103_v24 = vadd.f32 %v2071_v10, %v4548_v37 }
 0x39c   : > { %vm1944_vm5 = vcmp.gt.f32.partialorder %v1896_v51, 0.0  ;;  %v1976_v39 = vmul.f32 0.01, %v1896_v51  ;;  %v2215_v14 = vpop.f32.mrf.mxu1 }
 0x39d   : > { %v2216_v59 = vadd.f32 %v4300_v18, %v2215_v14 }
 0x39e   : > { %v2008_v60 = vsel %vm1944_vm5, %v1896_v51, %v1976_v39 }
 0x39f   : > { %v2040_v27 = vadd.f32 %v2008_v60, %v4092_v13  ;;  %v2291_v25 = vmax.f32 %v2216_v59, 0.0 }
 0x3a1   : > { %v2072_v54 = vmax.f32 %v2040_v27, 0.0  ;;  %v1898_v34 = vpop.f32.mrf.mxu0  ;;  %v2321_v22 = vpack.c.bf16 %v2291_v25, %v2290_v42  ;;  %v4553_v25 = vld [vmem:[#allocation3_spill] sm:$0xff] }
 0x3a2   : > { %v1899_v43 = vadd.f32 %v4211_v8, %v1898_v34 }
 0x3a3   : > { %2417 = vmatmul.bf16.gmra.mxu2 %v2321_v22  ;;  %v2104_v41 = vadd.f32 %v2072_v54, %v4549_v3 }
 0x3a4   : > { %v1977_v46 = vmul.f32 0.01, %v1899_v43  ;;  %v2218_v31 = vpop.f32.mrf.mxu1  ;;  %vm1945_vm6 = vcmp.gt.f32.partialorder %v1899_v43, 0.0 }
 0x3a5   : > { %v2125_v23 = vpack.c.bf16 %v2104_v41, %v2103_v24  ;;  %v2219_v16 = vadd.f32 %v4300_v18, %v2218_v31 }
 0x3a6   : > { %v2009_v38 = vsel %vm1945_vm6, %v1899_v43, %v1977_v46 }
 0x3a7   : > { %2257 = vmatmul.bf16.gmra.mxu1 %v2125_v23  ;;  %v2041_v62 = vadd.f32 %v2009_v38, %v4111_v61  ;;  %v2292_v28 = vmax.f32 %v2219_v16, 0.0  ;;  %v4550_v61 = vld [vmem:[#allocation23_spill] sm:$0xff] }
 0x3a9   : > { %v1900_v56 = vpop.f32.mrf.mxu0  ;;  %v2073_v17 = vmax.f32 %v2041_v62, 0.0 }
 0x3aa   : > { %v1901_v13 = vadd.f32 %v4211_v8, %v1900_v56 }
 0x3ab   : > { %v2105_v29 = vadd.f32 %v2073_v17, %v4550_v61 }
 0x3ac   : > { %vm1946_vm7 = vcmp.gt.f32.partialorder %v1901_v13, 0.0  ;;  %v1978_v7 = vmul.f32 0.01, %v1901_v13  ;;  %v2220_v52 = vpop.f32.mrf.mxu1 }
 0x3ad   : > { %v2221_v50 = vadd.f32 %v4300_v18, %v2220_v52 }
 0x3ae   : > { %v2010_v2 = vsel %vm1946_vm7, %v1901_v13, %v1978_v7 }
 0x3af   : > { %v2042_v19 = vadd.f32 %v2010_v2, %v4114_v49  ;;  %v2293_v4 = vmax.f32 %v2221_v50, 0.0 }
 0x3b1   : > { %v2074_v6 = vmax.f32 %v2042_v19, 0.0  ;;  %v1903_v55 = vpop.f32.mrf.mxu0  ;;  %v2322_v12 = vpack.c.bf16 %v2293_v4, %v2292_v28  ;;  %v4555_v28 = vld [vmem:[#allocation5_spill] sm:$0xff] }
 0x3b2   : > { %v1904_v47 = vadd.f32 %v4211_v8, %v1903_v55 }
 0x3b3   : > { %2422 = vmatmul.bf16.gmra.mxu2 %v2322_v12  ;;  %v2106_v58 = vadd.f32 %v2074_v6, %v4551_v11 }
 0x3b4   : > { %v1979_v9 = vmul.f32 0.01, %v1904_v47  ;;  %v2223_v20 = vpop.f32.mrf.mxu1  ;;  %vm1947_vm8 = vcmp.gt.f32.partialorder %v1904_v47, 0.0 }
 0x3b5   : > { %v2126_v32 = vpack.c.bf16 %v2106_v58, %v2105_v29  ;;  %v2224_v36 = vadd.f32 %v4300_v18, %v2223_v20 }
 0x3b6   : > { %v2011_v45 = vsel %vm1947_vm8, %v1904_v47, %v1979_v9 }
 0x3b7   : > { %2262 = vmatmul.bf16.gmra.mxu1 %v2126_v32  ;;  %v2043_v35 = vadd.f32 %v2011_v45, %v4132_v30  ;;  %v2294_v57 = vmax.f32 %v2224_v36, 0.0  ;;  %v4552_v30 = vld [vmem:[#allocation2_spill] sm:$0xff] }
 0x3b9   : > { %v1905_v44 = vpop.f32.mrf.mxu0  ;;  %v2075_v15 = vmax.f32 %v2043_v35, 0.0 }
 0x3ba   : > { %v1906_v49 = vadd.f32 %v4211_v8, %v1905_v44 }
 0x3bb   : > { %v2107_v27 = vadd.f32 %v2075_v15, %v4552_v30 }
 0x3bc   : > { %vm1948_vm9 = vcmp.gt.f32.partialorder %v1906_v49, 0.0  ;;  %v1980_v1 = vmul.f32 0.01, %v1906_v49  ;;  %v2225_v26 = vpop.f32.mrf.mxu1 }
 0x3bd   : > { %v2226_v0 = vadd.f32 %v4300_v18, %v2225_v26 }
 0x3be   : > { %v2012_v51 = vsel %vm1948_vm9, %v1906_v49, %v1980_v1 }
 0x3bf   : > { %v2044_v39 = vadd.f32 %v2012_v51, %v4128_v21  ;;  %v2295_v14 = vmax.f32 %v2226_v0, 0.0  ;;  %v4557_v51 = vld [vmem:[#allocation7_spill] sm:$0xff] }
 0x3c1   : > { %v2076_v59 = vmax.f32 %v2044_v39, 0.0  ;;  %v1908_v60 = vpop.f32.mrf.mxu0  ;;  %v2323_v10 = vpack.c.bf16 %v2295_v14, %v2294_v57 }
 0x3c2   : > { %v1909_v42 = vadd.f32 %v4211_v8, %v1908_v60 }
 0x3c3   : > { %2427 = vmatmul.bf16.gmra.mxu2 %v2323_v10  ;;  %v2108_v54 = vadd.f32 %v2076_v59, %v4553_v25 }
 0x3c4   : > { %v1981_v34 = vmul.f32 0.01, %v1909_v42  ;;  %v2228_v22 = vpop.f32.mrf.mxu1  ;;  %vm1949_vm10 = vcmp.gt.f32.partialorder %v1909_v42, 0.0 }
 0x3c5   : > { %v2127_v43 = vpack.c.bf16 %v2108_v54, %v2107_v27  ;;  %v2229_v41 = vadd.f32 %v4300_v18, %v2228_v22 }
 0x3c6   : > { %v2013_v37 = vsel %vm1949_vm10, %v1909_v42, %v1981_v34 }
 0x3c7   : > { %2267 = vmatmul.bf16.gmra.mxu1 %v2127_v43  ;;  %v2045_v3 = vadd.f32 %v2013_v37, %v4153_v63  ;;  %v2296_v13 = vmax.f32 %v2229_v41, 0.0  ;;  %v4554_v63 = vld [vmem:[#allocation4_spill] sm:$0xff]  ;;  %v4559_v41 = vld [vmem:[#allocation9_spill] sm:$0xff] }
 0x3c9   : > { %v1910_v24 = vpop.f32.mrf.mxu0  ;;  %v2077_v56 = vmax.f32 %v2045_v3, 0.0  ;;  %v4558_v3 = vld [vmem:[#allocation8_spill] sm:$0xff] }
 0x3ca   : > { %v1911_v21 = vadd.f32 %v4211_v8, %v1910_v24 }
 0x3cb   : > { %v2109_v17 = vadd.f32 %v2077_v56, %v4554_v63 }
 0x3cc   : > { %vm1950_vm11 = vcmp.gt.f32.partialorder %v1911_v21, 0.0  ;;  %v1982_v46 = vmul.f32 0.01, %v1911_v21  ;;  %v2230_v31 = vpop.f32.mrf.mxu1 }
 0x3cd   : > { %v2231_v23 = vadd.f32 %v4300_v18, %v2230_v31 }
 0x3ce   : > { %v2014_v38 = vsel %vm1950_vm11, %v1911_v21, %v1982_v46 }
 0x3cf   : > { %v2046_v62 = vadd.f32 %v2014_v38, %v4149_v40  ;;  %v2297_v16 = vmax.f32 %v2231_v23, 0.0 }
 0x3d1   : > { %v2078_v7 = vmax.f32 %v2046_v62, 0.0  ;;  %v2324_v52 = vpack.c.bf16 %v2297_v16, %v2296_v13  ;;  %v1913_v50 = vpop.f32.mrf.mxu0 }
 0x3d2   : > { %v1914_v2 = vadd.f32 %v4211_v8, %v1913_v50 }
 0x3d3   : > { %2432 = vmatmul.bf16.gmra.mxu2 %v2324_v52  ;;  %v2110_v19 = vadd.f32 %v2078_v7, %v4555_v28  ;;  %v4364_v28 = vld [vmem:[%s4465_s12] ss:$0 sm:$0xff] }
 0x3d4   : > { %v1983_v4 = vmul.f32 0.01, %v1914_v2  ;;  %v2233_v6 = vpop.f32.mrf.mxu1  ;;  %vm1951_vm12 = vcmp.gt.f32.partialorder %v1914_v2, 0.0 }
 0x3d5   : > { %v2128_v55 = vpack.c.bf16 %v2110_v19, %v2109_v17  ;;  %v2234_v29 = vadd.f32 %v4300_v18, %v2233_v6 }
 0x3d6   : > { %v2015_v12 = vsel %vm1951_vm12, %v1914_v2, %v1983_v4 }
 0x3d7   : > { %2272 = vmatmul.bf16.gmra.mxu1 %v2128_v55  ;;  %v2047_v61 = vadd.f32 %v2015_v12, %v4177_v48  ;;  %v2298_v45 = vmax.f32 %v2234_v29, 0.0  ;;  %v4556_v48 = vld [vmem:[#allocation6_spill] sm:$0xff] }
 0x3d9   : > { %v1915_v47 = vpop.f32.mrf.mxu0  ;;  %v2079_v32 = vmax.f32 %v2047_v61, 0.0 }
 0x3da   : > { %v1916_v40 = vadd.f32 %v4211_v8, %v1915_v47 }
 0x3db   : > { %v2111_v0 = vadd.f32 %v2079_v32, %v4556_v48 }
 0x3dc   : > { %vm1952_vm13 = vcmp.gt.f32.partialorder %v1916_v40, 0.0  ;;  %v1984_v11 = vmul.f32 0.01, %v1916_v40  ;;  %v2235_v58 = vpop.f32.mrf.mxu1 }
 0x3dd   : > { %v2236_v9 = vadd.f32 %v4300_v18, %v2235_v58 }
 0x3de   : > { %v2016_v20 = vsel %vm1952_vm13, %v1916_v40, %v1984_v11 }
 0x3df   : > { %v2048_v44 = vadd.f32 %v2016_v20, %v4173_v33  ;;  %v2299_v49 = vmax.f32 %v2236_v9, 0.0 }
 0x3e1   : > { %v2080_v35 = vmax.f32 %v2048_v44, 0.0  ;;  %v2325_v36 = vpack.c.bf16 %v2299_v49, %v2298_v45  ;;  %v1918_v1 = vpop.f32.mrf.mxu0 }
 0x3e2   : > { %v1919_v26 = vadd.f32 %v4211_v8, %v1918_v1 }
 0x3e3   : > { %2437 = vmatmul.bf16.gmra.mxu2 %v2325_v36  ;;  %v2112_v15 = vadd.f32 %v2080_v35, %v4557_v51 }
 0x3e4   : > { %v1985_v57 = vmul.f32 0.01, %v1919_v26  ;;  %v2238_v39 = vpop.f32.mrf.mxu1  ;;  %vm1953_vm14 = vcmp.gt.f32.partialorder %v1919_v26, 0.0 }
 0x3e5   : > { %v2129_v14 = vpack.c.bf16 %v2112_v15, %v2111_v0  ;;  %v2239_v42 = vadd.f32 %v4300_v18, %v2238_v39 }
 0x3e6   : > { %v2017_v59 = vsel %vm1953_vm14, %v1919_v26, %v1985_v57 }
 0x3e7   : > { %2277 = vmatmul.bf16.gmra.mxu1 %v2129_v14  ;;  %v2049_v10 = vadd.f32 %v2017_v59, %v4194_v5  ;;  %v2300_v22 = vmax.f32 %v2239_v42, 0.0 }
 0x3e9   : > { %v1920_v60 = vpop.f32.mrf.mxu0  ;;  %v2081_v34 = vmax.f32 %v2049_v10, 0.0 }
 0x3ea   : > { %v1921_v33 = vadd.f32 %v4211_v8, %v1920_v60 }
 0x3eb   : > { %v2113_v8 = vadd.f32 %v2081_v34, %v4558_v3 }
 0x3ec   : > { %vm1954_vm15 = vcmp.gt.f32.partialorder %v1921_v33, 0.0  ;;  %v1986_v30 = vmul.f32 0.01, %v1921_v33  ;;  %v2240_v27 = vpop.f32.mrf.mxu1 }
 0x3ed   : > { %v2241_v25 = vadd.f32 %v4300_v18, %v2240_v27 }
 0x3ee   : > { %v2018_v54 = vsel %vm1954_vm15, %v1921_v33, %v1986_v30 }
 0x3ef   : > { %v2050_v43 = vadd.f32 %v2018_v54, %v4190_v53  ;;  %v2301_v37 = vmax.f32 %v2241_v25, 0.0 }
 0x3f1   : > { %v2082_v24 = vmax.f32 %v2050_v43, 0.0  ;;  %v2326_v21 = vpack.c.bf16 %v2301_v37, %v2300_v22 }
 0x3f3   : > { %2442 = vmatmul.bf16.gmra.mxu2 %v2326_v21  ;;  %v2114_v5 = vadd.f32 %v2082_v24, %v4559_v41 }
 0x3f4   : > { %v2243_v46 = vpop.f32.mrf.mxu1 }
 0x3f5   : > { %v2130_v31 = vpack.c.bf16 %v2114_v5, %v2113_v8  ;;  %v2244_v23 = vadd.f32 %v4300_v18, %v2243_v46 }
 0x3f7   : > { %2282 = vmatmul.bf16.gmra.mxu1 %v2130_v31  ;;  %v2302_v13 = vmax.f32 %v2244_v23, 0.0 }
 0x3fc   : > { %v2245_v38 = vpop.f32.mrf.mxu1 }
 0x3fd   : > { %v2246_v56 = vadd.f32 %v4300_v18, %v2245_v38 }
 0x3ff   : > { %v2303_v62 = vmax.f32 %v2246_v56, 0.0 }
 0x401   : > { %v2327_v16 = vpack.c.bf16 %v2303_v62, %v2302_v13 }
 0x403   : > { %2447 = vmatmul.bf16.gmra.mxu2 %v2327_v16 }
 0x404   : > { %v2248_v53 = vpop.f32.mrf.mxu1 }
 0x405   : > { %v2249_v7 = vadd.f32 %v4300_v18, %v2248_v53 }
 0x407   : > { %v2304_v2 = vmax.f32 %v2249_v7, 0.0 }
 0x40c   : > { %v2250_v52 = vpop.f32.mrf.mxu1 }
 0x40d   : > { %v2251_v50 = vadd.f32 %v4300_v18, %v2250_v52 }
 0x40f   : > { %v2305_v63 = vmax.f32 %v2251_v50, 0.0 }
 0x411   : > { %v2328_v17 = vpack.c.bf16 %v2305_v63, %v2304_v2 }
 0x413   : > { %2452 = vmatmul.bf16.gmra.mxu2 %v2328_v17 }
 0x414   : > { %v2253_v19 = vpop.f32.mrf.mxu1 }
 0x415   : > { %v2254_v12 = vadd.f32 %v4300_v18, %v2253_v19 }
 0x416   : > { %v2413_v4 = vpop.f32.mrf.mxu2 }
 0x417   : > { %v2414_v6 = vadd.f32 %v4364_v28, %v2413_v4  ;;  %v2306_v11 = vmax.f32 %v2254_v12, 0.0 }
 0x419   : > { %v2493_v55 = vsub.f32 0.0, %v2414_v6 }
 0x41b   : > { %v2525_v47 = vmul.f32 1.442695, %v2493_v55 }
 0x41c   : > { %v2255_v40 = vpop.f32.mrf.mxu1 }
 0x41d   : > { %3191 = vpow2.f32 %v2525_v47  ;;  %v2256_v61 = vadd.f32 %v4300_v18, %v2255_v40 }
 0x41e   : > { %v2415_v29 = vpop.f32.mrf.mxu2 }
 0x41f   : > { %v2307_v58 = vmax.f32 %v2256_v61, 0.0  ;;  %v2416_v9 = vadd.f32 %v4364_v28, %v2415_v29 }
 0x421   : > { %v2329_v20 = vpack.c.bf16 %v2307_v58, %v2306_v11  ;;  %v2494_v32 = vsub.f32 0.0, %v2416_v9 }
 0x423   : > { %v3192_v45 = vpop.eup %3191  ;;  %v2527_v44 = vmul.f32 1.442695, %v2494_v32  ;;  %2457 = vmatmul.bf16.gmra.mxu2 %v2329_v20 }
 0x424   : > { %v2589_v49 = vadd.f32 1.0, %v3192_v45  ;;  %v2258_v35 = vpop.f32.mrf.mxu1 }
 0x425   : > { %3193 = vpow2.f32 %v2527_v44  ;;  %v2259_v0 = vadd.f32 %v4300_v18, %v2258_v35 }
 0x426   : > { %3195 = vrcp.f32 %v2589_v49  ;;  %v2418_v36 = vpop.f32.mrf.mxu2 }
 0x427   : > { %v2419_v1 = vadd.f32 %v4364_v28, %v2418_v36  ;;  %v2308_v60 = vmax.f32 %v2259_v0, 0.0 }
 0x429   : > { %v2495_v26 = vsub.f32 0.0, %v2419_v1 }
 0x42b   : > { %v3194_v48 = vpop.eup %3193  ;;  %v2529_v51 = vmul.f32 1.442695, %v2495_v26 }
 0x42c   : > { %v3196_v15 = vpop.eup %3195  ;;  %v2590_v57 = vadd.f32 1.0, %v3194_v48  ;;  %v2260_v39 = vpop.f32.mrf.mxu1 }
 0x42d   : > { %2653 = vst [vmem:[%s4375_s17] sm:$0xff] %v3196_v15  ;;  %3197 = vpow2.f32 %v2529_v51  ;;  %v2261_v14 = vadd.f32 %v4300_v18, %v2260_v39 }
 0x42e   : > { %3199 = vrcp.f32 %v2590_v57  ;;  %v2420_v59 = vpop.f32.mrf.mxu2 }
 0x42f   : > { %v2309_v33 = vmax.f32 %v2261_v14, 0.0  ;;  %v2421_v10 = vadd.f32 %v4364_v28, %v2420_v59 }
 0x431   : > { %v2330_v42 = vpack.c.bf16 %v2309_v33, %v2308_v60  ;;  %v2496_v30 = vsub.f32 0.0, %v2421_v10 }
 0x433   : > { %v3198_v27 = vpop.eup %3197  ;;  %v2531_v25 = vmul.f32 1.442695, %v2496_v30  ;;  %2462 = vmatmul.bf16.gmra.mxu2 %v2330_v42 }
 0x434   : > { %v3200_v54 = vpop.eup %3199  ;;  %v2591_v34 = vadd.f32 1.0, %v3198_v27  ;;  %v2263_v22 = vpop.f32.mrf.mxu1 }
 0x435   : > { %2654 = vst [vmem:[%s4375_s17 + $0x8] sm:$0xff] %v3200_v54  ;;  %3201 = vpow2.f32 %v2531_v25  ;;  %v2264_v3 = vadd.f32 %v4300_v18, %v2263_v22 }
 0x436   : > { %3203 = vrcp.f32 %v2591_v34  ;;  %v2423_v43 = vpop.f32.mrf.mxu2 }
 0x437   : > { %v2424_v37 = vadd.f32 %v4364_v28, %v2423_v43  ;;  %v2310_v38 = vmax.f32 %v2264_v3, 0.0 }
 0x439   : > { %v2497_v24 = vsub.f32 0.0, %v2424_v37 }
 0x43b   : > { %v3202_v21 = vpop.eup %3201  ;;  %v2533_v8 = vmul.f32 1.442695, %v2497_v24 }
 0x43c   : > { %v3204_v41 = vpop.eup %3203  ;;  %v2592_v5 = vadd.f32 1.0, %v3202_v21  ;;  %v2265_v46 = vpop.f32.mrf.mxu1 }
 0x43d   : > { %2655 = vst [vmem:[%s4375_s17 + $0x10] sm:$0xff] %v3204_v41  ;;  %3205 = vpow2.f32 %v2533_v8  ;;  %v2266_v31 = vadd.f32 %v4300_v18, %v2265_v46 }
 0x43e   : > { %3207 = vrcp.f32 %v2592_v5  ;;  %v2425_v23 = vpop.f32.mrf.mxu2 }
 0x43f   : > { %v2311_v56 = vmax.f32 %v2266_v31, 0.0  ;;  %v2426_v13 = vadd.f32 %v4364_v28, %v2425_v23 }
 0x441   : > { %v2331_v62 = vpack.c.bf16 %v2311_v56, %v2310_v38  ;;  %v2498_v16 = vsub.f32 0.0, %v2426_v13 }
 0x443   : > { %v3206_v53 = vpop.eup %3205  ;;  %v2535_v7 = vmul.f32 1.442695, %v2498_v16  ;;  %2467 = vmatmul.bf16.gmra.mxu2 %v2331_v62 }
 0x444   : > { %v3208_v52 = vpop.eup %3207  ;;  %v2593_v50 = vadd.f32 1.0, %v3206_v53  ;;  %v2268_v2 = vpop.f32.mrf.mxu1 }
 0x445   : > { %2656 = vst [vmem:[%s4375_s17 + $0x18] sm:$0xff] %v3208_v52  ;;  %3209 = vpow2.f32 %v2535_v7  ;;  %v2269_v6 = vadd.f32 %v4300_v18, %v2268_v2 }
 0x446   : > { %3211 = vrcp.f32 %v2593_v50  ;;  %v2428_v63 = vpop.f32.mrf.mxu2 }
 0x447   : > { %v2429_v17 = vadd.f32 %v4364_v28, %v2428_v63  ;;  %v2312_v11 = vmax.f32 %v2269_v6, 0.0 }
 0x449   : > { %v2499_v19 = vsub.f32 0.0, %v2429_v17 }
 0x44b   : > { %v3210_v4 = vpop.eup %3209  ;;  %v2537_v55 = vmul.f32 1.442695, %v2499_v19 }
 0x44c   : > { %v3212_v12 = vpop.eup %3211  ;;  %v2594_v47 = vadd.f32 1.0, %v3210_v4  ;;  %v2270_v40 = vpop.f32.mrf.mxu1 }
 0x44d   : > { %2657 = vst [vmem:[%s4375_s17 + $0x20] sm:$0xff] %v3212_v12  ;;  %3213 = vpow2.f32 %v2537_v55  ;;  %v2271_v61 = vadd.f32 %v4300_v18, %v2270_v40 }
 0x44e   : > { %3215 = vrcp.f32 %v2594_v47  ;;  %v2430_v29 = vpop.f32.mrf.mxu2 }
 0x44f   : > { %v2313_v58 = vmax.f32 %v2271_v61, 0.0  ;;  %v2431_v9 = vadd.f32 %v4364_v28, %v2430_v29 }
 0x451   : > { %v2332_v20 = vpack.c.bf16 %v2313_v58, %v2312_v11  ;;  %v2500_v32 = vsub.f32 0.0, %v2431_v9 }
 0x453   : > { %v3214_v45 = vpop.eup %3213  ;;  %v2539_v44 = vmul.f32 1.442695, %v2500_v32  ;;  %2472 = vmatmul.bf16.gmra.mxu2 %v2332_v20 }
 0x454   : > { %v3216_v49 = vpop.eup %3215  ;;  %v2595_v35 = vadd.f32 1.0, %v3214_v45  ;;  %v2273_v36 = vpop.f32.mrf.mxu1 }
 0x455   : > { %2658 = vst [vmem:[%s4375_s17 + $0x28] sm:$0xff] %v3216_v49  ;;  %3217 = vpow2.f32 %v2539_v44  ;;  %v2274_v51 = vadd.f32 %v4300_v18, %v2273_v36 }
 0x456   : > { %3219 = vrcp.f32 %v2595_v35  ;;  %v2433_v1 = vpop.f32.mrf.mxu2 }
 0x457   : > { %v2434_v26 = vadd.f32 %v4364_v28, %v2433_v1  ;;  %v2314_v33 = vmax.f32 %v2274_v51, 0.0 }
 0x459   : > { %v2501_v48 = vsub.f32 0.0, %v2434_v26 }
 0x45b   : > { %v3218_v0 = vpop.eup %3217  ;;  %v2541_v15 = vmul.f32 1.442695, %v2501_v48 }
 0x45c   : > { %v3220_v57 = vpop.eup %3219  ;;  %v2596_v39 = vadd.f32 1.0, %v3218_v0  ;;  %v2275_v14 = vpop.f32.mrf.mxu1 }
 0x45d   : > { %2659 = vst [vmem:[%s4375_s17 + $0x30] sm:$0xff] %v3220_v57  ;;  %3221 = vpow2.f32 %v2541_v15  ;;  %v2276_v59 = vadd.f32 %v4300_v18, %v2275_v14 }
 0x45e   : > { %3223 = vrcp.f32 %v2596_v39  ;;  %v2435_v60 = vpop.f32.mrf.mxu2 }
 0x45f   : > { %v2315_v10 = vmax.f32 %v2276_v59, 0.0  ;;  %v2436_v42 = vadd.f32 %v4364_v28, %v2435_v60 }
 0x461   : > { %v2333_v30 = vpack.c.bf16 %v2315_v10, %v2314_v33  ;;  %v2502_v27 = vsub.f32 0.0, %v2436_v42 }
 0x463   : > { %v3222_v25 = vpop.eup %3221  ;;  %v2543_v54 = vmul.f32 1.442695, %v2502_v27  ;;  %2477 = vmatmul.bf16.gmra.mxu2 %v2333_v30 }
 0x464   : > { %v3224_v34 = vpop.eup %3223  ;;  %v2597_v22 = vadd.f32 1.0, %v3222_v25  ;;  %v2278_v43 = vpop.f32.mrf.mxu1 }
 0x465   : > { %2660 = vst [vmem:[%s4375_s17 + $0x38] sm:$0xff] %v3224_v34  ;;  %3225 = vpow2.f32 %v2543_v54  ;;  %v2279_v8 = vadd.f32 %v4300_v18, %v2278_v43 }
 0x466   : > { %3227 = vrcp.f32 %v2597_v22  ;;  %v2438_v37 = vpop.f32.mrf.mxu2 }
 0x467   : > { %v2439_v24 = vadd.f32 %v4364_v28, %v2438_v37  ;;  %v2316_v56 = vmax.f32 %v2279_v8, 0.0 }
 0x469   : > { %v2503_v21 = vsub.f32 0.0, %v2439_v24 }
 0x46b   : > { %v3226_v3 = vpop.eup %3225  ;;  %v2545_v41 = vmul.f32 1.442695, %v2503_v21 }
 0x46c   : > { %v3228_v5 = vpop.eup %3227  ;;  %v2598_v46 = vadd.f32 1.0, %v3226_v3  ;;  %v2280_v31 = vpop.f32.mrf.mxu1 }
 0x46d   : > { %2661 = vst [vmem:[%s4375_s17 + $0x40] sm:$0xff] %v3228_v5  ;;  %3229 = vpow2.f32 %v2545_v41  ;;  %v2281_v23 = vadd.f32 %v4300_v18, %v2280_v31 }
 0x46e   : > { %3231 = vrcp.f32 %v2598_v46  ;;  %v2440_v38 = vpop.f32.mrf.mxu2 }
 0x46f   : > { %v2317_v13 = vmax.f32 %v2281_v23, 0.0  ;;  %v2441_v62 = vadd.f32 %v4364_v28, %v2440_v38 }
 0x471   : > { %v2334_v16 = vpack.c.bf16 %v2317_v13, %v2316_v56  ;;  %v2504_v53 = vsub.f32 0.0, %v2441_v62 }
 0x473   : > { %v3230_v7 = vpop.eup %3229  ;;  %v2547_v52 = vmul.f32 1.442695, %v2504_v53  ;;  %2482 = vmatmul.bf16.gmra.mxu2 %v2334_v16 }
 0x474   : > { %v3232_v50 = vpop.eup %3231  ;;  %v2599_v2 = vadd.f32 1.0, %v3230_v7  ;;  %v2283_v63 = vpop.f32.mrf.mxu1 }
 0x475   : > { %2662 = vst [vmem:[%s4375_s17 + $0x48] sm:$0xff] %v3232_v50  ;;  %3233 = vpow2.f32 %v2547_v52  ;;  %v2284_v55 = vadd.f32 %v4300_v18, %v2283_v63 }
 0x476   : > { %3235 = vrcp.f32 %v2599_v2  ;;  %v2443_v17 = vpop.f32.mrf.mxu2 }
 0x477   : > { %v2444_v19 = vadd.f32 %v4364_v28, %v2443_v17  ;;  %v2318_v58 = vmax.f32 %v2284_v55, 0.0 }
 0x479   : > { %v2505_v4 = vsub.f32 0.0, %v2444_v19 }
 0x47b   : > { %v3234_v6 = vpop.eup %3233  ;;  %v2549_v12 = vmul.f32 1.442695, %v2505_v4 }
 0x47c   : > { %v3236_v47 = vpop.eup %3235  ;;  %v2600_v40 = vadd.f32 1.0, %v3234_v6  ;;  %v2285_v61 = vpop.f32.mrf.mxu1 }
 0x47d   : > { %2663 = vst [vmem:[%s4375_s17 + $0x50] sm:$0xff] %v3236_v47  ;;  %3237 = vpow2.f32 %v2549_v12  ;;  %v2286_v29 = vadd.f32 %v4300_v18, %v2285_v61 }
 0x47e   : > { %3239 = vrcp.f32 %v2600_v40  ;;  %v2445_v11 = vpop.f32.mrf.mxu2 }
 0x47f   : > { %v2319_v9 = vmax.f32 %v2286_v29, 0.0  ;;  %v2446_v20 = vadd.f32 %v4364_v28, %v2445_v11 }
 0x481   : > { %v2335_v32 = vpack.c.bf16 %v2319_v9, %v2318_v58  ;;  %v2506_v45 = vsub.f32 0.0, %v2446_v20 }
 0x483   : > { %v3238_v44 = vpop.eup %3237  ;;  %v2551_v49 = vmul.f32 1.442695, %v2506_v45  ;;  %2487 = vmatmul.bf16.gmra.mxu2 %v2335_v32 }
 0x484   : > { %v3240_v35 = vpop.eup %3239  ;;  %v2601_v36 = vadd.f32 1.0, %v3238_v44 }
 0x485   : > { %2664 = vst [vmem:[%s4375_s17 + $0x58] sm:$0xff] %v3240_v35  ;;  %3241 = vpow2.f32 %v2551_v49 }
 0x486   : > { %3243 = vrcp.f32 %v2601_v36  ;;  %v2448_v1 = vpop.f32.mrf.mxu2 }
 0x487   : > { %v2449_v18 = vadd.f32 %v4364_v28, %v2448_v1 }
 0x489   : > { %v2507_v26 = vsub.f32 0.0, %v2449_v18 }
 0x48b   : > { %v3242_v48 = vpop.eup %3241  ;;  %v2553_v0 = vmul.f32 1.442695, %v2507_v26 }
 0x48c   : > { %v3244_v51 = vpop.eup %3243  ;;  %v2602_v15 = vadd.f32 1.0, %v3242_v48 }
 0x48d   : > { %2665 = vst [vmem:[%s4375_s17 + $0x60] sm:$0xff] %v3244_v51  ;;  %3245 = vpow2.f32 %v2553_v0 }
 0x48e   : > { %3247 = vrcp.f32 %v2602_v15  ;;  %v2450_v57 = vpop.f32.mrf.mxu2 }
 0x48f   : > { %v2451_v39 = vadd.f32 %v4364_v28, %v2450_v57 }
 0x491   : > { %v2508_v14 = vsub.f32 0.0, %v2451_v39 }
 0x493   : > { %v3246_v59 = vpop.eup %3245  ;;  %v2555_v60 = vmul.f32 1.442695, %v2508_v14 }
 0x494   : > { %v3248_v33 = vpop.eup %3247  ;;  %v2603_v10 = vadd.f32 1.0, %v3246_v59 }
 0x495   : > { %2666 = vst [vmem:[%s4375_s17 + $0x68] sm:$0xff] %v3248_v33  ;;  %3249 = vpow2.f32 %v2555_v60 }
 0x496   : > { %3251 = vrcp.f32 %v2603_v10  ;;  %v2453_v42 = vpop.f32.mrf.mxu2 }
 0x497   : > { %v2454_v30 = vadd.f32 %v4364_v28, %v2453_v42 }
 0x499   : > { %v2509_v27 = vsub.f32 0.0, %v2454_v30 }
 0x49b   : > { %v3250_v25 = vpop.eup %3249  ;;  %v2557_v54 = vmul.f32 1.442695, %v2509_v27 }
 0x49c   : > { %v3252_v34 = vpop.eup %3251  ;;  %v2604_v22 = vadd.f32 1.0, %v3250_v25 }
 0x49d   : > { %2667 = vst [vmem:[%s4375_s17 + $0x70] sm:$0xff] %v3252_v34  ;;  %3253 = vpow2.f32 %v2557_v54 }
 0x49e   : > { %3255 = vrcp.f32 %v2604_v22  ;;  %v2455_v43 = vpop.f32.mrf.mxu2 }
 0x49f   : > { %v2456_v37 = vadd.f32 %v4364_v28, %v2455_v43 }
 0x4a1   : > { %v2510_v24 = vsub.f32 0.0, %v2456_v37 }
 0x4a3   : > { %v3254_v21 = vpop.eup %3253  ;;  %v2559_v3 = vmul.f32 1.442695, %v2510_v24 }
 0x4a4   : > { %v3256_v8 = vpop.eup %3255  ;;  %v2605_v41 = vadd.f32 1.0, %v3254_v21 }
 0x4a5   : > { %2668 = vst [vmem:[%s4375_s17 + $0x78] sm:$0xff] %v3256_v8  ;;  %3257 = vpow2.f32 %v2559_v3 }
 0x4a6   : > { %3259 = vrcp.f32 %v2605_v41  ;;  %v2458_v5 = vpop.f32.mrf.mxu2 }
 0x4a7   : > { %v2459_v46 = vadd.f32 %v4364_v28, %v2458_v5 }
 0x4a9   : > { %v2511_v31 = vsub.f32 0.0, %v2459_v46 }
 0x4ab   : > { %v3258_v23 = vpop.eup %3257  ;;  %v2561_v38 = vmul.f32 1.442695, %v2511_v31 }
 0x4ac   : > { %v3260_v56 = vpop.eup %3259  ;;  %v2606_v13 = vadd.f32 1.0, %v3258_v23 }
 0x4ad   : > { %2669 = vst [vmem:[%s4375_s17 + $0x80] sm:$0xff] %v3260_v56  ;;  %3261 = vpow2.f32 %v2561_v38 }
 0x4ae   : > { %3263 = vrcp.f32 %v2606_v13  ;;  %v2460_v62 = vpop.f32.mrf.mxu2 }
 0x4af   : > { %v2461_v16 = vadd.f32 %v4364_v28, %v2460_v62 }
 0x4b1   : > { %v2512_v53 = vsub.f32 0.0, %v2461_v16 }
 0x4b3   : > { %v3262_v7 = vpop.eup %3261  ;;  %v2563_v52 = vmul.f32 1.442695, %v2512_v53 }
 0x4b4   : > { %v3264_v50 = vpop.eup %3263  ;;  %v2607_v2 = vadd.f32 1.0, %v3262_v7 }
 0x4b5   : > { %2670 = vst [vmem:[%s4375_s17 + $0x88] sm:$0xff] %v3264_v50  ;;  %3265 = vpow2.f32 %v2563_v52 }
 0x4b6   : > { %3267 = vrcp.f32 %v2607_v2  ;;  %v2463_v63 = vpop.f32.mrf.mxu2 }
 0x4b7   : > { %v2464_v17 = vadd.f32 %v4364_v28, %v2463_v63 }
 0x4b9   : > { %v2513_v19 = vsub.f32 0.0, %v2464_v17 }
 0x4bb   : > { %v3266_v4 = vpop.eup %3265  ;;  %v2565_v6 = vmul.f32 1.442695, %v2513_v19 }
 0x4bc   : > { %v3268_v55 = vpop.eup %3267  ;;  %v2608_v12 = vadd.f32 1.0, %v3266_v4 }
 0x4bd   : > { %2671 = vst [vmem:[%s4375_s17 + $0x90] sm:$0xff] %v3268_v55  ;;  %3269 = vpow2.f32 %v2565_v6 }
 0x4be   : > { %3271 = vrcp.f32 %v2608_v12  ;;  %v2465_v47 = vpop.f32.mrf.mxu2 }
 0x4bf   : > { %v2466_v40 = vadd.f32 %v4364_v28, %v2465_v47 }
 0x4c1   : > { %v2514_v61 = vsub.f32 0.0, %v2466_v40 }
 0x4c3   : > { %v3270_v29 = vpop.eup %3269  ;;  %v2567_v11 = vmul.f32 1.442695, %v2514_v61 }
 0x4c4   : > { %v3272_v58 = vpop.eup %3271  ;;  %v2609_v9 = vadd.f32 1.0, %v3270_v29 }
 0x4c5   : > { %2672 = vst [vmem:[%s4375_s17 + $0x98] sm:$0xff] %v3272_v58  ;;  %3273 = vpow2.f32 %v2567_v11 }
 0x4c6   : > { %3275 = vrcp.f32 %v2609_v9  ;;  %v2468_v20 = vpop.f32.mrf.mxu2 }
 0x4c7   : > { %v2469_v32 = vadd.f32 %v4364_v28, %v2468_v20 }
 0x4c9   : > { %v2515_v45 = vsub.f32 0.0, %v2469_v32 }
 0x4cb   : > { %v3274_v44 = vpop.eup %3273  ;;  %v2569_v49 = vmul.f32 1.442695, %v2515_v45 }
 0x4cc   : > { %v3276_v35 = vpop.eup %3275  ;;  %v2610_v36 = vadd.f32 1.0, %v3274_v44 }
 0x4cd   : > { %2673 = vst [vmem:[%s4375_s17 + $0xa0] sm:$0xff] %v3276_v35  ;;  %3277 = vpow2.f32 %v2569_v49 }
 0x4ce   : > { %3279 = vrcp.f32 %v2610_v36  ;;  %v2470_v1 = vpop.f32.mrf.mxu2 }
 0x4cf   : > { %v2471_v18 = vadd.f32 %v4364_v28, %v2470_v1 }
 0x4d1   : > { %v2516_v26 = vsub.f32 0.0, %v2471_v18 }
 0x4d3   : > { %v3278_v48 = vpop.eup %3277  ;;  %v2571_v0 = vmul.f32 1.442695, %v2516_v26 }
 0x4d4   : > { %v3280_v51 = vpop.eup %3279  ;;  %v2611_v15 = vadd.f32 1.0, %v3278_v48 }
 0x4d5   : > { %2674 = vst [vmem:[%s4375_s17 + $0xa8] sm:$0xff] %v3280_v51  ;;  %3281 = vpow2.f32 %v2571_v0 }
 0x4d6   : > { %3283 = vrcp.f32 %v2611_v15  ;;  %v2473_v57 = vpop.f32.mrf.mxu2 }
 0x4d7   : > { %v2474_v39 = vadd.f32 %v4364_v28, %v2473_v57 }
 0x4d9   : > { %v2517_v14 = vsub.f32 0.0, %v2474_v39 }
 0x4db   : > { %v3282_v59 = vpop.eup %3281  ;;  %v2573_v60 = vmul.f32 1.442695, %v2517_v14 }
 0x4dc   : > { %v3284_v33 = vpop.eup %3283  ;;  %v2612_v10 = vadd.f32 1.0, %v3282_v59 }
 0x4dd   : > { %2675 = vst [vmem:[%s4375_s17 + $0xb0] sm:$0xff] %v3284_v33  ;;  %3285 = vpow2.f32 %v2573_v60 }
 0x4de   : > { %3287 = vrcp.f32 %v2612_v10  ;;  %v2475_v42 = vpop.f32.mrf.mxu2 }
 0x4df   : > { %v2476_v30 = vadd.f32 %v4364_v28, %v2475_v42 }
 0x4e1   : > { %v2518_v27 = vsub.f32 0.0, %v2476_v30 }
 0x4e3   : > { %v3286_v25 = vpop.eup %3285  ;;  %v2575_v54 = vmul.f32 1.442695, %v2518_v27 }
 0x4e4   : > { %v3288_v34 = vpop.eup %3287  ;;  %v2613_v22 = vadd.f32 1.0, %v3286_v25 }
 0x4e5   : > { %2676 = vst [vmem:[%s4375_s17 + $0xb8] sm:$0xff] %v3288_v34  ;;  %3289 = vpow2.f32 %v2575_v54 }
 0x4e6   : > { %3291 = vrcp.f32 %v2613_v22  ;;  %v2478_v43 = vpop.f32.mrf.mxu2 }
 0x4e7   : > { %v2479_v37 = vadd.f32 %v4364_v28, %v2478_v43 }
 0x4e9   : > { %v2519_v24 = vsub.f32 0.0, %v2479_v37 }
 0x4eb   : > { %v3290_v21 = vpop.eup %3289  ;;  %v2577_v3 = vmul.f32 1.442695, %v2519_v24 }
 0x4ec   : > { %v3292_v8 = vpop.eup %3291  ;;  %v2614_v41 = vadd.f32 1.0, %v3290_v21 }
 0x4ed   : > { %2677 = vst [vmem:[%s4375_s17 + $0xc0] sm:$0xff] %v3292_v8  ;;  %3293 = vpow2.f32 %v2577_v3 }
 0x4ee   : > { %3295 = vrcp.f32 %v2614_v41  ;;  %v2480_v5 = vpop.f32.mrf.mxu2 }
 0x4ef   : > { %v2481_v46 = vadd.f32 %v4364_v28, %v2480_v5 }
 0x4f1   : > { %v2520_v31 = vsub.f32 0.0, %v2481_v46 }
 0x4f3   : > { %v3294_v23 = vpop.eup %3293  ;;  %v2579_v38 = vmul.f32 1.442695, %v2520_v31 }
 0x4f4   : > { %v3296_v56 = vpop.eup %3295  ;;  %v2615_v13 = vadd.f32 1.0, %v3294_v23 }
 0x4f5   : > { %2678 = vst [vmem:[%s4375_s17 + $0xc8] sm:$0xff] %v3296_v56  ;;  %3297 = vpow2.f32 %v2579_v38 }
 0x4f6   : > { %3299 = vrcp.f32 %v2615_v13  ;;  %v2483_v62 = vpop.f32.mrf.mxu2 }
 0x4f7   : > { %v2484_v16 = vadd.f32 %v4364_v28, %v2483_v62 }
 0x4f9   : > { %v2521_v53 = vsub.f32 0.0, %v2484_v16 }
 0x4fb   : > { %v3298_v7 = vpop.eup %3297  ;;  %v2581_v52 = vmul.f32 1.442695, %v2521_v53 }
 0x4fc   : > { %v3300_v50 = vpop.eup %3299  ;;  %v2616_v2 = vadd.f32 1.0, %v3298_v7 }
 0x4fd   : > { %2679 = vst [vmem:[%s4375_s17 + $0xd0] sm:$0xff] %v3300_v50  ;;  %3301 = vpow2.f32 %v2581_v52 }
 0x4fe   : > { %3303 = vrcp.f32 %v2616_v2  ;;  %v2485_v63 = vpop.f32.mrf.mxu2 }
 0x4ff   : > { %v2486_v17 = vadd.f32 %v4364_v28, %v2485_v63 }
 0x501   : > { %v2522_v19 = vsub.f32 0.0, %v2486_v17 }
 0x503   : > { %v3302_v4 = vpop.eup %3301  ;;  %v2583_v6 = vmul.f32 1.442695, %v2522_v19 }
 0x504   : > { %v3304_v55 = vpop.eup %3303  ;;  %v2617_v12 = vadd.f32 1.0, %v3302_v4 }
 0x505   : > { %2680 = vst [vmem:[%s4375_s17 + $0xd8] sm:$0xff] %v3304_v55  ;;  %3305 = vpow2.f32 %v2583_v6 }
 0x506   : > { %3307 = vrcp.f32 %v2617_v12  ;;  %v2488_v47 = vpop.f32.mrf.mxu2 }
 0x507   : > { %v2489_v40 = vadd.f32 %v4364_v28, %v2488_v47 }
 0x509   : > { %v2523_v61 = vsub.f32 0.0, %v2489_v40 }
 0x50b   : > { %v3306_v29 = vpop.eup %3305  ;;  %v2585_v11 = vmul.f32 1.442695, %v2523_v61 }
 0x50c   : > { %v3308_v58 = vpop.eup %3307  ;;  %v2618_v9 = vadd.f32 1.0, %v3306_v29 }
 0x50d   : > { %2681 = vst [vmem:[%s4375_s17 + $0xe0] sm:$0xff] %v3308_v58  ;;  %3309 = vpow2.f32 %v2585_v11 }
 0x50e   : > { %3311 = vrcp.f32 %v2618_v9  ;;  %v2490_v20 = vpop.f32.mrf.mxu2 }
 0x50f   : > { %v2491_v32 = vadd.f32 %v4364_v28, %v2490_v20 }
 0x511   : > { %v2524_v45 = vsub.f32 0.0, %v2491_v32 }
 0x513   : > { %v3310_v44 = vpop.eup %3309  ;;  %v2587_v49 = vmul.f32 1.442695, %v2524_v45 }
 0x514   : > { %v3312_v35 = vpop.eup %3311  ;;  %v2619_v36 = vadd.f32 1.0, %v3310_v44 }
 0x515   : > { %2682 = vst [vmem:[%s4375_s17 + $0xe8] sm:$0xff] %v3312_v35  ;;  %3313 = vpow2.f32 %v2587_v49 }
 0x516   : > { %3315 = vrcp.f32 %v2619_v36 }
 0x51b   : > { %v3314_v1 = vpop.eup %3313 }
 0x51c   : > { %v3316_v18 = vpop.eup %3315  ;;  %v2620_v26 = vadd.f32 1.0, %v3314_v1 }
 0x51d   : > { %2683 = vst [vmem:[%s4375_s17 + $0xf0] sm:$0xff] %v3316_v18 }
 0x51e   : > { %3317 = vrcp.f32 %v2620_v26 }
 0x524   : > { %v3318_v48 = vpop.eup %3317 }
 0x525   : > { %2684 = vst [vmem:[%s4375_s17 + $0xf8] sm:$0xff] %v3318_v48 }
 0x526 PF: > { %s23_s25 = sadd.s32 1, %s3325_s25  }
 0x527   : > { %p20_p4 = scmp.ge.s32.totalorder %s23_s25, 6  }
 0x529   :  { %22 = sbr.rel (!%p20_p4) target bundleno = 1 (0x1), region = 108 }

</bundles_post_ra>
